<compile_context>
chip_gen: v5e
topology: v5e:2x2
jax: 0.10.0
libtpu: 0.0.40
codegen_flags: <defaults>
</compile_context>

<pallas_src>
import jax
import jax.numpy as jnp
from jax.experimental import pallas as pl
from jax.experimental.pallas import tpu as pltpu

NEG_SLOPE = 0.01                        # torch F.leaky_relu default
_HIGHEST = jax.lax.Precision.HIGHEST


def _leaky_relu(x):
    return jnp.where(x > 0, x, NEG_SLOPE * x)


def _mlp_block_body(x_ref, m_ref, w0_ref, b0_ref, wm_ref, bm_ref,
                    wl_ref, bl_ref, out_ref, num_mid):
    # x_ref: (d, bs) f32 resident; m_ref: (T, d, bs) int8 0/1 mask.
    x = x_ref[...]
    xm = jnp.where(m_ref[...] != 0, x[None, :, :], 0.0)        # (T, d, bs) f32

    # layer 0 (adjacency already folded into w0): h[t,i,b] = sum_j w0[t,i,j]*xm[t,j,b]
    h = jnp.einsum('tij,tjb->tib', w0_ref[...], xm,
                   precision=_HIGHEST,
                   preferred_element_type=jnp.float32) + b0_ref[...]
    h = _leaky_relu(h)

    # hidden layers 1 .. num_layers-1, batched over the T nodes of the block
    for l in range(num_mid):
        h = jnp.einsum('tij,tjb->tib', wm_ref[l], h,
                       precision=_HIGHEST,
                       preferred_element_type=jnp.float32) + bm_ref[l]
        h = _leaky_relu(h)

    # last layer (out_dim = 1, no nonlinearity): lane-broadcast mul + sublane reduce
    out_tb = jnp.sum(h * wl_ref[...], axis=1) + bl_ref[...]     # (T, bs)
    out_ref[0] = out_tb.astype(out_ref.dtype)


def _make_kernel(num_mid):
    if num_mid > 0:
        def kernel(x_ref, m_ref, w0_ref, b0_ref, wm_ref, bm_ref,
                   wl_ref, bl_ref, out_ref):
            _mlp_block_body(x_ref, m_ref, w0_ref, b0_ref, wm_ref, bm_ref,
                            wl_ref, bl_ref, out_ref, num_mid)
    else:
        def kernel(x_ref, m_ref, w0_ref, b0_ref, wl_ref, bl_ref, out_ref):
            _mlp_block_body(x_ref, m_ref, w0_ref, b0_ref, None, None,
                            wl_ref, bl_ref, out_ref, 0)
    return kernel


def _rup(x, m):
    return ((x + m - 1) // m) * m


def _vmem_plan():
    """(planning budget, vmem_limit_bytes) tuned per TPU generation."""
    try:
        cap = int(pltpu.get_tpu_info().vmem_capacity_bytes)
    except Exception:
        cap = 64 * 1024 * 1024            # conservative fallback: v7x-class 64 MiB part
    if cap >= 100 * 1024 * 1024:          # v5e / v6e: 128 MiB physical VMEM
        return 64 * 1024 * 1024, 96 * 1024 * 1024
    return 32 * 1024 * 1024, 48 * 1024 * 1024    # v7x: 64 MiB per TensorCore


def _choose_node_block(d, bs, hid, num_mid, vmem_budget):
    """Node-block size T and padded node count dp.

    Accounts for double-buffered input tiles (lane/sublane padding included),
    the in-kernel f32 masked-input temporary and the resident x block.  Splits
    the grid into >=2 'parallel' steps whenever possible (v7x megacore).
    """
    bs_l = _rup(bs, 128)                              # batch axis lane padding
    hid_s = _rup(hid, 8)
    per_node = (
        2 * _rup(d, 32) * bs_l                        # M tile, int8, 2 buffers
        + _rup(d, 8) * bs_l * 4                       # masked-input f32 temporary
        + 2 * hid_s * _rup(d, 128) * 4                # W0eff, 2 buffers
        + 2 * num_mid * hid_s * _rup(hid, 128) * 4    # mid-layer weights
        + 2 * (num_mid + 2) * hid_s * 128 * 4         # b0 / b_mid / w_last ((hid,1) lane-padded)
        + 2 * 128 * 4                                 # b_last
        + 3 * hid_s * bs_l * 4                        # hidden activations + matmul temps
        + 2 * bs_l * 4                                # output tile
    )
    resident = 2 * _rup(d, 8) * bs_l * 4              # resident x block
    avail = max(vmem_budget - resident, per_node * 8)
    cap = max(8, min(512, avail // per_node))
    if d <= cap:
        if d <= 8:
            return d, d                               # too small to split across cores
        t = min(cap, _rup((d + 1) // 2, 8))           # >=2 parallel grid steps
        return t, _rup(d, t)
    t = max(8, (cap // 8) * 8)                        # blocked: keep T a multiple of 8
    return t, _rup(d, t)


def mlp_gaussian_forward(x, M, adjacency, weights, biases, *,
                         num_layers, hid_dim):
    """Pallas implementation of MLPGaussianModule.forward.

    x: (bs, num_vars); M: (bs, num_vars, num_vars) sampled hard Gumbel
    adjacency; adjacency: (num_vars, num_vars); weights/biases: per-layer
    lists shaped as in the torch module.  Returns the stacked density
    parameters of shape (bs, num_vars, 1); torch's forward returns
    torch.unbind(out, 1) -- use `unbind_density_params` for the tuple form.
    """
    assert num_layers >= 1
    bs, d = x.shape
    hid = hid_dim
    num_mid = num_layers - 1

    vmem_budget, vmem_limit = _vmem_plan()
    t_blk, dp = _choose_node_block(d, bs, hid, num_mid, vmem_budget)
    n_blocks = dp // t_blk

    # ---- host-side (XLA) re-layouts: node-major, batch-on-lanes -------------
    x_t = jnp.transpose(x).astype(jnp.float32)                        # (d, bs)
    m_t = jnp.transpose(M, (2, 1, 0)).astype(jnp.int8)                # (d, d, bs) [t, j, b]
    # fold adjacency into W0: w0e[t, i, j] = W0[t, i, j] * adjacency[j, t]
    w0e = (weights[0]
           * jnp.transpose(adjacency)[:, None, :]).astype(jnp.float32)  # (d, hid, d)
    b0 = biases[0][:, :, None].astype(jnp.float32)                    # (d, hid, 1)
    wl = weights[num_layers][:, 0, :, None].astype(jnp.float32)       # (d, hid, 1)
    bl = biases[num_layers].astype(jnp.float32)                       # (d, 1)
    if num_mid > 0:
        wm = jnp.stack(weights[1:num_layers], axis=0).astype(jnp.float32)       # (nm, d, hid, hid)
        bm = jnp.stack(biases[1:num_layers],
                       axis=0)[:, :, :, None].astype(jnp.float32)               # (nm, d, hid, 1)

    pad = dp - d
    if pad:  # pad the node axis so it divides evenly into blocks (zeros are inert)
        m_t = jnp.pad(m_t, ((0, pad), (0, 0), (0, 0)))
        w0e = jnp.pad(w0e, ((0, pad), (0, 0), (0, 0)))
        b0 = jnp.pad(b0, ((0, pad), (0, 0), (0, 0)))
        wl = jnp.pad(wl, ((0, pad), (0, 0), (0, 0)))
        bl = jnp.pad(bl, ((0, pad), (0, 0)))
        if num_mid > 0:
            wm = jnp.pad(wm, ((0, 0), (0, pad), (0, 0), (0, 0)))
            bm = jnp.pad(bm, ((0, 0), (0, pad), (0, 0), (0, 0)))

    in_specs = [
        pl.BlockSpec((d, bs), lambda g: (0, 0)),                 # x (resident)
        # TODO(synk): sweep pipeline_mode=pl.Buffered(3) on the M spec once the
        # M DMA is confirmed as the sole long pole (costs one extra M tile).
        pl.BlockSpec((t_blk, d, bs), lambda g: (g, 0, 0)),       # M node block, int8
        pl.BlockSpec((t_blk, hid, d), lambda g: (g, 0, 0)),      # W0 (adjacency folded)
        pl.BlockSpec((t_blk, hid, 1), lambda g: (g, 0, 0)),      # b0
    ]
    args = [x_t, m_t, w0e, b0]
    if num_mid > 0:
        in_specs += [
            pl.BlockSpec((num_mid, t_blk, hid, hid), lambda g: (0, g, 0, 0)),
            pl.BlockSpec((num_mid, t_blk, hid, 1), lambda g: (0, g, 0, 0)),
        ]
        args += [wm, bm]
    in_specs += [
        pl.BlockSpec((t_blk, hid, 1), lambda g: (g, 0, 0)),      # W_last
        pl.BlockSpec((t_blk, 1), lambda g: (g, 0)),              # b_last
    ]
    args += [wl, bl]

    out = pl.pallas_call(
        _make_kernel(num_mid),
        out_shape=jax.ShapeDtypeStruct((n_blocks, t_blk, bs), jnp.float32),
        grid_spec=pltpu.PrefetchScalarGridSpec(
            num_scalar_prefetch=0,
            grid=(n_blocks,),
            in_specs=in_specs,
            out_specs=pl.BlockSpec((1, t_blk, bs), lambda g: (g, 0, 0)),
        ),
        compiler_params=pltpu.CompilerParams(
            dimension_semantics=("parallel",),
            vmem_limit_bytes=vmem_limit,
        ),
    )(*args)

    # (n_blocks, T, bs) -> (num_vars, bs) -> (bs, num_vars, 1) slab
    out = jnp.transpose(out.reshape(dp, bs)[:d], (1, 0))[:, :, None]
    return out


def unbind_density_params(out):
    """torch.unbind(x, 1): tuple of num_vars tensors of shape (bs, 1)."""
    return tuple(out[:, t, :] for t in range(out.shape[1]))


# ---------------------------------------------------------------------------
# Parameter construction (deterministic, mirrors __init__ shapes/init intent)
# ---------------------------------------------------------------------------
def build_params(key, num_vars, num_layers, hid_dim):
    gain = (2.0 / (1.0 + NEG_SLOPE ** 2)) ** 0.5     # calculate_gain('leaky_relu')
    weights, biases = [], []
    for i in range(num_layers + 1):
        in_dim = hid_dim if i != 0 else num_vars
        out_dim = hid_dim if i != num_layers else 1
        key, sub = jax.random.split(key)
        bound = gain * (6.0 / (in_dim + out_dim)) ** 0.5   # per-node xavier_uniform
        w = jax.random.uniform(sub, (num_vars, out_dim, in_dim),
                               minval=-bound, maxval=bound, dtype=jnp.float32)
        b = jnp.zeros((num_vars, out_dim), jnp.float32)
        weights.append(w)
        biases.append(b)
    return weights, biases, key


def sample_gumbel_adjacency(key, bs, num_vars, log_alpha, tau=1.0):
    # gumbel_sigmoid(..., hard=True): forward value is the hard 0/1 sample.
    # TODO(synk): no straight-through gradient path (forward semantics only).
    u = jax.random.uniform(key, (bs, num_vars, num_vars),
                           minval=1e-6, maxval=1.0 - 1e-6, dtype=jnp.float32)
    logistic = jnp.log(u) - jnp.log(1.0 - u)
    y_soft = jax.nn.sigmoid((log_alpha[None, :, :] + logistic) / tau)
    return (y_soft > 0.5).astype(jnp.float32)


# ---------------------------------------------------------------------------
# Pure-JAX reference of the torch forward (for correctness check)
# ---------------------------------------------------------------------------
def ref_forward(x, M, adjacency, weights, biases, num_layers):
    h = jnp.einsum('tij,bjt,jt,bj->bti', weights[0], M, adjacency, x,
                   precision=_HIGHEST) + biases[0][None]
    h = jnp.where(h > 0, h, NEG_SLOPE * h)
    for l in range(1, num_layers + 1):
        h = jnp.einsum('tij,btj->bti', weights[l], h,
                       precision=_HIGHEST) + biases[l][None]
        if l != num_layers:
            h = jnp.where(h > 0, h, NEG_SLOPE * h)
    return h  # (bs, num_vars, 1)


if __name__ == "__main__":
    # TODO(synk): zero_weights_ratio / numel_weights bookkeeping (Python-side
    # statistics in the torch module) is not reproduced.
    def run_case(seed, num_vars, num_layers, hid_dim, bs, log_alpha_val):
        key = jax.random.PRNGKey(seed)
        weights, biases, key = build_params(key, num_vars, num_layers, hid_dim)
        adjacency = (jnp.ones((num_vars, num_vars), jnp.float32)
                     - jnp.eye(num_vars, dtype=jnp.float32))
        log_alpha = jnp.full((num_vars, num_vars), log_alpha_val, jnp.float32)

        key, kx, km = jax.random.split(key, 3)
        x = jax.random.normal(kx, (bs, num_vars), jnp.float32)
        M = sample_gumbel_adjacency(km, bs, num_vars, log_alpha)

        out = mlp_gaussian_forward(x, M, adjacency, weights, biases,
                                   num_layers=num_layers, hid_dim=hid_dim)
        out = jax.block_until_ready(out)

        ref = ref_forward(x, M, adjacency, weights, biases, num_layers)
        assert out.shape == (bs, num_vars, 1)
        density_params = unbind_density_params(out)
        assert len(density_params) == num_vars
        assert all(p.shape == (bs, 1) for p in density_params)
        err = float(jnp.max(jnp.abs(out - ref)))
        # tolerance covers MXU f32 accumulation-order differences only
        assert jnp.allclose(out, ref, atol=1e-4, rtol=1e-4), err

    # case 1: single node block, one mid layer (DCDI-style log_alpha init = 5)
    run_case(0, num_vars=8, num_layers=2, hid_dim=32, bs=8, log_alpha_val=5.0)
    # case 2: 2-block grid with node padding, no mid layers, mixed 0/1 mask
    run_case(0, num_vars=20, num_layers=1, hid_dim=16, bs=16, log_alpha_val=0.0)

    print("KERNEL_OK")
</pallas_src>

<mosaic_0001>
module attributes {stable_mosaic.version = 11 : i64} {
  func.func @kernel(%arg0: i32, %arg1: memref<8x8xf32, #tpu.memory_space<vmem>>, %arg2: memref<8x8x8xi8, #tpu.memory_space<vmem>>, %arg3: memref<8x32x8xf32, #tpu.memory_space<vmem>>, %arg4: memref<8x32x1xf32, #tpu.memory_space<vmem>>, %arg5: memref<1x8x32x32xf32, #tpu.memory_space<vmem>>, %arg6: memref<1x8x32x1xf32, #tpu.memory_space<vmem>>, %arg7: memref<8x32x1xf32, #tpu.memory_space<vmem>>, %arg8: memref<8x1xf32, #tpu.memory_space<vmem>>, %arg9: memref<1x8x8xf32, #tpu.memory_space<vmem>>) attributes {dimension_semantics = [#tpu.dimension_semantics<parallel>], iteration_bounds = array<i64: 1>, scalar_prefetch = 0 : i64, scratch_operands = 0 : i64, tpu.core_type = #tpu.core_type<tc>, window_params = [{pipeline_mode = #tpu.pipeline_mode<synchronous>, transform_indices = @transform_0, window_bounds = array<i64: 8, 8>}, {transform_indices = @transform_1, window_bounds = array<i64: 8, 8, 8>}, {transform_indices = @transform_2, window_bounds = array<i64: 8, 32, 8>}, {transform_indices = @transform_3, window_bounds = array<i64: 8, 32, 1>}, {transform_indices = @transform_4, window_bounds = array<i64: 1, 8, 32, 32>}, {transform_indices = @transform_5, window_bounds = array<i64: 1, 8, 32, 1>}, {transform_indices = @transform_6, window_bounds = array<i64: 8, 32, 1>}, {transform_indices = @transform_7, window_bounds = array<i64: 8, 1>}, {transform_indices = @transform_8, window_bounds = array<i64: 1, 8, 8>}]} {
    %c0 = arith.constant 0 : index
    %c0_0 = arith.constant 0 : index
    %0 = vector.load %arg1[%c0, %c0_0] : memref<8x8xf32, #tpu.memory_space<vmem>>, vector<8x8xf32>
    %c0_1 = arith.constant 0 : index
    %c0_2 = arith.constant 0 : index
    %c0_3 = arith.constant 0 : index
    %1 = vector.load %arg2[%c0_1, %c0_2, %c0_3] : memref<8x8x8xi8, #tpu.memory_space<vmem>>, vector<8x8x8xi8>
    %c0_i8 = arith.constant 0 : i8
    %2 = vector.broadcast %c0_i8 : i8 to vector<8x8x8xi8>
    %3 = arith.cmpi ne, %1, %2 : vector<8x8x8xi8>
    %4 = vector.shape_cast %0 : vector<8x8xf32> to vector<1x8x8xf32>
    %cst = arith.constant 0.000000e+00 : f32
    %5 = vector.shape_cast %4 : vector<1x8x8xf32> to vector<1x8x8xf32>
    %6 = vector.broadcast %5 : vector<1x8x8xf32> to vector<8x8x8xf32>
    %7 = vector.broadcast %cst : f32 to vector<8x8x8xf32>
    %8 = arith.select %3, %6, %7 : vector<8x8x8xi1>, vector<8x8x8xf32>
    %c0_4 = arith.constant 0 : index
    %c0_5 = arith.constant 0 : index
    %c0_6 = arith.constant 0 : index
    %9 = vector.load %arg3[%c0_4, %c0_5, %c0_6] : memref<8x32x8xf32, #tpu.memory_space<vmem>>, vector<8x32x8xf32>
    "tpu.trace_start"() <{level = 10 : i32, message = "tij,tjb->tib"}> : () -> ()
    %cst_7 = arith.constant dense<0.000000e+00> : vector<8x32x8xf32>
    %10 = tpu.matmul %9, %8, %cst_7 {dimension_numbers = #tpu.dot_dimension_numbers<[2], [1], [1], [2], [0, 0, 0, 1, 1, 2], [0], [0]>, precision = #tpu.contract_precision<fp32>} : vector<8x32x8xf32>, vector<8x8x8xf32>, vector<8x32x8xf32> -> vector<8x32x8xf32>
    "tpu.trace_stop"() : () -> ()
    %c0_8 = arith.constant 0 : index
    %c0_9 = arith.constant 0 : index
    %c0_10 = arith.constant 0 : index
    %11 = vector.load %arg4[%c0_8, %c0_9, %c0_10] : memref<8x32x1xf32, #tpu.memory_space<vmem>>, vector<8x32x1xf32>
    %12 = vector.broadcast %11 : vector<8x32x1xf32> to vector<8x32x8xf32>
    %13 = arith.addf %10, %12 : vector<8x32x8xf32>
    %cst_11 = arith.constant 0.000000e+00 : f32
    %14 = vector.broadcast %cst_11 : f32 to vector<8x32x8xf32>
    %15 = arith.cmpf ogt, %13, %14 : vector<8x32x8xf32>
    %cst_12 = arith.constant 0.00999999977 : f32
    %16 = vector.broadcast %cst_12 : f32 to vector<8x32x8xf32>
    %17 = arith.mulf %16, %13 : vector<8x32x8xf32>
    %18 = arith.select %15, %13, %17 : vector<8x32x8xi1>, vector<8x32x8xf32>
    %c0_13 = arith.constant 0 : index
    %c0_14 = arith.constant 0 : index
    %c0_15 = arith.constant 0 : index
    %c0_16 = arith.constant 0 : index
    %19 = vector.load %arg5[%c0_13, %c0_14, %c0_15, %c0_16] : memref<1x8x32x32xf32, #tpu.memory_space<vmem>>, vector<1x8x32x32xf32>
    %20 = vector.shape_cast %19 : vector<1x8x32x32xf32> to vector<8x32x32xf32>
    "tpu.trace_start"() <{level = 10 : i32, message = "tij,tjb->tib"}> : () -> ()
    %cst_17 = arith.constant dense<0.000000e+00> : vector<8x32x8xf32>
    %21 = tpu.matmul %20, %18, %cst_17 {dimension_numbers = #tpu.dot_dimension_numbers<[2], [1], [1], [2], [0, 0, 0, 1, 1, 2], [0], [0]>, precision = #tpu.contract_precision<fp32>} : vector<8x32x32xf32>, vector<8x32x8xf32>, vector<8x32x8xf32> -> vector<8x32x8xf32>
    "tpu.trace_stop"() : () -> ()
    %c0_18 = arith.constant 0 : index
    %c0_19 = arith.constant 0 : index
    %c0_20 = arith.constant 0 : index
    %c0_21 = arith.constant 0 : index
    %22 = vector.load %arg6[%c0_18, %c0_19, %c0_20, %c0_21] : memref<1x8x32x1xf32, #tpu.memory_space<vmem>>, vector<1x8x32x1xf32>
    %23 = vector.shape_cast %22 : vector<1x8x32x1xf32> to vector<8x32x1xf32>
    %24 = vector.broadcast %23 : vector<8x32x1xf32> to vector<8x32x8xf32>
    %25 = arith.addf %21, %24 : vector<8x32x8xf32>
    %cst_22 = arith.constant 0.000000e+00 : f32
    %26 = vector.broadcast %cst_22 : f32 to vector<8x32x8xf32>
    %27 = arith.cmpf ogt, %25, %26 : vector<8x32x8xf32>
    %cst_23 = arith.constant 0.00999999977 : f32
    %28 = vector.broadcast %cst_23 : f32 to vector<8x32x8xf32>
    %29 = arith.mulf %28, %25 : vector<8x32x8xf32>
    %30 = arith.select %27, %25, %29 : vector<8x32x8xi1>, vector<8x32x8xf32>
    %c0_24 = arith.constant 0 : index
    %c0_25 = arith.constant 0 : index
    %c0_26 = arith.constant 0 : index
    %31 = vector.load %arg7[%c0_24, %c0_25, %c0_26] : memref<8x32x1xf32, #tpu.memory_space<vmem>>, vector<8x32x1xf32>
    %32 = vector.broadcast %31 : vector<8x32x1xf32> to vector<8x32x8xf32>
    %33 = arith.mulf %30, %32 : vector<8x32x8xf32>
    %cst_27 = arith.constant dense<0.000000e+00> : vector<8x8xf32>
    %34 = vector.multi_reduction <add>, %33, %cst_27 [1] : vector<8x32x8xf32> to vector<8x8xf32>
    %c0_28 = arith.constant 0 : index
    %c0_29 = arith.constant 0 : index
    %35 = vector.load %arg8[%c0_28, %c0_29] : memref<8x1xf32, #tpu.memory_space<vmem>>, vector<8x1xf32>
    %36 = vector.broadcast %35 : vector<8x1xf32> to vector<8x8xf32>
    %37 = arith.addf %34, %36 : vector<8x8xf32>
    %c0_30 = arith.constant 0 : index
    %c0_31 = arith.constant 0 : index
    %c0_32 = arith.constant 0 : index
    %38 = vector.load %arg9[%c0_30, %c0_31, %c0_32] : memref<1x8x8xf32, #tpu.memory_space<vmem>>, vector<1x8x8xf32>
    %39 = vector.shape_cast %38 : vector<1x8x8xf32> to vector<8x8xf32>
    %40 = vector.shape_cast %37 : vector<8x8xf32> to vector<1x8x8xf32>
    tpu.vector_store %arg9[%c0_30, %c0_31, %c0_32], %40 {strides = array<i32>} : memref<1x8x8xf32, #tpu.memory_space<vmem>>, vector<1x8x8xf32>,
    return
  }
  func.func @transform_0(%arg0: i32) -> (i32, i32) {
    %c0_i32 = arith.constant 0 : i32
    %c0_i32_0 = arith.constant 0 : i32
    %c0_i32_1 = arith.constant 0 : i32
    return %c0_i32, %c0_i32_0 : i32, i32
  }
  func.func @transform_1(%arg0: i32) -> (i32, i32, i32) {
    %c0_i32 = arith.constant 0 : i32
    %c0_i32_0 = arith.constant 0 : i32
    %c0_i32_1 = arith.constant 0 : i32
    return %arg0, %c0_i32, %c0_i32_0 : i32, i32, i32
  }
  func.func @transform_2(%arg0: i32) -> (i32, i32, i32) {
    %c0_i32 = arith.constant 0 : i32
    %c0_i32_0 = arith.constant 0 : i32
    %c0_i32_1 = arith.constant 0 : i32
    return %arg0, %c0_i32, %c0_i32_0 : i32, i32, i32
  }
  func.func @transform_3(%arg0: i32) -> (i32, i32, i32) {
    %c0_i32 = arith.constant 0 : i32
    %c0_i32_0 = arith.constant 0 : i32
    %c0_i32_1 = arith.constant 0 : i32
    return %arg0, %c0_i32, %c0_i32_0 : i32, i32, i32
  }
  func.func @transform_4(%arg0: i32) -> (i32, i32, i32, i32) {
    %c0_i32 = arith.constant 0 : i32
    %c0_i32_0 = arith.constant 0 : i32
    %c0_i32_1 = arith.constant 0 : i32
    %c0_i32_2 = arith.constant 0 : i32
    return %c0_i32, %arg0, %c0_i32_0, %c0_i32_1 : i32, i32, i32, i32
  }
  func.func @transform_5(%arg0: i32) -> (i32, i32, i32, i32) {
    %c0_i32 = arith.constant 0 : i32
    %c0_i32_0 = arith.constant 0 : i32
    %c0_i32_1 = arith.constant 0 : i32
    %c0_i32_2 = arith.constant 0 : i32
    return %c0_i32, %arg0, %c0_i32_0, %c0_i32_1 : i32, i32, i32, i32
  }
  func.func @transform_6(%arg0: i32) -> (i32, i32, i32) {
    %c0_i32 = arith.constant 0 : i32
    %c0_i32_0 = arith.constant 0 : i32
    %c0_i32_1 = arith.constant 0 : i32
    return %arg0, %c0_i32, %c0_i32_0 : i32, i32, i32
  }
  func.func @transform_7(%arg0: i32) -> (i32, i32) {
    %c0_i32 = arith.constant 0 : i32
    %c0_i32_0 = arith.constant 0 : i32
    return %arg0, %c0_i32 : i32, i32
  }
  func.func @transform_8(%arg0: i32) -> (i32, i32, i32) {
    %c0_i32 = arith.constant 0 : i32
    %c0_i32_0 = arith.constant 0 : i32
    %c0_i32_1 = arith.constant 0 : i32
    return %arg0, %c0_i32, %c0_i32_0 : i32, i32, i32
  }
}

</mosaic_0001>

<bundles_post_ra>
// kernel: tpu_custom_call.1
= control target key start
LH: loop header
LB: loop body
LE: loop exit
PB: predicated region body
PF: predicated region fallthrough
CT: control target
= control target key end

     0   :  { %vm305_vm0 = vcmask 64512   ;;  %v5486_v2 = vmov 0   ;;  %s7976_s0 = inlined_call_operand.vmem [shape: f32[8,8], index: 0, kind: input, shape index: {}]   ;;  %s7977_s1 = inlined_call_operand.vmem [shape: s8[8,8,8], index: 1, kind: input, shape index: {}]   ;;  %s7978_s2 = inlined_call_operand.vmem [shape: f32[8,32,8], index: 2, kind: input, shape index: {}]   ;;  %s7979_s3 = inlined_call_operand.vmem [shape: f32[8,32,1], index: 3, kind: input, shape index: {}]   ;;  %s7980_s4 = inlined_call_operand.vmem [shape: f32[1,8,32,32], index: 4, kind: input, shape index: {}]   ;;  %s7981_s5 = inlined_call_operand.vmem [shape: f32[1,8,32,1], index: 5, kind: input, shape index: {}]   ;;  %s7982_s6 = inlined_call_operand.vmem [shape: f32[8,32,1], index: 6, kind: input, shape index: {}]   ;;  %s7983_s7 = inlined_call_operand.vmem [shape: f32[8,1], index: 7, kind: input, shape index: {}]   ;;  %s7984_s8 = inlined_call_operand.hbm [shape: f32[1,8,8], index: 8, kind: output, shape index: {}]  }
   0x1   :  { %v114_v0 = vld [vmem:[%s7979_s3 + $0x8] sm:$0xff]  ;;  %v116_v1 = vld [vmem:[%s7979_s3 + $0x18] sm:$0xff]  ;;  %5457 = vset.pattern.permute.xlu1 %v5486_v2  ;;  %5456 = vset.pattern.permute.xlu0 %v5486_v2  ;;  %v33_v3 = vld [vmem:[%s7977_s1] sm:$0x3] }
   0x2   :  { %152 = vperm.xlu1 %5457, %v114_v0   ;;  %162 = vperm.xlu0 %5456, %v116_v1   ;;  %vm41_vm1 = vnez %v33_v3  ;;  %v81_v4 = vld [vmem:[%s7978_s2] sm:$0xff]  ;;  %v82_v8 = vld [vmem:[%s7978_s2 + $0x8] sm:$0xff]  ;;  %v83_v14 = vld [vmem:[%s7978_s2 + $0x10] sm:$0xff] }
   0x3   :  { %v34_v5 = vld [vmem:[%s7977_s1 + $0x2] sm:$0x3]  ;;  %v49_v6 = vsel %vm41_vm1, 16843009, %v5486_v2  ;;  %v307_v7 = vsel %vm305_vm0, %v81_v4, 0  ;;  %5458 = vset.pattern.permute.xlu2 %v5486_v2  ;;  %v310_v13 = vsel %vm305_vm0, %v82_v8, 0 }
   0x4   :  { %vm42_vm2 = vnez %v34_v5  ;;  %v5559_v9 = vld [vmem:[%s7976_s0] sm:$0xff]  ;;  %v57_v10 = vunpack.c.0.s8 %v49_v6  ;;  %v5561_v11 = vand.u32 4294901760, %v307_v7  ;;  %v5568_v16 = vand.u32 4294901760, %v310_v13  ;;  %v120_v18 = vld [vmem:[%s7979_s3 + $0x38] sm:$0xff] }
   0x5   :  { %v50_v12 = vsel %vm42_vm2, 16843009, %v5486_v2  ;;  %v113_v20 = vld [vmem:[%s7979_s3] sm:$0xff]  ;;  %v313_v22 = vsel %vm305_vm0, %v83_v14, 0  ;;  %182 = vperm.xlu2 %5458, %v120_v18  }
   0x6   :  { %v58_v15 = vunpack.c.0.s8 %v50_v12  ;;  %vm65_vm3 = vcmp.ne.s32.totalorder %v57_v10, 0  ;;  %v336_v17 = vsub.f32 %v307_v7, %v5561_v11  ;;  %v344_v21 = vsub.f32 %v310_v13, %v5568_v16 }
   0x7   :  { %v73_v19 = vsel %vm65_vm3, %v5559_v9, 0.0 }
   0x8   :  { %vm66_vm4 = vcmp.ne.s32.totalorder %v58_v15, 0 }
   0x9   :  { %13 = vsyncpa [#allocation3], 0  ;;  %v333_v23 = vand.u32 4294901760, %v73_v19  ;;  %v115_v24 = vld [vmem:[%s7979_s3 + $0x10] sm:$0xff]  ;;  %v337_v25 = vand.u32 4294901760, %v336_v17  ;;  %v74_v26 = vsel %vm66_vm4, %v5559_v9, 0.0 }
   0xa   :  { %v584_v27 = vand.u32 4294901760, %v74_v26  ;;  %147 = vperm.xlu1 %5457, %v113_v20   ;;  %v345_v30 = vand.u32 4294901760, %v344_v21  ;;  %v5584_v31 = vand.u32 4294901760, %v313_v22  ;;  %157 = vperm.xlu0 %5456, %v115_v24   ;;  %v84_v35 = vld [vmem:[%s7978_s2 + $0x18] sm:$0xff]  ;;  %v119_v40 = vld [vmem:[%s7979_s3 + $0x30] sm:$0xff]  ;;  %v117_v42 = vld [vmem:[%s7979_s3 + $0x20] sm:$0xff] }
   0xb   :  { %461 = vmatpush.msra.mxu3 %v333_v23  ;;  %v384_v28 = vsub.f32 %v73_v19, %v333_v23  ;;  %v338_v29 = vsub.f32 %v336_v17, %v337_v25  ;;  %334 = vmatpush.msra.mxu0 %v333_v23  ;;  %v316_v43 = vsel %vm305_vm0, %v84_v35, 0  ;;  %v118_v45 = vld [vmem:[%s7979_s3 + $0x28] sm:$0xff]  ;;  %v85_v50 = vld [vmem:[%s7978_s2 + $0x20] sm:$0xff]  ;;  %v123_v55 = vld [vmem:[%s7979_s3 + $0x50] sm:$0xff] }
   0xc   :  { %465 = vmatmul.f32.vlgmr.msra.gmra.mxu3 %v337_v25  ;;  %v635_v32 = vsub.f32 %v74_v26, %v584_v27  ;;  %v346_v38 = vsub.f32 %v344_v21, %v345_v30  ;;  %v352_v39 = vsub.f32 %v313_v22, %v5584_v31  ;;  %v5600_v49 = vand.u32 4294901760, %v316_v43  ;;  %v121_v54 = vld [vmem:[%s7979_s3 + $0x40] sm:$0xff]  ;;  %v122_v56 = vld [vmem:[%s7979_s3 + $0x48] sm:$0xff]  ;;  %v124_v0 = vld [vmem:[%s7979_s3 + $0x58] sm:$0xff] }
   0xd   :  { %423 = vmatpush.msra.mxu2 %v384_v28  ;;  %v339_v33 = vand.u32 4294901760, %v338_v29  ;;  %v385_v34 = vand.u32 4294901760, %v384_v28  ;;  %177 = vperm.xlu2 %5458, %v119_v40   ;;  %v558_v53 = vsel %vm305_vm0, %v85_v50, 0  ;;  %v86_v60 = vld [vmem:[%s7978_s2 + $0x28] sm:$0xff]  ;;  %v125_v3 = vld [vmem:[%s7979_s3 + $0x60] sm:$0xff]  ;;  %v87_v7 = vld [vmem:[%s7978_s2 + $0x30] sm:$0xff] }
   0xe   :  { %426 = vmatmul.f32.vlgmr.msra.gmra.mxu2 %v336_v17  ;;  %v636_v36 = vand.u32 4294901760, %v635_v32  ;;  %v347_v47 = vand.u32 4294901760, %v346_v38  ;;  %v353_v48 = vand.u32 4294901760, %v352_v39  ;;  %v360_v52 = vsub.f32 %v316_v43, %v5600_v49  ;;  %v126_v1 = vld [vmem:[%s7979_s3 + $0x68] sm:$0xff]  ;;  %v127_v13 = vld [vmem:[%s7979_s3 + $0x70] sm:$0xff]  ;;  %v129_v14 = vld [vmem:[%s7979_s3 + $0x80] sm:$0xff] }
   0xf   :  { %340 = vmatmul.f32.vlgmr.msra.gmra.mxu0 %v339_v33  ;;  %585 = vmatpush.msrb.mxu2 %v584_v27  ;;  %v386_v37 = vsub.f32 %v384_v28, %v385_v34  ;;  %v5617_v57 = vand.u32 4294901760, %v558_v53  ;;  %v561_v63 = vsel %vm305_vm0, %v86_v60, 0  ;;  %v564_v12 = vsel %vm305_vm0, %v87_v7, 0  ;;  %v128_v15 = vld [vmem:[%s7979_s3 + $0x78] sm:$0xff]  ;;  %v130_v24 = vld [vmem:[%s7979_s3 + $0x88] sm:$0xff]  ;;  %v133_v38 = vld [vmem:[%s7979_s3 + $0xa0] sm:$0xff] }
  0x10   :  { %505 = vmatpush.msrb.mxu0 %v385_v34  ;;  %v637_v41 = vsub.f32 %v635_v32, %v636_v36  ;;  %v354_v51 = vsub.f32 %v352_v39, %v353_v48  ;;  %v361_v59 = vand.u32 4294901760, %v360_v52  ;;  %v5637_v5 = vand.u32 4294901760, %v561_v63  ;;  %v88_v20 = vld [vmem:[%s7978_s2 + $0x38] sm:$0xff]  ;;  %v35_v25 = vld [vmem:[%s7977_s1 + $0x4] sm:$0x3]  ;;  %v134_v40 = vld [vmem:[%s7979_s3 + $0xa8] sm:$0xff] }
  0x11   :  { %v387_v44 = vand.u32 4294901760, %v386_v37  ;;  %756 = vmatpush.msra.mxu2 %v636_v36  ;;  %v5624_v61 = vsub.f32 %v558_v53, %v5617_v57  ;;  %v5660_v19 = vand.u32 4294901760, %v564_v12  ;;  %v132_v26 = vld [vmem:[%s7979_s3 + $0x98] sm:$0xff]  ;;  %vm43_vm5 = vnez %v35_v25 }
  0x12   :  { %674 = vmatpush.msra.mxu0 %v635_v32  ;;  %v638_v46 = vand.u32 4294901760, %v637_v41  ;;  %167 = vperm.xlu1 %5457, %v117_v42   ;;  %v355_v58 = vand.u32 4294901760, %v354_v51  ;;  %v362_v62 = vsub.f32 %v360_v52, %v361_v59  ;;  %v5647_v10 = vsub.f32 %v561_v63, %v5637_v5  ;;  %v139_v51 = vld [vmem:[%s7979_s3 + $0xd0] sm:$0xff]  ;;  %v140_v53 = vld [vmem:[%s7979_s3 + $0xd8] sm:$0xff] }
  0x13   :  { %388 = vmatpush.msra.mxu1 %v387_v44  ;;  %172 = vperm.xlu0 %5456, %v118_v45   ;;  %v588_v4 = vand.u32 4294901760, %v5624_v61  ;;  %v5671_v22 = vsub.f32 %v564_v12, %v5660_v19  ;;  %v51_v28 = vsel %vm43_vm5, 16843009, %v5486_v2  ;;  %v2445_v12 = vld [vmem:[%s7981_s5 + $0x18] sm:$0xff] }
  0x14   :  { %639 = vmatpush.msrb.mxu3 %v638_v46  ;;  %390 = vmatmul.f32.vlgmr.msra.gmra.mxu1 %v5561_v11  ;;  %v363_v6 = vand.u32 4294901760, %v362_v62  ;;  %v596_v18 = vand.u32 4294901760, %v5647_v10  ;;  %v59_v33 = vunpack.c.0.s8 %v51_v28  ;;  %v2444_v62 = vld [vmem:[%s7981_s5 + $0x10] sm:$0xff]  ;;  %v92_v28 = vld [vmem:[%s7978_s2 + $0x58] sm:$0xff] }
  0x15   :  { %471 = vmatmul.f32.gmra.mxu3 %v345_v30  ;;  %539 = vmatpush.msrb.mxu1 %v333_v23  ;;  %v589_v8 = vsub.f32 %v5624_v61, %v588_v4  ;;  %v567_v23 = vsel %vm305_vm0, %v88_v20, 0  ;;  %v604_v30 = vand.u32 4294901760, %v5671_v22 }
  0x16   :  { %431 = vmatmul.f32.gmra.mxu2 %v344_v21  ;;  %790 = vmatpush.msra.mxu3 %v584_v27  ;;  %v597_v21 = vsub.f32 %v5647_v10, %v596_v18  ;;  %v5689_v32 = vand.u32 4294901760, %v567_v23  ;;  %vm67_vm6 = vcmp.ne.s32.totalorder %v59_v33, 0  ;;  %v2453_v33 = vld [vmem:[%s7981_s5 + $0x58] sm:$0xff] }
  0x17   :  { %348 = vmatmul.f32.gmra.mxu0 %v347_v47  ;;  %712 = vmatpush.msra.mxu1 %v584_v27  ;;  %v590_v17 = vand.u32 4294901760, %v589_v8  ;;  %v131_v27 = vld [vmem:[%s7979_s3 + $0x90] sm:$0xff]  ;;  %v75_v34 = vsel %vm67_vm6, %v5559_v9, 0.0  ;;  %v605_v35 = vsub.f32 %v5671_v22, %v604_v30  ;;  %v136_v47 = vld [vmem:[%s7979_s3 + $0xb8] sm:$0xff] }
  0x18   :  { %187 = vperm.xlu2 %5458, %v121_v54   ;;  %v598_v29 = vand.u32 4294901760, %v597_v21  ;;  %v5698_v36 = vsub.f32 %v567_v23, %v5689_v32  ;;  %v835_v37 = vand.u32 4294901760, %v75_v34  ;;  %v36_v54 = vld [vmem:[%s7977_s1 + $0x6] sm:$0x3]  ;;  %v2448_v21 = vld [vmem:[%s7981_s5 + $0x30] sm:$0xff] }
  0x19   :  { %v606_v41 = vand.u32 4294901760, %v605_v35  ;;  %vm44_vm7 = vnez %v36_v54  ;;  %v2452_v35 = vld [vmem:[%s7981_s5 + $0x50] sm:$0xff] }
  0x1a   :  { %197 = vperm.xlu1 %5457, %v123_v55   ;;  %v612_v42 = vand.u32 4294901760, %v5698_v36  ;;  %v144_v55 = vld [vmem:[%s7979_s3 + $0xf8] sm:$0xff] }
  0x1b   :  { %192 = vperm.xlu0 %5456, %v122_v56   ;;  %v52_v56 = vsel %vm44_vm7, 16843009, %v5486_v2 }
  0x1c   :  { %394 = vmatmul.f32.gmra.mxu1 %v5568_v16  ;;  %v613_v45 = vsub.f32 %v5698_v36, %v612_v42 }
  0x1d   :  { %477 = vmatmul.f32.gmra.mxu3 %v353_v48  ;;  %v138_v48 = vld [vmem:[%s7979_s3 + $0xc8] sm:$0xff] }
  0x1e   :  { %436 = vmatmul.f32.gmra.mxu2 %v352_v39  ;;  %v886_v39 = vsub.f32 %v75_v34, %v835_v37  ;;  %v614_v50 = vand.u32 4294901760, %v613_v45  ;;  %v818_v34 = vsel %vm305_vm0, %v92_v28, 0 }
  0x1f   :  { %356 = vmatmul.f32.gmra.mxu0 %v355_v58  ;;  %v89_v58 = vld [vmem:[%s7978_s2 + $0x40] sm:$0xff] }
  0x20   :  { %202 = vperm.xlu2 %5458, %v124_v0   ;;  %v887_v43 = vand.u32 4294901760, %v886_v39  ;;  %v809_v63 = vsel %vm305_vm0, %v89_v58, 0 }
  0x22   :  { %212 = vperm.xlu1 %5457, %v126_v1   ;;  %v888_v44 = vsub.f32 %v886_v39, %v887_v43  ;;  %v2443_v1 = vld [vmem:[%s7981_s5 + $0x8] sm:$0xff] }
  0x23   :  { %207 = vperm.xlu0 %5456, %v125_v3  }
  0x24   :  { %398 = vmatmul.f32.gmra.mxu1 %v5584_v31  ;;  %v889_v46 = vand.u32 4294901760, %v888_v44  ;;  %v2455_v44 = vld [vmem:[%s7981_s5 + $0x68] sm:$0xff] }
  0x25   :  { %483 = vmatmul.f32.gmra.mxu3 %v361_v59 }
  0x26   :  { %441 = vmatmul.f32.gmra.mxu2 %v360_v52  ;;  %v141_v52 = vld [vmem:[%s7979_s3 + $0xe0] sm:$0xff] }
  0x27   :  { %364 = vmatmul.f32.gmra.mxu0 %v363_v6  ;;  %v90_v6 = vld [vmem:[%s7978_s2 + $0x48] sm:$0xff] }
  0x28   :  { %217 = vperm.xlu2 %5458, %v127_v13   ;;  %v812_v13 = vsel %vm305_vm0, %v90_v6, 0  ;;  %v96_v6 = vld [vmem:[%s7978_s2 + $0x78] sm:$0xff] }
  0x2a   :  { %227 = vperm.xlu1 %5457, %v129_v14   ;;  %v2446_v14 = vld [vmem:[%s7981_s5 + $0x20] sm:$0xff] }
  0x2b   :  { %222 = vperm.xlu0 %5456, %v128_v15  }
  0x2c   :  { %402 = vmatmul.f32.gmra.mxu1 %v5600_v49 }
  0x2d   :  { %641 = vmatmul.f32.vlgmr.msrb.gmra.mxu3 %v5617_v57 }
  0x2e   :  { %591 = vmatmul.f32.vlgmr.msrb.gmra.mxu2 %v590_v17  ;;  %963 = vmatpush.msrb.mxu3 %v835_v37  ;;  %v5799_v17 = vand.u32 4294901760, %v812_v13 }
  0x2f   :  { %507 = vmatmul.f32.vlgmr.msrb.gmra.mxu0 %v5561_v11  ;;  %925 = vmatpush.msrb.mxu2 %v886_v39 }
  0x30   :  { %232 = vperm.xlu2 %5458, %v130_v24   ;;  %836 = vmatpush.msrb.mxu0 %v835_v37  ;;  %v846_v20 = vsub.f32 %v812_v13, %v5799_v17  ;;  %v2449_v24 = vld [vmem:[%s7981_s5 + $0x38] sm:$0xff] }
  0x32   :  { %242 = vperm.xlu1 %5457, %v132_v26   ;;  %v847_v26 = vand.u32 4294901760, %v846_v20 }
  0x33   :  { %237 = vperm.xlu0 %5456, %v131_v27  }
  0x34   :  { %541 = vmatmul.f32.vlgmr.msrb.gmra.mxu1 %v5561_v11  ;;  %v135_v11 = vld [vmem:[%s7979_s3 + $0xb0] sm:$0xff] }
  0x35   :  { %645 = vmatmul.f32.gmra.mxu3 %v5637_v5  ;;  %890 = vmatpush.msrb.mxu1 %v889_v46 }
  0x36   :  { %599 = vmatmul.f32.gmra.mxu2 %v598_v29  ;;  %v848_v29 = vsub.f32 %v846_v20, %v847_v26 }
  0x37   :  { %511 = vmatmul.f32.gmra.mxu0 %v5568_v16 }
  0x38   :  { %247 = vperm.xlu2 %5458, %v133_v38   ;;  %v5839_v38 = vand.u32 4294901760, %v818_v34 }
  0x3a   :  { %257 = vperm.xlu1 %5457, %v135_v11   ;;  %v93_v11 = vld [vmem:[%s7978_s2 + $0x60] sm:$0xff] }
  0x3b   :  { %252 = vperm.xlu0 %5456, %v134_v40   ;;  %v862_v40 = vsub.f32 %v818_v34, %v5839_v38 }
  0x3c   :  { %545 = vmatmul.f32.gmra.mxu1 %v5568_v16  ;;  %v137_v16 = vld [vmem:[%s7979_s3 + $0xc0] sm:$0xff] }
  0x3d   :  { %649 = vmatmul.f32.gmra.mxu3 %v5660_v19 }
  0x3e   :  { %607 = vmatmul.f32.gmra.mxu2 %v606_v41  ;;  %v1060_v41 = vsel %vm305_vm0, %v93_v11, 0 }
  0x3f   :  { %515 = vmatmul.f32.gmra.mxu0 %v5584_v31  ;;  %v5857_v45 = vand.u32 4294901760, %v1060_v41 }
  0x40   :  { %262 = vperm.xlu2 %5458, %v136_v47   ;;  %v863_v47 = vand.u32 4294901760, %v862_v40 }
  0x42   :  { %272 = vperm.xlu1 %5457, %v138_v48   ;;  %v94_v48 = vld [vmem:[%s7978_s2 + $0x68] sm:$0xff] }
  0x43   :  { %267 = vperm.xlu0 %5456, %v137_v16   ;;  %v5864_v16 = vsub.f32 %v1060_v41, %v5857_v45 }
  0x44   :  { %549 = vmatmul.f32.gmra.mxu1 %v5584_v31  ;;  %v142_v31 = vld [vmem:[%s7979_s3 + $0xe8] sm:$0xff] }
  0x45   :  { %653 = vmatmul.f32.gmra.mxu3 %v5689_v32  ;;  %v1090_v54 = vand.u32 4294901760, %v5864_v16 }
  0x46   :  { %615 = vmatmul.f32.gmra.mxu2 %v614_v50  ;;  %v864_v50 = vsub.f32 %v862_v40, %v863_v47 }
  0x47   :  { %519 = vmatmul.f32.gmra.mxu0 %v5600_v49  ;;  %v1091_v58 = vsub.f32 %v5864_v16, %v1090_v54 }
  0x48   :  { %277 = vperm.xlu2 %5458, %v139_v51   ;;  %v1063_v51 = vsel %vm305_vm0, %v94_v48, 0 }
  0x4a   :  { %287 = vperm.xlu1 %5457, %v141_v52   ;;  %v2457_v52 = vld [vmem:[%s7981_s5 + $0x78] sm:$0xff] }
  0x4b   :  { %282 = vperm.xlu0 %5456, %v140_v53   ;;  %v2459_v53 = vld [vmem:[%s7981_s5 + $0x88] sm:$0xff] }
  0x4c   :  { %553 = vmatmul.f32.gmra.mxu1 %v5600_v49  ;;  %v143_v49 = vld [vmem:[%s7979_s3 + $0xf0] sm:$0xff] }
  0x4d   :  { %792 = vmatmul.f32.vlgmr.msra.gmra.mxu3 %v5617_v57 }
  0x4e   :  { %758 = vmatmul.f32.vlgmr.msra.gmra.mxu2 %v5617_v57  ;;  %v60_v57 = vunpack.c.0.s8 %v52_v56 }
  0x4f   :  { %677 = vmatmul.f32.vlgmr.msra.gmra.mxu0 %v5624_v61  ;;  %v2442_v61 = vld [vmem:[%s7981_s5] sm:$0xff] }
  0x50   :  { %1007 = vmatpush.msra.mxu0 %v887_v43  ;;  %292 = vperm.xlu2 %5458, %v142_v31   ;;  %vm68_vm8 = vcmp.ne.s32.totalorder %v60_v57, 0  ;;  %v2456_v43 = vld [vmem:[%s7981_s5 + $0x70] sm:$0xff]  ;;  %v2458_v31 = vld [vmem:[%s7981_s5 + $0x80] sm:$0xff] }
  0x51   :  { %v76_v59 = vsel %vm68_vm8, %v5559_v9, 0.0  ;;  %v95_v57 = vld [vmem:[%s7978_s2 + $0x70] sm:$0xff] }
  0x52   :  { %302 = vperm.xlu1 %5457, %v144_v55   ;;  %v5763_v60 = vand.u32 4294901760, %v76_v59  ;;  %v5877_v55 = vand.u32 4294901760, %v1063_v51 }
  0x53   :  { %297 = vperm.xlu0 %5456, %v143_v49   ;;  %v865_v49 = vand.u32 4294901760, %v864_v50 }
  0x54   :  { %716 = vmatmul.f32.vlgmr.msra.gmra.mxu1 %v588_v4  ;;  %1087 = vmatpush.msra.mxu2 %v5763_v60  ;;  %v1137_v0 = vsub.f32 %v76_v59, %v5763_v60  ;;  %v5778_v4 = vand.u32 4294901760, %v809_v63  ;;  %v5887_v59 = vsub.f32 %v1063_v51, %v5877_v55 }
  0x55   :  { %796 = vmatmul.f32.gmra.mxu3 %v5637_v5  ;;  %1041 = vmatpush.msra.mxu1 %v835_v37 }
  0x56   :  { %762 = vmatmul.f32.gmra.mxu2 %v5637_v5  ;;  %v1138_v3 = vand.u32 4294901760, %v1137_v0  ;;  %v838_v8 = vsub.f32 %v809_v63, %v5778_v4  ;;  %v2461_v63 = vld [vmem:[%s7981_s5 + $0x98] sm:$0xff] }
  0x57   :  { %682 = vmatmul.f32.gmra.mxu0 %v5647_v10  ;;  %v2447_v10 = vld [vmem:[%s7981_s5 + $0x28] sm:$0xff] }
  0x58   :  { %2476 = vperm.xlu2 %5458, %v2442_v61   ;;  %v1139_v5 = vsub.f32 %v1137_v0, %v1138_v3  ;;  %v839_v15 = vand.u32 4294901760, %v838_v8  ;;  %v2460_v61 = vld [vmem:[%s7981_s5 + $0x90] sm:$0xff] }
  0x5a   :  { %2486 = vperm.xlu1 %5457, %v2444_v62   ;;  %v1140_v7 = vand.u32 4294901760, %v1139_v5  ;;  %v2462_v62 = vld [vmem:[%s7981_s5 + $0xa0] sm:$0xff] }
  0x5b   :  { %2481 = vperm.xlu0 %5456, %v2443_v1   ;;  %v1098_v1 = vand.u32 4294901760, %v5887_v59 }
  0x5c   :  { %722 = vmatmul.f32.gmra.mxu1 %v596_v18  ;;  %1141 = vmatpush.msra.mxu3 %v1140_v7  ;;  %v91_v18 = vld [vmem:[%s7978_s2 + $0x50] sm:$0xff] }
  0x5d   :  { %800 = vmatmul.f32.gmra.mxu3 %v5660_v19  ;;  %v815_v23 = vsel %vm305_vm0, %v91_v18, 0  ;;  %v2465_v18 = vld [vmem:[%s7981_s5 + $0xb8] sm:$0xff] }
  0x5e   :  { %766 = vmatmul.f32.gmra.mxu2 %v5660_v19  ;;  %v840_v19 = vsub.f32 %v838_v8, %v839_v15  ;;  %v5820_v27 = vand.u32 4294901760, %v815_v23 }
  0x5f   :  { %687 = vmatmul.f32.gmra.mxu0 %v5671_v22  ;;  %v2450_v22 = vld [vmem:[%s7981_s5 + $0x40] sm:$0xff] }
  0x60   :  { %2491 = vperm.xlu2 %5458, %v2445_v12   ;;  %v841_v25 = vand.u32 4294901760, %v840_v19 }
  0x62   :  { %2501 = vperm.xlu1 %5457, %v2447_v10  }
  0x63   :  { %2496 = vperm.xlu0 %5456, %v2446_v14   ;;  %v1069_v14 = vsel %vm305_vm0, %v96_v6, 0 }
  0x64   :  { %728 = vmatmul.f32.gmra.mxu1 %v604_v30  ;;  %v854_v30 = vsub.f32 %v815_v23, %v5820_v27 }
  0x65   :  { %804 = vmatmul.f32.gmra.mxu3 %v5689_v32 }
  0x66   :  { %770 = vmatmul.f32.gmra.mxu2 %v5689_v32  ;;  %v2451_v32 = vld [vmem:[%s7981_s5 + $0x48] sm:$0xff]  ;;  %v855_v37 = vand.u32 4294901760, %v854_v30 }
  0x67   :  { %692 = vmatmul.f32.gmra.mxu0 %v5698_v36  ;;  %v849_v36 = vand.u32 4294901760, %v848_v29 }
  0x68   :  { %2506 = vperm.xlu2 %5458, %v2448_v21   ;;  %v856_v39 = vsub.f32 %v854_v30, %v855_v37 }
  0x6a   :  { %2516 = vperm.xlu1 %5457, %v2450_v22   ;;  %v857_v46 = vand.u32 4294901760, %v856_v39  ;;  %v2467_v39 = vld [vmem:[%s7981_s5 + $0xc8] sm:$0xff] }
  0x6b   :  { %2511 = vperm.xlu0 %5456, %v2449_v24   ;;  %v5925_v24 = vand.u32 4294901760, %v1069_v14 }
  0x6c   :  { %734 = vmatmul.f32.gmra.mxu1 %v612_v42  ;;  %v2454_v42 = vld [vmem:[%s7981_s5 + $0x60] sm:$0xff] }
  0x6d   :  { %967 = vmatmul.f32.vlgmr.msrb.gmra.mxu3 %v839_v15  ;;  %v2463_v15 = vld [vmem:[%s7981_s5 + $0xa8] sm:$0xff] }
  0x6e   :  { %928 = vmatmul.f32.vlgmr.msrb.gmra.mxu2 %v838_v8  ;;  %1292 = vmatpush.msrb.mxu3 %v5763_v60  ;;  %v1099_v8 = vsub.f32 %v5887_v59, %v1098_v1 }
  0x6f   :  { %842 = vmatmul.f32.vlgmr.msrb.gmra.mxu0 %v841_v25  ;;  %1258 = vmatpush.msrb.mxu2 %v1138_v3 }
  0x70   :  { %1176 = vmatpush.msrb.mxu0 %v1137_v0  ;;  %2521 = vperm.xlu2 %5458, %v2451_v32   ;;  %v1092_v0 = vand.u32 4294901760, %v1091_v58  ;;  %v1100_v22 = vand.u32 4294901760, %v1099_v8  ;;  %v5935_v32 = vsub.f32 %v1069_v14, %v5925_v24 }
  0x72   :  { %2531 = vperm.xlu1 %5457, %v2453_v33  }
  0x73   :  { %2526 = vperm.xlu0 %5456, %v2452_v35  }
  0x74   :  { %892 = vmatmul.f32.vlgmr.msrb.gmra.mxu1 %v5778_v4  ;;  %v153_v56 = vpop.permute.xlu1 %152 }
  0x75   :  { %973 = vmatmul.f32.gmra.mxu3 %v847_v26  ;;  %1214 = vmatpush.msrb.mxu1 %v5763_v60  ;;  %v1066_v60 = vsel %vm305_vm0, %v95_v57, 0  ;;  %v5927_v26 = vpop.permute.xlu0 %162  ;;  %v2469_v57 = vld [vmem:[%s7981_s5 + $0xd8] sm:$0xff] }
  0x76   :  { %933 = vmatmul.f32.gmra.mxu2 %v846_v20  ;;  %v5900_v3 = vand.u32 4294901760, %v1066_v60  ;;  %v2464_v20 = vld [vmem:[%s7981_s5 + $0xb0] sm:$0xff] }
  0x77   :  { %850 = vmatmul.f32.gmra.mxu0 %v849_v36  ;;  %v37_v36 = vld [vmem:[%s7977_s1 + $0x8] sm:$0x3] }
  0x78   :  { %2536 = vperm.xlu2 %5458, %v2454_v42   ;;  %v5911_v12 = vsub.f32 %v1066_v60, %v5900_v3  ;;  %vm45_vm9 = vnez %v37_v36  ;;  %v1114_v42 = vand.u32 4294901760, %v5935_v32  ;;  %v2470_v60 = vld [vmem:[%s7981_s5 + $0xe0] sm:$0xff] }
  0x7a   :  { %2546 = vperm.xlu1 %5457, %v2456_v43   ;;  %v1106_v23 = vand.u32 4294901760, %v5911_v12  ;;  %v53_v43 = vsel %vm45_vm9, 16843009, %v5486_v2  ;;  %v1115_v51 = vsub.f32 %v5935_v32, %v1114_v42 }
  0x7b   :  { %2541 = vperm.xlu0 %5456, %v2455_v44  }
  0x7c   :  { %896 = vmatmul.f32.gmra.mxu1 %v5799_v17  ;;  %v148_v7 = vpop.permute.xlu1 %147 }
  0x7d   :  { %979 = vmatmul.f32.gmra.mxu3 %v855_v37  ;;  %v2466_v37 = vld [vmem:[%s7981_s5 + $0xc0] sm:$0xff]  ;;  %v158_v50 = vpop.permute.xlu0 %157 }
  0x7e   :  { %938 = vmatmul.f32.gmra.mxu2 %v854_v30  ;;  %v1107_v30 = vsub.f32 %v5911_v12, %v1106_v23 }
  0x7f   :  { %858 = vmatmul.f32.gmra.mxu0 %v857_v46  ;;  %v61_v46 = vunpack.c.0.s8 %v53_v43  ;;  %v5057_v43 = vld [vmem:[%s7982_s6 + $0x30] sm:$0xff] }
  0x80   :  { %2551 = vperm.xlu2 %5458, %v2457_v52   ;;  %v1108_v41 = vand.u32 4294901760, %v1107_v30  ;;  %v5054_v30 = vld [vmem:[%s7982_s6 + $0x18] sm:$0xff] }
  0x81   :  { %vm69_vm10 = vcmp.ne.s32.totalorder %v61_v46, 0 }
  0x82   :  { %2561 = vperm.xlu1 %5457, %v2459_v53   ;;  %v77_v52 = vsel %vm69_vm10, %v5559_v9, 0.0  ;;  %vm2634_vm10 = vcmask 261120  }
  0x83   :  { %2556 = vperm.xlu0 %5456, %v2458_v31  }
  0x84   :  { %900 = vmatmul.f32.gmra.mxu1 %v5820_v27 }
  0x85   :  { %985 = vmatmul.f32.gmra.mxu3 %v863_v47 }
  0x86   :  { %943 = vmatmul.f32.gmra.mxu2 %v862_v40 }
  0x87   :  { %866 = vmatmul.f32.gmra.mxu0 %v865_v49  ;;  %v5963_v49 = vand.u32 4294901760, %v77_v52 }
  0x88   :  { %2566 = vperm.xlu2 %5458, %v2460_v61  }
  0x89   :  { %v1388_v61 = vsub.f32 %v77_v52, %v5963_v49 }
  0x8a   :  { %2576 = vperm.xlu1 %5457, %v2462_v62  }
  0x8b   :  { %2571 = vperm.xlu0 %5456, %v2461_v63   ;;  %v1116_v63 = vand.u32 4294901760, %v1115_v51 }
  0x8c   :  { %v341_v5 = vpop.f32.mrf.mxu0  ;;  %904 = vmatmul.f32.gmra.mxu1 %v5839_v38 }
  0x8d   :  { %1143 = vmatmul.f32.vlgmr.msra.gmra.mxu3 %v5857_v45  ;;  %v342_v10 = vadd.f32 %v341_v5, %v148_v7  ;;  %v1389_v5 = vand.u32 4294901760, %v1388_v61 }
  0x8e   :  { %1093 = vmatmul.f32.vlgmr.msra.gmra.mxu2 %v1092_v0  ;;  %1465 = vmatpush.msra.mxu3 %v5963_v49 }
  0x8f   :  { %1009 = vmatmul.f32.vlgmr.msra.gmra.mxu0 %v5778_v4  ;;  %v466_v13 = vpop.f32.mrf.mxu3  ;;  %1427 = vmatpush.msra.mxu2 %v1388_v61  ;;  %v1390_v8 = vsub.f32 %v1388_v61, %v1389_v5 }
  0x90   :  { %2581 = vperm.xlu2 %5458, %v2463_v15   ;;  %1338 = vmatpush.msra.mxu0 %v5963_v49 }
  0x91   :  { %v427_v19 = vpop.f32.mrf.mxu2  ;;  %v391_v21 = vpop.f32.mrf.mxu1  ;;  %v1391_v14 = vand.u32 4294901760, %v1390_v8 }
  0x92   :  { %v392_v25 = vadd.f32 %v391_v21, %v342_v10  ;;  %2591 = vperm.xlu1 %5457, %v2465_v18   ;;  %v5051_v18 = vld [vmem:[%s7982_s6] sm:$0xff] }
  0x93   :  { %2586 = vperm.xlu0 %5456, %v2464_v20   ;;  %v2473_v20 = vld [vmem:[%s7981_s5 + $0xf8] sm:$0xff] }
  0x94   :  { %v349_v28 = vpop.f32.mrf.mxu0  ;;  %v428_v29 = vadd.f32 %v427_v19, %v392_v25  ;;  %1043 = vmatmul.f32.vlgmr.msra.gmra.mxu1 %v5778_v4  ;;  %v2468_v4 = vld [vmem:[%s7981_s5 + $0xd0] sm:$0xff] }
  0x95   :  { %1147 = vmatmul.f32.gmra.mxu3 %v5877_v55  ;;  %v350_v33 = vadd.f32 %v349_v28, %v153_v56  ;;  %1392 = vmatpush.msra.mxu1 %v1391_v14 }
  0x96   :  { %1101 = vmatmul.f32.gmra.mxu2 %v1100_v22  ;;  %v5937_v34 = vadd.f32 %v466_v13, %v428_v29 }
  0x97   :  { %1013 = vmatmul.f32.gmra.mxu0 %v5799_v17 }
  0x98   :  { %v472_v35 = vpop.f32.mrf.mxu3  ;;  %2596 = vperm.xlu2 %5458, %v2466_v37  }
  0x99   :  { %v432_v11 = vpop.f32.mrf.mxu2  ;;  %v395_v40 = vpop.f32.mrf.mxu1 }
  0x9a   :  { %v396_v44 = vadd.f32 %v395_v40, %v350_v33  ;;  %2606 = vperm.xlu1 %5457, %v2468_v4   ;;  %v168_v33 = vpop.permute.xlu1 %167  ;;  %v38_v40 = vld [vmem:[%s7977_s1 + $0xa] sm:$0x3] }
  0x9b   :  { %2601 = vperm.xlu0 %5456, %v2467_v39   ;;  %v97_v39 = vld [vmem:[%s7978_s2 + $0x80] sm:$0xff]  ;;  %vm46_vm11 = vnez %v38_v40  ;;  %v5061_v40 = vld [vmem:[%s7982_s6 + $0x50] sm:$0xff] }
  0x9c   :  { %v357_v47 = vpop.f32.mrf.mxu0  ;;  %v433_v48 = vadd.f32 %v432_v11, %v396_v44  ;;  %1047 = vmatmul.f32.gmra.mxu1 %v5799_v17  ;;  %v2471_v17 = vld [vmem:[%s7981_s5 + $0xe8] sm:$0xff]  ;;  %v1311_v44 = vsel %vm305_vm0, %v97_v39, 0  ;;  %v100_v39 = vld [vmem:[%s7978_s2 + $0x98] sm:$0xff] }
  0x9d   :  { %1151 = vmatmul.f32.gmra.mxu3 %v5900_v3  ;;  %v358_v53 = vadd.f32 %v357_v47, %v158_v50  ;;  %v173_v47 = vpop.permute.xlu0 %172  ;;  %v6039_v52 = vand.u32 4294901760, %v1311_v44 }
  0x9e   :  { %1109 = vmatmul.f32.gmra.mxu2 %v1108_v41  ;;  %v5960_v31 = vadd.f32 %v472_v35, %v433_v48  ;;  %v6026_v41 = vpop.permute.xlu2 %182 }
  0x9f   :  { %1017 = vmatmul.f32.gmra.mxu0 %v5820_v27 }
  0xa0   :  { %v478_v56 = vpop.f32.mrf.mxu3  ;;  %2611 = vperm.xlu2 %5458, %v2469_v57   ;;  %v98_v57 = vld [vmem:[%s7978_s2 + $0x88] sm:$0xff] }
  0xa1   :  { %v437_v58 = vpop.f32.mrf.mxu2  ;;  %v399_v62 = vpop.f32.mrf.mxu1 }
  0xa2   :  { %v400_v0 = vadd.f32 %v399_v62, %v358_v53  ;;  %2621 = vperm.xlu1 %5457, %v2471_v17  }
  0xa3   :  { %2616 = vperm.xlu0 %5456, %v2470_v60   ;;  %v1340_v60 = vsub.f32 %v1311_v44, %v6039_v52 }
  0xa4   :  { %v365_v6 = vpop.f32.mrf.mxu0  ;;  %v438_v7 = vadd.f32 %v437_v58, %v400_v0  ;;  %1051 = vmatmul.f32.gmra.mxu1 %v5820_v27  ;;  %v2472_v27 = vld [vmem:[%s7981_s5 + $0xf0] sm:$0xff]  ;;  %v5055_v58 = vld [vmem:[%s7982_s6 + $0x20] sm:$0xff] }
  0xa5   :  { %1155 = vmatmul.f32.gmra.mxu3 %v5925_v24  ;;  %v366_v10 = vadd.f32 %v365_v6, %v5927_v26  ;;  %v5059_v0 = vld [vmem:[%s7982_s6 + $0x40] sm:$0xff]  ;;  %v1341_v8 = vand.u32 4294901760, %v1340_v60 }
  0xa6   :  { %1117 = vmatmul.f32.gmra.mxu2 %v1116_v63  ;;  %v5980_v13 = vadd.f32 %v478_v56, %v438_v7  ;;  %v178_v62 = vpop.permute.xlu2 %177 }
  0xa7   :  { %1021 = vmatmul.f32.gmra.mxu0 %v5839_v38 }
  0xa8   :  { %v484_v15 = vpop.f32.mrf.mxu3  ;;  %2626 = vperm.xlu2 %5458, %v2472_v27   ;;  %v99_v27 = vld [vmem:[%s7978_s2 + $0x90] sm:$0xff] }
  0xa9   :  { %v442_v19 = vpop.f32.mrf.mxu2  ;;  %v403_v21 = vpop.f32.mrf.mxu1 }
  0xaa   :  { %v404_v22 = vadd.f32 %v403_v21, %v366_v10  ;;  %5085 = vperm.xlu1 %5457, %v5051_v18  }
  0xab   :  { %2631 = vperm.xlu0 %5456, %v2473_v20   ;;  %v1342_v20 = vsub.f32 %v1340_v60, %v1341_v8 }
  0xac   :  { %v5992_v25 = vpop.f32.mrf.mxu0  ;;  %v443_v26 = vadd.f32 %v442_v19, %v404_v22  ;;  %1055 = vmatmul.f32.gmra.mxu1 %v5839_v38  ;;  %v5053_v38 = vld [vmem:[%s7982_s6 + $0x10] sm:$0xff]  ;;  %v5058_v19 = vld [vmem:[%s7982_s6 + $0x38] sm:$0xff]  ;;  %v1317_v22 = vsel %vm305_vm0, %v99_v27, 0 }
  0xad   :  { %1294 = vmatmul.f32.vlgmr.msrb.gmra.mxu3 %v5857_v45 }
  0xae   :  { %1260 = vmatmul.f32.vlgmr.msrb.gmra.mxu2 %v5857_v45  ;;  %v5997_v28 = vadd.f32 %v484_v15, %v443_v26  ;;  %v5052_v45 = vld [vmem:[%s7982_s6 + $0x8] sm:$0xff] }
  0xaf   :  { %1179 = vmatmul.f32.vlgmr.msrb.gmra.mxu0 %v5864_v16  ;;  %v54_v16 = vsel %vm46_vm11, 16843009, %v5486_v2 }
  0xb0   :  { %v642_v29 = vpop.f32.mrf.mxu3  ;;  %1509 = vmatpush.msrb.mxu0 %v1389_v5  ;;  %5090 = vperm.xlu2 %5458, %v5052_v45   ;;  %v62_v46 = vunpack.c.0.s8 %v54_v16 }
  0xb1   :  { %v592_v35 = vpop.f32.mrf.mxu2  ;;  %v6006_v4 = vpop.f32.mrf.mxu1 }
  0xb2   :  { %v593_v36 = vadd.f32 %v592_v35, %v168_v33  ;;  %5100 = vperm.xlu1 %5457, %v5054_v30   ;;  %vm70_vm12 = vcmp.ne.s32.totalorder %v62_v46, 0  ;;  %v1343_v33 = vand.u32 4294901760, %v1342_v20  ;;  %v5065_v46 = vld [vmem:[%s7982_s6 + $0x70] sm:$0xff]  ;;  %v102_v20 = vld [vmem:[%s7978_s2 + $0xa8] sm:$0xff] }
  0xb3   :  { %5095 = vperm.xlu0 %5456, %v5053_v38   ;;  %v78_v53 = vsel %vm70_vm12, %v5559_v9, 0.0  ;;  %v6099_v38 = vand.u32 4294901760, %v1317_v22 }
  0xb4   :  { %v6011_v37 = vpop.f32.mrf.mxu0  ;;  %v6013_v11 = vadd.f32 %v642_v29, %v593_v36  ;;  %1218 = vmatmul.f32.vlgmr.msrb.gmra.mxu1 %v1090_v54  ;;  %v6046_v17 = vand.u32 4294901760, %v78_v53 }
  0xb5   :  { %1298 = vmatmul.f32.gmra.mxu3 %v5877_v55  ;;  %1543 = vmatpush.msrb.mxu1 %v5963_v49  ;;  %v1356_v16 = vsub.f32 %v1317_v22, %v6099_v38 }
  0xb6   :  { %1264 = vmatmul.f32.gmra.mxu2 %v5877_v55  ;;  %v5056_v55 = vld [vmem:[%s7982_s6 + $0x28] sm:$0xff]  ;;  %v1639_v9 = vsub.f32 %v78_v53, %v6046_v17 }
  0xb7   :  { %1184 = vmatmul.f32.gmra.mxu0 %v5887_v59  ;;  %1589 = vmatpush.msrb.mxu2 %v6046_v17 }
  0xb8   :  { %v646_v54 = vpop.f32.mrf.mxu3  ;;  %v1640_v61 = vand.u32 4294901760, %v1639_v9  ;;  %5105 = vperm.xlu2 %5458, %v5055_v58  }
  0xb9   :  { %v600_v48 = vpop.f32.mrf.mxu2  ;;  %v6037_v50 = vpop.f32.mrf.mxu1 }
  0xba   :  { %v601_v51 = vadd.f32 %v600_v48, %v173_v47  ;;  %5115 = vperm.xlu1 %5457, %v5057_v43   ;;  %v1641_v7 = vsub.f32 %v1639_v9, %v1640_v61 }
  0xbb   :  { %5110 = vperm.xlu0 %5456, %v5056_v55  }
  0xbc   :  { %v6042_v49 = vpop.f32.mrf.mxu0  ;;  %v6044_v56 = vadd.f32 %v646_v54, %v601_v51  ;;  %1224 = vmatmul.f32.gmra.mxu1 %v1098_v1  ;;  %v5060_v1 = vld [vmem:[%s7982_s6 + $0x48] sm:$0xff]  ;;  %v1642_v18 = vand.u32 4294901760, %v1641_v7  ;;  %v1357_v51 = vand.u32 4294901760, %v1356_v16 }
  0xbd   :  { %1302 = vmatmul.f32.gmra.mxu3 %v5900_v3 }
  0xbe   :  { %1268 = vmatmul.f32.gmra.mxu2 %v5900_v3  ;;  %v1314_v3 = vsel %vm305_vm0, %v98_v57, 0  ;;  %1643 = vmatpush.msrb.mxu3 %v1642_v18 }
  0xbf   :  { %1189 = vmatmul.f32.gmra.mxu0 %v5911_v12  ;;  %v6071_v10 = vand.u32 4294901760, %v1314_v3 }
  0xc0   :  { %v650_v59 = vpop.f32.mrf.mxu3  ;;  %5120 = vperm.xlu2 %5458, %v5058_v19  }
  0xc1   :  { %v608_v63 = vpop.f32.mrf.mxu2  ;;  %v6069_v5 = vpop.f32.mrf.mxu1  ;;  %v1348_v21 = vsub.f32 %v1314_v3, %v6071_v10 }
  0xc2   :  { %v609_v6 = vadd.f32 %v608_v63, %v178_v62  ;;  %5130 = vperm.xlu1 %5457, %v5060_v1   ;;  %v5069_v62 = vld [vmem:[%s7982_s6 + $0x90] sm:$0xff] }
  0xc3   :  { %5125 = vperm.xlu0 %5456, %v5059_v0   ;;  %v1349_v35 = vand.u32 4294901760, %v1348_v21 }
  0xc4   :  { %v6073_v14 = vpop.f32.mrf.mxu0  ;;  %v6075_v15 = vadd.f32 %v650_v59, %v609_v6  ;;  %1230 = vmatmul.f32.gmra.mxu1 %v1106_v23  ;;  %v5063_v23 = vld [vmem:[%s7982_s6 + $0x60] sm:$0xff]  ;;  %v1358_v59 = vsub.f32 %v1356_v16, %v1357_v51 }
  0xc5   :  { %1306 = vmatmul.f32.gmra.mxu3 %v5925_v24 }
  0xc6   :  { %1272 = vmatmul.f32.gmra.mxu2 %v5925_v24  ;;  %v5062_v24 = vld [vmem:[%s7982_s6 + $0x58] sm:$0xff]  ;;  %v1359_v18 = vand.u32 4294901760, %v1358_v59 }
  0xc7   :  { %1194 = vmatmul.f32.gmra.mxu0 %v5935_v32  ;;  %v5066_v32 = vld [vmem:[%s7982_s6 + $0x78] sm:$0xff] }
  0xc8   :  { %v654_v12 = vpop.f32.mrf.mxu3  ;;  %5135 = vperm.xlu2 %5458, %v5061_v40  }
  0xc9   :  { %v616_v26 = vpop.f32.mrf.mxu2  ;;  %v6096_v29 = vpop.f32.mrf.mxu1 }
  0xca   :  { %v617_v30 = vadd.f32 %v616_v26, %v6026_v41  ;;  %5145 = vperm.xlu1 %5457, %v5063_v23   ;;  %v1350_v41 = vsub.f32 %v1348_v21, %v1349_v35  ;;  %v1565_v26 = vsel %vm305_vm0, %v102_v20, 0 }
  0xcb   :  { %5140 = vperm.xlu0 %5456, %v5062_v24  }
  0xcc   :  { %v6101_v36 = vadd.f32 %v654_v12, %v617_v30  ;;  %v678_v45 = vpop.f32.mrf.mxu0  ;;  %1236 = vmatmul.f32.gmra.mxu1 %v1114_v42  ;;  %v1320_v42 = vsel %vm305_vm0, %v100_v39, 0  ;;  %v1351_v55 = vand.u32 4294901760, %v1350_v41  ;;  %v5072_v30 = vld [vmem:[%s7982_s6 + $0xa8] sm:$0xff]  ;;  %v6165_v41 = vand.u32 4294901760, %v1565_v26 }
  0xcd   :  { %1469 = vmatmul.f32.vlgmr.msra.gmra.mxu3 %v1341_v8  ;;  %v679_v43 = vadd.f32 %v678_v45, %v6013_v11  ;;  %v6121_v53 = vand.u32 4294901760, %v1320_v42  ;;  %v5064_v11 = vld [vmem:[%s7982_s6 + $0x68] sm:$0xff]  ;;  %v5071_v45 = vld [vmem:[%s7982_s6 + $0xa0] sm:$0xff] }
  0xce   :  { %1430 = vmatmul.f32.vlgmr.msra.gmra.mxu2 %v1340_v60  ;;  %1794 = vmatpush.msra.mxu3 %v6046_v17 }
  0xcf   :  { %1344 = vmatmul.f32.vlgmr.msra.gmra.mxu0 %v1343_v33  ;;  %1760 = vmatpush.msra.mxu2 %v1640_v61  ;;  %v1364_v1 = vsub.f32 %v1320_v42, %v6121_v53  ;;  %v103_v42 = vld [vmem:[%s7978_s2 + $0xb0] sm:$0xff] }
  0xd0   :  { %v793_v54 = vpop.f32.mrf.mxu3  ;;  %1678 = vmatpush.msra.mxu0 %v1639_v9  ;;  %v101_v9 = vld [vmem:[%s7978_s2 + $0xa0] sm:$0xff]  ;;  %5150 = vperm.xlu2 %5458, %v5064_v11  }
  0xd1   :  { %v759_v44 = vpop.f32.mrf.mxu2  ;;  %v717_v47 = vpop.f32.mrf.mxu1  ;;  %v1562_v61 = vsel %vm305_vm0, %v101_v9, 0  ;;  %v1365_v27 = vand.u32 4294901760, %v1364_v1 }
  0xd2   :  { %v718_v48 = vadd.f32 %v717_v47, %v679_v43  ;;  %5160 = vperm.xlu1 %5457, %v5066_v32   ;;  %v6142_v7 = vand.u32 4294901760, %v1562_v61  ;;  %v5070_v43 = vld [vmem:[%s7982_s6 + $0x98] sm:$0xff] }
  0xd3   :  { %5155 = vperm.xlu0 %5456, %v5065_v46   ;;  %v1366_v22 = vsub.f32 %v1364_v1, %v1365_v27  ;;  %v6178_v46 = vsub.f32 %v1565_v26, %v6165_v41 }
  0xd4   :  { %v683_v57 = vpop.f32.mrf.mxu0  ;;  %v760_v58 = vadd.f32 %v759_v44, %v718_v48  ;;  %1394 = vmatmul.f32.vlgmr.msra.gmra.mxu1 %v6039_v52  ;;  %v6152_v12 = vsub.f32 %v1562_v61, %v6142_v7  ;;  %v1568_v48 = vsel %vm305_vm0, %v103_v42, 0 }
  0xd5   :  { %1475 = vmatmul.f32.gmra.mxu3 %v1349_v35  ;;  %1716 = vmatpush.msra.mxu1 %v6046_v17  ;;  %v684_v63 = vadd.f32 %v683_v57, %v6044_v56  ;;  %v5068_v17 = vld [vmem:[%s7982_s6 + $0x88] sm:$0xff]  ;;  %v5067_v56 = vld [vmem:[%s7982_s6 + $0x80] sm:$0xff]  ;;  %v6191_v61 = vand.u32 4294901760, %v1568_v48 }
  0xd6   :  { %1435 = vmatmul.f32.gmra.mxu2 %v1348_v21  ;;  %v6131_v60 = vadd.f32 %v793_v54, %v760_v58  ;;  %v1592_v40 = vand.u32 4294901760, %v6152_v12  ;;  %v1367_v54 = vand.u32 4294901760, %v1366_v22  ;;  %v5076_v58 = vld [vmem:[%s7982_s6 + $0xc8] sm:$0xff] }
  0xd7   :  { %1352 = vmatmul.f32.gmra.mxu0 %v1351_v55  ;;  %v5080_v22 = vld [vmem:[%s7982_s6 + $0xe8] sm:$0xff] }
  0xd8   :  { %v797_v3 = vpop.f32.mrf.mxu3  ;;  %5165 = vperm.xlu2 %5458, %v5067_v56   ;;  %v1593_v44 = vsub.f32 %v6152_v12, %v1592_v40  ;;  %vm2318_vm9 = vcmp.gt.f32.partialorder %v6131_v60, 0.0 }
  0xd9   :  { %v763_v0 = vpop.f32.mrf.mxu2  ;;  %v723_v6 = vpop.f32.mrf.mxu1 }
  0xda   :  { %v724_v8 = vadd.f32 %v723_v6, %v684_v63  ;;  %5175 = vperm.xlu1 %5457, %v5069_v62   ;;  %v1594_v59 = vand.u32 4294901760, %v1593_v44  ;;  %v104_v63 = vld [vmem:[%s7978_s2 + $0xb8] sm:$0xff] }
  0xdb   :  { %5170 = vperm.xlu0 %5456, %v5068_v17   ;;  %v188_v17 = vpop.permute.xlu2 %187  ;;  %v5078_v44 = vld [vmem:[%s7982_s6 + $0xd8] sm:$0xff] }
  0xdc   :  { %v688_v19 = vpop.f32.mrf.mxu0  ;;  %v764_v21 = vadd.f32 %v763_v0, %v724_v8  ;;  %1398 = vmatmul.f32.gmra.mxu1 %v6071_v10  ;;  %v5075_v0 = vld [vmem:[%s7982_s6 + $0xc0] sm:$0xff]  ;;  %v6205_v8 = vsub.f32 %v1568_v48, %v6191_v61  ;;  %v39_v48 = vld [vmem:[%s7977_s1 + $0xc] sm:$0x3] }
  0xdd   :  { %1481 = vmatmul.f32.gmra.mxu3 %v1357_v51  ;;  %v689_v33 = vadd.f32 %v688_v19, %v6075_v15  ;;  %v5073_v51 = vld [vmem:[%s7982_s6 + $0xb0] sm:$0xff]  ;;  %v1571_v19 = vsel %vm305_vm0, %v104_v63, 0  ;;  %vm47_vm13 = vnez %v39_v48 }
  0xde   :  { %1440 = vmatmul.f32.gmra.mxu2 %v1356_v16  ;;  %v6154_v23 = vadd.f32 %v797_v3, %v764_v21  ;;  %v5077_v21 = vld [vmem:[%s7982_s6 + $0xd0] sm:$0xff] }
  0xdf   :  { %1360 = vmatmul.f32.gmra.mxu0 %v1359_v18 }
  0xe0   :  { %v801_v24 = vpop.f32.mrf.mxu3  ;;  %5180 = vperm.xlu2 %5458, %v5070_v43   ;;  %vm2319_vm8 = vcmp.gt.f32.partialorder %v6154_v23, 0.0 }
  0xe1   :  { %v767_v35 = vpop.f32.mrf.mxu2  ;;  %v729_v39 = vpop.f32.mrf.mxu1 }
  0xe2   :  { %v730_v16 = vadd.f32 %v729_v39, %v689_v33  ;;  %5190 = vperm.xlu1 %5457, %v5072_v30   ;;  %v1608_v30 = vand.u32 4294901760, %v6205_v8  ;;  %v6218_v33 = vand.u32 4294901760, %v1571_v19 }
  0xe3   :  { %5185 = vperm.xlu0 %5456, %v5071_v45  }
  0xe4   :  { %v693_v32 = vpop.f32.mrf.mxu0  ;;  %v768_v15 = vadd.f32 %v767_v35, %v730_v16  ;;  %1402 = vmatmul.f32.gmra.mxu1 %v6099_v38  ;;  %v5079_v16 = vld [vmem:[%s7982_s6 + $0xe0] sm:$0xff]  ;;  %v6229_v42 = vsub.f32 %v1571_v19, %v6218_v33 }
  0xe5   :  { %1487 = vmatmul.f32.gmra.mxu3 %v1365_v27  ;;  %v694_v57 = vadd.f32 %v693_v32, %v6101_v36  ;;  %v1609_v32 = vsub.f32 %v6205_v8, %v1608_v30 }
  0xe6   :  { %1445 = vmatmul.f32.gmra.mxu2 %v1364_v1  ;;  %v6180_v47 = vadd.f32 %v801_v24, %v768_v15  ;;  %v1600_v1 = vand.u32 4294901760, %v6178_v46 }
  0xe7   :  { %1368 = vmatmul.f32.gmra.mxu0 %v1367_v54  ;;  %v193_v54 = vpop.permute.xlu0 %192 }
  0xe8   :  { %v805_v55 = vpop.f32.mrf.mxu3  ;;  %v1601_v6 = vsub.f32 %v6178_v46, %v1600_v1  ;;  %5205 = vperm.xlu2 %5458, %v5075_v0   ;;  %v198_v0 = vpop.permute.xlu1 %197  ;;  %vm2320_vm7 = vcmp.gt.f32.partialorder %v6180_v47, 0.0 }
  0xe9   :  { %v771_v9 = vpop.f32.mrf.mxu2  ;;  %v735_v11 = vpop.f32.mrf.mxu1 }
  0xea   :  { %v736_v3 = vadd.f32 %v735_v11, %v694_v57  ;;  %5195 = vperm.xlu1 %5457, %v5073_v51   ;;  %v1602_v24 = vand.u32 4294901760, %v1601_v6  ;;  %v5081_v51 = vld [vmem:[%s7982_s6 + $0xf0] sm:$0xff]  ;;  %v55_v11 = vsel %vm47_vm13, 16843009, %v5486_v2  ;;  %v6256_v6 = vld [vmem:[%s7976_s0] sm:$0xff]  ;;  %s5445_s0 = sshll.u32 %s7984_s8, 4  ;;  %s5446_s0 = int_to_ptr.hbm [resolvable:$true] %s5445_s0 }
  0xeb   :  { %5210 = vperm.xlu0 %5456, %v5076_v58   ;;  %v1616_v58 = vand.u32 4294901760, %v6229_v42 }
  0xec   :  { %v843_v62 = vpop.f32.mrf.mxu0  ;;  %v772_v36 = vadd.f32 %v771_v9, %v736_v3  ;;  %1406 = vmatmul.f32.gmra.mxu1 %v6121_v53  ;;  %v1610_v9 = vand.u32 4294901760, %v1609_v32  ;;  %v63_v3 = vunpack.c.0.s8 %v55_v11 }
  0xed   :  { %1645 = vmatmul.f32.vlgmr.msrb.gmra.mxu3 %v6142_v7  ;;  %v844_v27 = vadd.f32 %v843_v62, %v188_v17  ;;  %v1617_v17 = vsub.f32 %v6229_v42, %v1616_v58 }
  0xee   :  { %1595 = vmatmul.f32.vlgmr.msrb.gmra.mxu2 %v1594_v59  ;;  %v6207_v18 = vadd.f32 %v805_v55, %v772_v36  ;;  %vm71_vm14 = vcmp.ne.s32.totalorder %v63_v3, 0  ;;  %v5074_v36 = vld [vmem:[%s7982_s6 + $0xb8] sm:$0xff] }
  0xef   :  { %1511 = vmatmul.f32.vlgmr.msrb.gmra.mxu0 %v6039_v52 }
  0xf0   :  { %v968_v20 = vpop.f32.mrf.mxu3  ;;  %5225 = vperm.xlu2 %5458, %v5079_v16   ;;  %vm2321_vm6 = vcmp.gt.f32.partialorder %v6207_v18, 0.0 }
  0xf1   :  { %v929_v56 = vpop.f32.mrf.mxu2  ;;  %v893_v26 = vpop.f32.mrf.mxu1 }
  0xf2   :  { %v894_v35 = vadd.f32 %v893_v26, %v844_v27  ;;  %5215 = vperm.xlu1 %5457, %v5077_v21  }
  0xf3   :  { %5230 = vperm.xlu0 %5456, %v5080_v22   ;;  %v5379_v22 = vld [vmem:[%s7983_s7] sm:$0xff] }
  0xf4   :  { %v851_v45 = vpop.f32.mrf.mxu0  ;;  %v930_v39 = vadd.f32 %v929_v56, %v894_v35  ;;  %1545 = vmatmul.f32.vlgmr.msrb.gmra.mxu1 %v6039_v52  ;;  %v1618_v35 = vand.u32 4294901760, %v1617_v17 }
  0xf5   :  { %1649 = vmatmul.f32.gmra.mxu3 %v6165_v41  ;;  %v852_v15 = vadd.f32 %v851_v45, %v193_v54 }
  0xf6   :  { %1603 = vmatmul.f32.gmra.mxu2 %v1602_v24  ;;  %v6231_v43 = vadd.f32 %v968_v20, %v930_v39 }
  0xf7   :  { %1515 = vmatmul.f32.gmra.mxu0 %v6071_v10 }
  0xf8   :  { %v974_v52 = vpop.f32.mrf.mxu3  ;;  %5200 = vperm.xlu2 %5458, %v5074_v36  }
  0xf9   :  { %v934_v55 = vpop.f32.mrf.mxu2  ;;  %v897_v57 = vpop.f32.mrf.mxu1 }
  0xfa   :  { %v898_v59 = vadd.f32 %v897_v57, %v852_v15  ;;  %5220 = vperm.xlu1 %5457, %v5078_v44   ;;  %v5082_v15 = vld [vmem:[%s7982_s6 + $0xf8] sm:$0xff] }
  0xfb   :  { %5235 = vperm.xlu0 %5456, %v5081_v51  }
  0xfc   :  { %v859_v62 = vpop.f32.mrf.mxu0  ;;  %v935_v63 = vadd.f32 %v934_v55, %v898_v59  ;;  %1549 = vmatmul.f32.gmra.mxu1 %v6071_v10  ;;  %v79_v10 = vsel %vm71_vm14, %v6256_v6, 0.0 }
  0xfd   :  { %1653 = vmatmul.f32.gmra.mxu3 %v6191_v61  ;;  %v860_v27 = vadd.f32 %v859_v62, %v198_v0  ;;  %v1839_v20 = vand.u32 4294901760, %v79_v10 }
  0xfe   :  { %1611 = vmatmul.f32.gmra.mxu2 %v1610_v9  ;;  %v6259_v19 = vadd.f32 %v974_v52, %v935_v63  ;;  %v203_v52 = vpop.permute.xlu2 %202  ;;  %v208_v63 = vpop.permute.xlu0 %207 }
  0xff   :  { %1519 = vmatmul.f32.gmra.mxu0 %v6099_v38  ;;  %v1890_v26 = vsub.f32 %v79_v10, %v1839_v20  ;;  %1967 = vmatpush.msrb.mxu3 %v1839_v20 }
 0x100   :  { %v980_v21 = vpop.f32.mrf.mxu3  ;;  %1840 = vmatpush.msrb.mxu0 %v1839_v20  ;;  %5240 = vperm.xlu2 %5458, %v5082_v15  }
 0x101   :  { %v939_v56 = vpop.f32.mrf.mxu2  ;;  %v901_v24 = vpop.f32.mrf.mxu1  ;;  %1929 = vmatpush.msrb.mxu2 %v1890_v26  ;;  %v1891_v39 = vand.u32 4294901760, %v1890_v26 }
 0x102   :  { %v902_v45 = vadd.f32 %v901_v24, %v860_v27 }
 0x103   :  { %5382 = vperm.xlu0 %5456, %v5379_v22   ;;  %v1892_v32 = vsub.f32 %v1890_v26, %v1891_v39  ;;  %v213_v22 = vpop.permute.xlu1 %212 }
 0x104   :  { %v867_v16 = vpop.f32.mrf.mxu0  ;;  %v940_v54 = vadd.f32 %v939_v56, %v902_v45  ;;  %1553 = vmatmul.f32.gmra.mxu1 %v6099_v38 }
 0x105   :  { %1657 = vmatmul.f32.gmra.mxu3 %v6218_v33  ;;  %v868_v44 = vadd.f32 %v867_v16, %v203_v52  ;;  %v1893_v55 = vand.u32 4294901760, %v1892_v32 }
 0x106   :  { %1619 = vmatmul.f32.gmra.mxu2 %v1618_v35  ;;  %v6270_v48 = vadd.f32 %v980_v21, %v940_v54 }
 0x107   :  { %1523 = vmatmul.f32.gmra.mxu0 %v6121_v53  ;;  %1894 = vmatpush.msrb.mxu1 %v1893_v55 }
 0x108   :  { %v986_v51 = vpop.f32.mrf.mxu3 }
 0x109   :  { %v944_v57 = vpop.f32.mrf.mxu2  ;;  %v905_v38 = vpop.f32.mrf.mxu1 }
 0x10a   :  { %v906_v9 = vadd.f32 %v905_v38, %v868_v44 }
 0x10c   :  { %v6273_v11 = vpop.f32.mrf.mxu0  ;;  %v945_v59 = vadd.f32 %v944_v57, %v906_v9  ;;  %1557 = vmatmul.f32.gmra.mxu1 %v6121_v53  ;;  %v105_v53 = vld [vmem:[%s7978_s2 + $0xc0] sm:$0xff] }
 0x10d   :  { %1796 = vmatmul.f32.vlgmr.msra.gmra.mxu3 %v6142_v7 }
 0x10e   :  { %1762 = vmatmul.f32.vlgmr.msra.gmra.mxu2 %v6142_v7  ;;  %v6278_v3 = vadd.f32 %v986_v51, %v945_v59  ;;  %v40_v7 = vld [vmem:[%s7977_s1 + $0xe] sm:$0x3] }
 0x10f   :  { %1681 = vmatmul.f32.vlgmr.msra.gmra.mxu0 %v6152_v12  ;;  %vm48_vm15 = vnez %v40_v7  ;;  %v223_v7 = vpop.permute.xlu0 %222 }
 0x110   :  { %v1144_v62 = vpop.f32.mrf.mxu3  ;;  %2011 = vmatpush.msra.mxu0 %v1891_v39  ;;  %v56_v21 = vsel %vm48_vm15, 16843009, %v5486_v2  ;;  %v106_v2 = vld [vmem:[%s7978_s2 + $0xc8] sm:$0xff] }
 0x111   :  { %v1094_v36 = vpop.f32.mrf.mxu2  ;;  %v6281_v0 = vpop.f32.mrf.mxu1  ;;  %v64_v56 = vunpack.c.0.s8 %v56_v21 }
 0x112   :  { %v1095_v17 = vadd.f32 %v1094_v36, %v208_v63 }
 0x113   :  { %vm72_vm1 = vcmp.ne.s32.totalorder %v64_v56, 0 }
 0x114   :  { %v6283_v10 = vpop.f32.mrf.mxu0  ;;  %v6285_v27 = vadd.f32 %v1144_v62, %v1095_v17  ;;  %1720 = vmatmul.f32.vlgmr.msra.gmra.mxu1 %v1592_v40  ;;  %v1813_v40 = vsel %vm305_vm0, %v105_v53, 0  ;;  %v107_v62 = vld [vmem:[%s7978_s2 + $0xd0] sm:$0xff] }
 0x115   :  { %1800 = vmatmul.f32.gmra.mxu3 %v6165_v41  ;;  %2045 = vmatpush.msra.mxu1 %v1839_v20  ;;  %v6302_v45 = vand.u32 4294901760, %v1813_v40  ;;  %v1819_v53 = vsel %vm305_vm0, %v107_v62, 0 }
 0x116   :  { %1766 = vmatmul.f32.gmra.mxu2 %v6165_v41  ;;  %v80_v41 = vsel %vm72_vm1, %v6256_v6, 0.0  ;;  %v6343_v56 = vand.u32 4294901760, %v1819_v53 }
 0x117   :  { %1686 = vmatmul.f32.gmra.mxu0 %v6178_v46  ;;  %v6309_v16 = vand.u32 4294901760, %v80_v41  ;;  %v1842_v6 = vsub.f32 %v1813_v40, %v6302_v45  ;;  %v1816_v46 = vsel %vm305_vm0, %v106_v2, 0 }
 0x118   :  { %v1148_v12 = vpop.f32.mrf.mxu3 }
 0x119   :  { %v1102_v26 = vpop.f32.mrf.mxu2  ;;  %v6300_v24 = vpop.f32.mrf.mxu1  ;;  %v2141_v54 = vsub.f32 %v80_v41, %v6309_v16  ;;  %2091 = vmatpush.msra.mxu2 %v6309_v16  ;;  %v1843_v57 = vand.u32 4294901760, %v1842_v6  ;;  %v1858_v41 = vsub.f32 %v1819_v53, %v6343_v56  ;;  %v517_v53 = vadd.f32 %v6042_v49, %v5980_v13 }
 0x11a   :  { %v1103_v35 = vadd.f32 %v1102_v26, %v213_v22  ;;  %v108_v26 = vld [vmem:[%s7978_s2 + $0xd8] sm:$0xff]  ;;  %v509_v13 = vadd.f32 %v5992_v25, %v5937_v34 }
 0x11b   :  { %v2142_v15 = vand.u32 4294901760, %v2141_v54  ;;  %v1844_v63 = vsub.f32 %v1842_v6, %v1843_v57 }
 0x11c   :  { %v6305_v39 = vpop.f32.mrf.mxu0  ;;  %v6307_v20 = vadd.f32 %v1148_v12, %v1103_v35  ;;  %1726 = vmatmul.f32.gmra.mxu1 %v1600_v1  ;;  %v218_v1 = vpop.permute.xlu2 %217 }
 0x11d   :  { %1804 = vmatmul.f32.gmra.mxu3 %v6191_v61  ;;  %v2143_v51 = vsub.f32 %v2141_v54, %v2142_v15  ;;  %v1845_v12 = vand.u32 4294901760, %v1844_v63 }
 0x11e   :  { %1770 = vmatmul.f32.gmra.mxu2 %v6191_v61  ;;  %v6325_v61 = vand.u32 4294901760, %v1816_v46 }
 0x11f   :  { %1691 = vmatmul.f32.gmra.mxu0 %v6205_v8  ;;  %v2144_v59 = vand.u32 4294901760, %v2143_v51 }
 0x120   :  { %v1152_v32 = vpop.f32.mrf.mxu3  ;;  %v1850_v36 = vsub.f32 %v1816_v46, %v6325_v61 }
 0x121   :  { %v1110_v52 = vpop.f32.mrf.mxu2  ;;  %v6323_v44 = vpop.f32.mrf.mxu1  ;;  %2145 = vmatpush.msra.mxu3 %v2144_v59 }
 0x122   :  { %v1111_v55 = vadd.f32 %v1110_v52, %v218_v1  ;;  %v1851_v40 = vand.u32 4294901760, %v1850_v36 }
 0x124   :  { %v6327_v38 = vpop.f32.mrf.mxu0  ;;  %v6329_v9 = vadd.f32 %v1152_v32, %v1111_v55  ;;  %1732 = vmatmul.f32.gmra.mxu1 %v1608_v30  ;;  %v1852_v35 = vsub.f32 %v1850_v36, %v1851_v40  ;;  %v1822_v32 = vsel %vm305_vm0, %v108_v26, 0  ;;  %v1859_v55 = vand.u32 4294901760, %v1858_v41 }
 0x125   :  { %1808 = vmatmul.f32.gmra.mxu3 %v6218_v33  ;;  %v6356_v51 = vand.u32 4294901760, %v1822_v32 }
 0x126   :  { %1774 = vmatmul.f32.gmra.mxu2 %v6218_v33  ;;  %v1853_v52 = vand.u32 4294901760, %v1852_v35 }
 0x127   :  { %1696 = vmatmul.f32.gmra.mxu0 %v6229_v42  ;;  %v1866_v62 = vsub.f32 %v1822_v32, %v6356_v51 }
 0x128   :  { %v1156_v17 = vpop.f32.mrf.mxu3 }
 0x129   :  { %v1118_v8 = vpop.f32.mrf.mxu2  ;;  %v6341_v30 = vpop.f32.mrf.mxu1 }
 0x12a   :  { %v1119_v21 = vadd.f32 %v1118_v8, %v223_v7 }
 0x12c   :  { %v6345_v22 = vadd.f32 %v1156_v17, %v1119_v21  ;;  %v1180_v33 = vpop.f32.mrf.mxu0  ;;  %1738 = vmatmul.f32.gmra.mxu1 %v1616_v58  ;;  %v551_v21 = vadd.f32 %v6069_v5, %v517_v53  ;;  %v111_v53 = vld [vmem:[%s7978_s2 + $0xf0] sm:$0xff] }
 0x12d   :  { %1971 = vmatmul.f32.vlgmr.msrb.gmra.mxu3 %v1843_v57  ;;  %v1181_v42 = vadd.f32 %v1180_v33, %v6285_v27  ;;  %v109_v57 = vld [vmem:[%s7978_s2 + $0xe0] sm:$0xff]  ;;  %v1867_v33 = vand.u32 4294901760, %v1866_v62 }
 0x12e   :  { %1932 = vmatmul.f32.vlgmr.msrb.gmra.mxu2 %v1842_v6  ;;  %2296 = vmatpush.msrb.mxu3 %v6309_v16  ;;  %v2064_v63 = vsel %vm305_vm0, %v109_v57, 0  ;;  %v2348_v5 = vmul.f32 0.01, %v551_v21  ;;  %vm2316_vm3 = vcmp.gt.f32.partialorder %v551_v21, 0.0 }
 0x12f   :  { %1846 = vmatmul.f32.vlgmr.msrb.gmra.mxu0 %v1845_v12  ;;  %2262 = vmatpush.msrb.mxu2 %v2142_v15  ;;  %v1860_v15 = vsub.f32 %v1858_v41, %v1859_v55  ;;  %v1868_v34 = vsub.f32 %v1866_v62, %v1867_v33 }
 0x130   :  { %v1295_v2 = vpop.f32.mrf.mxu3  ;;  %2180 = vmatpush.msrb.mxu0 %v2141_v54  ;;  %v521_v54 = vadd.f32 %v6073_v14, %v5997_v28  ;;  %v513_v14 = vadd.f32 %v6011_v37, %v5960_v31  ;;  %v110_v37 = vld [vmem:[%s7978_s2 + $0xe8] sm:$0xff] }
 0x131   :  { %v1261_v58 = vpop.f32.mrf.mxu2  ;;  %v1219_v46 = vpop.f32.mrf.mxu1 }
 0x132   :  { %v1220_v1 = vadd.f32 %v1219_v46, %v1181_v42  ;;  %v555_v7 = vadd.f32 %v6096_v29, %v521_v54  ;;  %v547_v26 = vadd.f32 %v6037_v50, %v513_v14  ;;  %v543_v50 = vadd.f32 %v6006_v4, %v509_v13 }
 0x133   :  { %v2380_v4 = vsel %vm2316_vm3, %v551_v21, %v2348_v5 }
 0x134   :  { %v1185_v6 = vpop.f32.mrf.mxu0  ;;  %v1262_v59 = vadd.f32 %v1261_v58, %v1220_v1  ;;  %1896 = vmatmul.f32.vlgmr.msrb.gmra.mxu1 %v6302_v45  ;;  %v2349_v49 = vmul.f32 0.01, %v555_v7  ;;  %vm2317_vm2 = vcmp.gt.f32.partialorder %v555_v7, 0.0  ;;  %v2347_v25 = vmul.f32 0.01, %v547_v26 }
 0x135   :  { %1977 = vmatmul.f32.gmra.mxu3 %v1851_v40  ;;  %2218 = vmatpush.msrb.mxu1 %v6309_v16  ;;  %v1186_v8 = vadd.f32 %v1185_v6, %v6307_v20  ;;  %v1861_v40 = vand.u32 4294901760, %v1860_v15  ;;  %vm2315_vm4 = vcmp.gt.f32.partialorder %v547_v26, 0.0  ;;  %v2067_v58 = vsel %vm305_vm0, %v110_v37, 0 }
 0x136   :  { %1937 = vmatmul.f32.gmra.mxu2 %v1850_v36  ;;  %v6365_v27 = vadd.f32 %v1295_v2, %v1262_v59  ;;  %v6375_v36 = vand.u32 4294901760, %v2064_v63  ;;  %v2381_v32 = vsel %vm2317_vm2, %v555_v7, %v2349_v49  ;;  %v1869_v6 = vand.u32 4294901760, %v1868_v34 }
 0x137   :  { %1854 = vmatmul.f32.gmra.mxu0 %v1853_v52  ;;  %v2346_v52 = vmul.f32 0.01, %v543_v50  ;;  %vm2314_vm5 = vcmp.gt.f32.partialorder %v543_v50, 0.0  ;;  %v2379_v57 = vsel %vm2315_vm4, %v547_v26, %v2347_v25  ;;  %v6394_v59 = vand.u32 4294901760, %v2381_v32  ;;  %v228_v25 = vpop.permute.xlu1 %227 }
 0x138   :  { %v1299_v17 = vpop.f32.mrf.mxu3  ;;  %v6383_v31 = vsub.f32 %v2064_v63, %v6375_v36  ;;  %v6396_v15 = vand.u32 4294901760, %v2067_v58  ;;  %vm2326_vm3 = vcmp.gt.f32.partialorder %v6365_v27, 0.0 }
 0x139   :  { %v1265_v28 = vpop.f32.mrf.mxu2  ;;  %v1225_v16 = vpop.f32.mrf.mxu1  ;;  %v2378_v7 = vsel %vm2314_vm5, %v543_v50, %v2346_v52  ;;  %v6412_v14 = vsub.f32 %v2381_v32, %v6394_v59 }
 0x13a   :  { %v1226_v12 = vadd.f32 %v1225_v16, %v1186_v8  ;;  %v2094_v1 = vand.u32 4294901760, %v6383_v31  ;;  %v6407_v8 = vand.u32 4294901760, %v2379_v57 }
 0x13b   :  { %v2714_v50 = vand.u32 4294901760, %v6412_v14 }
 0x13c   :  { %v1190_v35 = vpop.f32.mrf.mxu0  ;;  %v1266_v29 = vadd.f32 %v1265_v28, %v1226_v12  ;;  %1900 = vmatmul.f32.gmra.mxu1 %v6325_v61 }
 0x13d   :  { %1983 = vmatmul.f32.gmra.mxu3 %v1859_v55 }
 0x13e   :  { %1942 = vmatmul.f32.gmra.mxu2 %v1858_v41  ;;  %v6389_v20 = vadd.f32 %v1299_v17, %v1266_v29  ;;  %v1191_v41 = vadd.f32 %v1190_v35, %v6329_v9  ;;  %v6399_v9 = vand.u32 4294901760, %v2380_v4  ;;  %v2095_v17 = vsub.f32 %v6383_v31, %v2094_v1 }
 0x13f   :  { %1862 = vmatmul.f32.gmra.mxu0 %v1861_v40  ;;  %v2070_v40 = vsel %vm305_vm0, %v111_v53, 0  ;;  %v6425_v29 = vsub.f32 %v2379_v57, %v6407_v8 }
 0x140   :  { %v1303_v2 = vpop.f32.mrf.mxu3  ;;  %v2096_v35 = vand.u32 4294901760, %v2095_v17  ;;  %v6422_v13 = vsub.f32 %v2380_v4, %v6399_v9  ;;  %v2715_v4 = vsub.f32 %v6412_v14, %v2714_v50  ;;  %vm2327_vm2 = vcmp.gt.f32.partialorder %v6389_v20, 0.0 }
 0x141   :  { %v1269_v42 = vpop.f32.mrf.mxu2  ;;  %v1231_v46 = vpop.f32.mrf.mxu1 }
 0x142   :  { %v1232_v55 = vadd.f32 %v1231_v46, %v1191_v41  ;;  %v2720_v32 = vand.u32 4294901760, %v6422_v13  ;;  %v112_v41 = vld [vmem:[%s7978_s2 + $0xf8] sm:$0xff]  ;;  %v2726_v46 = vand.u32 4294901760, %v6425_v29 }
 0x144   :  { %v1195_v54 = vpop.f32.mrf.mxu0  ;;  %v1270_v63 = vadd.f32 %v1269_v42, %v1232_v55  ;;  %1904 = vmatmul.f32.gmra.mxu1 %v6343_v56  ;;  %v2721_v17 = vsub.f32 %v6422_v13, %v2720_v32 }
 0x145   :  { %1989 = vmatmul.f32.gmra.mxu3 %v1867_v33  ;;  %v1196_v21 = vadd.f32 %v1195_v54, %v6345_v22  ;;  %v6419_v33 = vand.u32 4294901760, %v2378_v7  ;;  %v6429_v22 = vand.u32 4294901760, %v2070_v40  ;;  %v2073_v54 = vsel %vm305_vm0, %v112_v41, 0 }
 0x146   :  { %1947 = vmatmul.f32.gmra.mxu2 %v1866_v62  ;;  %v6409_v28 = vadd.f32 %v1303_v2, %v1270_v63  ;;  %v6415_v62 = vsub.f32 %v2067_v58, %v6396_v15 }
 0x147   :  { %1870 = vmatmul.f32.gmra.mxu0 %v1869_v6  ;;  %v6435_v2 = vsub.f32 %v2378_v7, %v6419_v33  ;;  %v6455_v6 = vsub.f32 %v2070_v40, %v6429_v22 }
 0x148   :  { %v1307_v16 = vpop.f32.mrf.mxu3  ;;  %v7987_v5 = vand.u32 4294901760, %v6415_v62  ;;  %vm2328_vm1 = vcmp.gt.f32.partialorder %v6409_v28, 0.0 }
 0x149   :  { %v1273_v12 = vpop.f32.mrf.mxu2  ;;  %v1237_v26 = vpop.f32.mrf.mxu1  ;;  %v2732_v53 = vand.u32 4294901760, %v6435_v2 }
 0x14a   :  { %v1238_v49 = vadd.f32 %v1237_v26, %v1196_v21  ;;  %v2103_v55 = vsub.f32 %v6415_v62, %v7987_v5  ;;  %v7985_v26 = vand.u32 4294901760, %v6455_v6 }
 0x14b   :  { %v2733_v41 = vsub.f32 %v6435_v2, %v2732_v53 }
 0x14c   :  { %v1345_v37 = vpop.f32.mrf.mxu0  ;;  %v1274_v34 = vadd.f32 %v1273_v12, %v1238_v49  ;;  %1908 = vmatmul.f32.gmra.mxu1 %v6356_v51  ;;  %v2716_v12 = vand.u32 4294901760, %v2715_v4  ;;  %v2104_v40 = vand.u32 4294901760, %v2103_v55  ;;  %v2353_v49 = vmul.f32 0.01, %v6207_v18 }
 0x14d   :  { %2147 = vmatmul.f32.vlgmr.msra.gmra.mxu3 %v6375_v36  ;;  %v1346_v58 = vadd.f32 %v1345_v37, %v228_v25  ;;  %v2722_v25 = vand.u32 4294901760, %v2721_v17 }
 0x14e   :  { %2811 = vmatpush.msra.mxu3 %v6394_v59  ;;  %2097 = vmatmul.f32.vlgmr.msra.gmra.mxu2 %v2096_v35  ;;  %v6441_v42 = vadd.f32 %v1307_v16, %v1274_v34  ;;  %v2727_v16 = vsub.f32 %v6425_v29, %v2726_v46  ;;  %v6472_v35 = vand.u32 4294901760, %v2073_v54  ;;  %v233_v34 = vpop.permute.xlu2 %232 }
 0x14f   :  { %2013 = vmatmul.f32.vlgmr.msra.gmra.mxu0 %v6302_v45  ;;  %2767 = vmatpush.msra.mxu2 %v6412_v14 }
 0x150   :  { %2660 = vmatpush.msra.mxu0 %v6394_v59  ;;  %2813 = vmatpush.msra.mxu3 %v6399_v9  ;;  %v1470_v52 = vpop.f32.mrf.mxu3  ;;  %v2728_v55 = vand.u32 4294901760, %v2727_v16  ;;  %v6491_v17 = vsub.f32 %v2073_v54, %v6472_v35  ;;  %v2734_v16 = vand.u32 4294901760, %v2733_v41  ;;  %v238_v41 = vpop.permute.xlu0 %237  ;;  %vm2329_vm15 = vcmp.gt.f32.partialorder %v6441_v42, 0.0 }
 0x151   :  { %2770 = vmatpush.msra.mxu2 %v6422_v13  ;;  %v1431_v57 = vpop.f32.mrf.mxu2  ;;  %v1395_v63 = vpop.f32.mrf.mxu1  ;;  %v2410_v13 = vld [vmem:[%s7980_s4] sm:$0xff] }
 0x152   :  { %2662 = vmatpush.msra.mxu0 %v6399_v9  ;;  %2815 = vmatpush.msra.mxu3 %v6407_v8  ;;  %v1396_v7 = vadd.f32 %v1395_v63, %v1346_v58  ;;  %v2111_v63 = vsub.f32 %v6455_v6, %v7985_v26 }
 0x153   :  { %2773 = vmatpush.msra.mxu2 %v6425_v29 }
 0x154   :  { %2664 = vmatpush.msra.mxu0 %v6407_v8  ;;  %2817 = vmatpush.msra.mxu3 %v6419_v33  ;;  %v1353_v21 = vpop.f32.mrf.mxu0  ;;  %v1432_v37 = vadd.f32 %v1431_v57, %v1396_v7  ;;  %v2112_v26 = vand.u32 4294901760, %v2111_v63 }
 0x155   :  { %2047 = vmatmul.f32.vlgmr.msra.gmra.mxu1 %v6302_v45  ;;  %2151 = vmatmul.f32.gmra.mxu3 %v6396_v15  ;;  %v1354_v58 = vadd.f32 %v1353_v21, %v233_v34  ;;  %v2352_v45 = vmul.f32 0.01, %v6180_v47  ;;  %v2351_v21 = vmul.f32 0.01, %v6154_v23 }
 0x156   :  { %2666 = vmatpush.msra.mxu0 %v6419_v33  ;;  %2717 = vmatpush.msra.mxu1 %v2716_v12  ;;  %v6482_v4 = vadd.f32 %v1470_v52, %v1432_v37  ;;  %v2385_v52 = vsel %vm2321_vm6, %v6207_v18, %v2353_v49  ;;  %v7986_v18 = vand.u32 4294901760, %v6491_v17 }
 0x157   :  { %2776 = vmatpush.msra.mxu2 %v6435_v2  ;;  %2017 = vmatmul.f32.gmra.mxu0 %v6325_v61  ;;  %v2384_v54 = vsel %vm2320_vm7, %v6180_v47, %v2352_v45  ;;  %v6501_v34 = vand.u32 4294901760, %v2385_v52 }
 0x158   :  { %2105 = vmatmul.f32.gmra.mxu2 %v2104_v40  ;;  %2723 = vmatpush.msra.mxu1 %v2722_v25  ;;  %v1476_v57 = vpop.f32.mrf.mxu3  ;;  %v2350_v40 = vmul.f32 0.01, %v6131_v60 }
 0x159   :  { %v1436_v7 = vpop.f32.mrf.mxu2  ;;  %v1399_v12 = vpop.f32.mrf.mxu1 }
 0x15a   :  { %2729 = vmatpush.msra.mxu1 %v2728_v55  ;;  %v1400_v37 = vadd.f32 %v1399_v12, %v1354_v58  ;;  %v2383_v55 = vsel %vm2319_vm8, %v6154_v23, %v2351_v21  ;;  %v6508_v58 = vand.u32 4294901760, %v2384_v54  ;;  %v2382_v63 = vsel %vm2318_vm9, %v6131_v60, %v2350_v40 }
 0x15b   :  { %v6515_v12 = vsub.f32 %v2385_v52, %v6501_v34 }
 0x15c   :  { %2735 = vmatpush.msra.mxu1 %v2734_v16  ;;  %v1361_v25 = vpop.f32.mrf.mxu0  ;;  %v1437_v49 = vadd.f32 %v1436_v7, %v1400_v37  ;;  %v6520_v16 = vand.u32 4294901760, %v2383_v55  ;;  %v6522_v37 = vand.u32 4294901760, %v2382_v63 }
 0x15d   :  { %2051 = vmatmul.f32.gmra.mxu1 %v6325_v61  ;;  %2155 = vmatmul.f32.gmra.mxu3 %v6429_v22  ;;  %v1362_v47 = vadd.f32 %v1361_v25, %v238_v41  ;;  %v2119_v61 = vsub.f32 %v6491_v17, %v7986_v18  ;;  %v3004_v52 = vand.u32 4294901760, %v6515_v12  ;;  %v243_v41 = vpop.permute.xlu1 %242 }
 0x15e   :  { %v6510_v45 = vadd.f32 %v1476_v57, %v1437_v49  ;;  %v6525_v57 = vsub.f32 %v2384_v54, %v6508_v58  ;;  %v6534_v18 = vsub.f32 %v2382_v63, %v6522_v37 }
 0x15f   :  { %2021 = vmatmul.f32.gmra.mxu0 %v6343_v56  ;;  %v2120_v40 = vand.u32 4294901760, %v2119_v61 }
 0x160   :  { %2113 = vmatmul.f32.gmra.mxu2 %v2112_v26  ;;  %v1482_v7 = vpop.f32.mrf.mxu3  ;;  %v6529_v26 = vsub.f32 %v2383_v55, %v6520_v16  ;;  %v3005_v55 = vsub.f32 %v6515_v12, %v3004_v52 }
 0x161   :  { %v1441_v23 = vpop.f32.mrf.mxu2  ;;  %v1403_v21 = vpop.f32.mrf.mxu1 }
 0x162   :  { %v1404_v25 = vadd.f32 %v1403_v21, %v1362_v47  ;;  %v7988_v47 = vand.u32 4294901760, %v6525_v57 }
 0x164   :  { %v1369_v60 = vpop.f32.mrf.mxu0  ;;  %v1442_v49 = vadd.f32 %v1441_v23, %v1404_v25  ;;  %v7990_v23 = vand.u32 4294901760, %v6529_v26  ;;  %v3011_v63 = vsub.f32 %v6525_v57, %v7988_v47 }
 0x165   :  { %2055 = vmatmul.f32.gmra.mxu1 %v6343_v56  ;;  %2159 = vmatmul.f32.gmra.mxu3 %v6472_v35  ;;  %v1370_v5 = vadd.f32 %v1369_v60, %v243_v41 }
 0x166   :  { %v6536_v54 = vadd.f32 %v1482_v7, %v1442_v49  ;;  %v7989_v7 = vand.u32 4294901760, %v6534_v18  ;;  %v3006_v49 = vand.u32 4294901760, %v3005_v55  ;;  %v3017_v41 = vsub.f32 %v6529_v26, %v7990_v23  ;;  %v248_v55 = vpop.permute.xlu2 %247 }
 0x167   :  { %2025 = vmatmul.f32.gmra.mxu0 %v6356_v51 }
 0x168   :  { %2121 = vmatmul.f32.gmra.mxu2 %v2120_v40  ;;  %v1488_v61 = vpop.f32.mrf.mxu3  ;;  %v3023_v47 = vsub.f32 %v6534_v18, %v7989_v7 }
 0x169   :  { %v1446_v56 = vpop.f32.mrf.mxu2  ;;  %v1407_v21 = vpop.f32.mrf.mxu1 }
 0x16a   :  { %v1408_v25 = vadd.f32 %v1407_v21, %v1370_v5  ;;  %v3012_v21 = vand.u32 4294901760, %v3011_v63 }
 0x16c   :  { %v6548_v60 = vpop.f32.mrf.mxu0  ;;  %v1447_v40 = vadd.f32 %v1446_v56, %v1408_v25  ;;  %v3018_v56 = vand.u32 4294901760, %v3017_v41  ;;  %v8015_v41 = vand.u32 4294901760, %v6455_v6 }
 0x16d   :  { %2059 = vmatmul.f32.gmra.mxu1 %v6356_v51  ;;  %2298 = vmatmul.f32.vlgmr.msrb.gmra.mxu3 %v6375_v36 }
 0x16e   :  { %3007 = vmatpush.msrb.mxu3 %v3006_v49  ;;  %v6555_v5 = vadd.f32 %v1488_v61, %v1447_v40 }
 0x16f   :  { %2183 = vmatmul.f32.vlgmr.msrb.gmra.mxu0 %v6383_v31 }
 0x170   :  { %2264 = vmatmul.f32.vlgmr.msrb.gmra.mxu2 %v6375_v36  ;;  %2858 = vmatpush.msrb.mxu0 %v2714_v50  ;;  %v1646_v51 = vpop.f32.mrf.mxu3  ;;  %v3024_v36 = vand.u32 4294901760, %v3023_v47 }
 0x171   :  { %2950 = vmatpush.msrb.mxu2 %v6501_v34  ;;  %3013 = vmatpush.msrb.mxu3 %v3012_v21  ;;  %v1596_v61 = vpop.f32.mrf.mxu2  ;;  %v6567_v25 = vpop.f32.mrf.mxu1 }
 0x172   :  { %2862 = vmatpush.msrb.mxu0 %v2720_v32  ;;  %v1597_v63 = vadd.f32 %v1596_v61, %v248_v55  ;;  %v253_v61 = vpop.permute.xlu0 %252 }
 0x173   :  { %2952 = vmatpush.msrb.mxu2 %v6508_v58  ;;  %3019 = vmatpush.msrb.mxu3 %v3018_v56 }
 0x174   :  { %2866 = vmatpush.msrb.mxu0 %v2726_v46  ;;  %v6572_v14 = vpop.f32.mrf.mxu0  ;;  %v1647_v50 = vadd.f32 %v1646_v51, %v1597_v63  ;;  %v8014_v46 = vand.u32 4294901760, %v6415_v62 }
 0x175   :  { %2954 = vmatpush.msrb.mxu2 %v6520_v16  ;;  %3025 = vmatpush.msrb.mxu3 %v3024_v36 }
 0x176   :  { %2222 = vmatmul.f32.vlgmr.msrb.gmra.mxu1 %v2094_v1  ;;  %2302 = vmatmul.f32.gmra.mxu3 %v6396_v15  ;;  %v2636_v1 = vsel %vm2634_vm10, %v2410_v13, 0 }
 0x177   :  { %2870 = vmatpush.msrb.mxu0 %v2732_v53  ;;  %2901 = vmatpush.msrb.mxu1 %v6394_v59  ;;  %v6596_v59 = vand.u32 4294901760, %v2636_v1 }
 0x178   :  { %2956 = vmatpush.msrb.mxu2 %v6522_v37  ;;  %2188 = vmatmul.f32.gmra.mxu0 %v6415_v62  ;;  %v6586_v29 = vpop.f32.mrf.mxu3 }
 0x179   :  { %2268 = vmatmul.f32.gmra.mxu2 %v6396_v15  ;;  %2903 = vmatpush.msrb.mxu1 %v6399_v9  ;;  %v1604_v31 = vpop.f32.mrf.mxu2  ;;  %v6591_v32 = vpop.f32.mrf.mxu1  ;;  %v2411_v15 = vld [vmem:[%s7980_s4 + $0x8] sm:$0xff] }
 0x17a   :  { %v2639_v62 = vsel %vm2634_vm10, %v2411_v15, 0  ;;  %v8016_v15 = vand.u32 4294901760, %v6491_v17 }
 0x17b   :  { %2905 = vmatpush.msrb.mxu1 %v6407_v8  ;;  %v2668_v8 = vsub.f32 %v2636_v1, %v6596_v59  ;;  %v6617_v40 = vand.u32 4294901760, %v2639_v62 }
 0x17c   :  { %v6594_v2 = vpop.f32.mrf.mxu0 }
 0x17d   :  { %2907 = vmatpush.msrb.mxu1 %v6419_v33  ;;  %v2669_v49 = vand.u32 4294901760, %v2668_v8  ;;  %v2676_v56 = vsub.f32 %v2639_v62, %v6617_v40 }
 0x17e   :  { %2228 = vmatmul.f32.gmra.mxu1 %v8014_v46  ;;  %2306 = vmatmul.f32.gmra.mxu3 %v6429_v22 }
 0x17f   :  { %v2670_v51 = vsub.f32 %v2668_v8, %v2669_v49  ;;  %v2677_v1 = vand.u32 4294901760, %v2676_v56 }
 0x180   :  { %2193 = vmatmul.f32.gmra.mxu0 %v6455_v6  ;;  %v6606_v9 = vpop.f32.mrf.mxu3 }
 0x181   :  { %2272 = vmatmul.f32.gmra.mxu2 %v6429_v22  ;;  %v6610_v53 = vpop.f32.mrf.mxu2  ;;  %v6612_v33 = vpop.f32.mrf.mxu1  ;;  %v2412_v22 = vld [vmem:[%s7980_s4 + $0x10] sm:$0xff]  ;;  %v2671_v13 = vand.u32 4294901760, %v2670_v51  ;;  %v2678_v51 = vsub.f32 %v2676_v56, %v2677_v1 }
 0x182   :  { %v2642_v63 = vsel %vm2634_vm10, %v2412_v22, 0 }
 0x183   :  { %v6635_v46 = vand.u32 4294901760, %v2642_v63 }
 0x184   :  { %v6615_v47 = vpop.f32.mrf.mxu0 }
 0x185   :  { %v6645_v7 = vsub.f32 %v2642_v63, %v6635_v46 }
 0x186   :  { %2234 = vmatmul.f32.gmra.mxu1 %v8015_v41  ;;  %2310 = vmatmul.f32.gmra.mxu3 %v6472_v35 }
 0x188   :  { %2198 = vmatmul.f32.gmra.mxu0 %v6491_v17  ;;  %v6626_v21 = vpop.f32.mrf.mxu3 }
 0x189   :  { %2276 = vmatmul.f32.gmra.mxu2 %v6472_v35  ;;  %v6629_v55 = vpop.f32.mrf.mxu2  ;;  %v6632_v6 = vpop.f32.mrf.mxu1  ;;  %v2413_v35 = vld [vmem:[%s7980_s4 + $0x18] sm:$0xff] }
 0x18c   :  { %v1682_v36 = vpop.f32.mrf.mxu0 }
 0x18d   :  { %v1683_v41 = vadd.f32 %v1682_v36, %v1647_v50  ;;  %v8017_v36 = vand.u32 4294901760, %v6525_v57 }
 0x18e   :  { %2240 = vmatmul.f32.gmra.mxu1 %v8016_v15  ;;  %2821 = vmatmul.f32.vlgmr.msra.gmra.mxu3 %v2669_v49  ;;  %v2645_v49 = vsel %vm2634_vm10, %v2413_v35, 0  ;;  %v1605_v15 = vadd.f32 %v1604_v31, %v253_v61  ;;  %v8018_v31 = vand.u32 4294901760, %v6529_v26  ;;  %v1023_v35 = vadd.f32 %v6327_v38, %v6278_v3  ;;  %v258_v3 = vpop.permute.xlu1 %257 }
 0x18f   :  { %3191 = vmatpush.msra.mxu3 %v6501_v34  ;;  %v6659_v23 = vand.u32 4294901760, %v2645_v49 }
 0x190   :  { %2672 = vmatmul.f32.vlgmr.msra.gmra.mxu0 %v2671_v13  ;;  %v1797_v62 = vpop.f32.mrf.mxu3  ;;  %v1651_v61 = vadd.f32 %v6586_v29, %v1605_v15  ;;  %v8019_v29 = vand.u32 4294901760, %v6534_v18 }
 0x191   :  { %2779 = vmatmul.f32.vlgmr.msra.gmra.mxu2 %v2668_v8  ;;  %3057 = vmatpush.msra.mxu0 %v6515_v12  ;;  %v1763_v22 = vpop.f32.mrf.mxu2  ;;  %v1721_v17 = vpop.f32.mrf.mxu1  ;;  %v2679_v12 = vand.u32 4294901760, %v2678_v51  ;;  %v6679_v51 = vsub.f32 %v2645_v49, %v6659_v23 }
 0x192   :  { %3148 = vmatpush.msra.mxu2 %v3004_v52  ;;  %3193 = vmatpush.msra.mxu3 %v6508_v58  ;;  %v1722_v50 = vadd.f32 %v1721_v17, %v1683_v41  ;;  %v6652_v8 = vpop.permute.xlu0 %267  ;;  %v2685_v52 = vand.u32 4294901760, %v6645_v7  ;;  %v1613_v17 = vadd.f32 %v6610_v53, %v258_v3 }
 0x193   :  { %3060 = vmatpush.msra.mxu0 %v6525_v57 }
 0x194   :  { %3152 = vmatpush.msra.mxu2 %v8017_v36  ;;  %3195 = vmatpush.msra.mxu3 %v6520_v16  ;;  %v1687_v63 = vpop.f32.mrf.mxu0  ;;  %v1764_v13 = vadd.f32 %v1763_v22, %v1722_v50  ;;  %v1015_v50 = vadd.f32 %v6283_v10, %v6259_v19  ;;  %v1019_v36 = vadd.f32 %v6305_v39, %v6270_v48 }
 0x195   :  { %3063 = vmatpush.msra.mxu0 %v6529_v26  ;;  %v2414_v26 = vld [vmem:[%s7980_s4 + $0x20] sm:$0xff]  ;;  %v1688_v22 = vadd.f32 %v1687_v63, %v1651_v61  ;;  %v1011_v19 = vadd.f32 %v6273_v11, %v6231_v43  ;;  %v1655_v10 = vadd.f32 %v6606_v9, %v1613_v17  ;;  %v2415_v43 = vld [vmem:[%s7980_s4 + $0x28] sm:$0xff]  ;;  %v263_v11 = vpop.permute.xlu2 %262 }
 0x196   :  { %3156 = vmatpush.msra.mxu2 %v8018_v31  ;;  %3197 = vmatpush.msra.mxu3 %v6522_v37  ;;  %v6665_v57 = vadd.f32 %v1797_v62, %v1764_v13  ;;  %v1053_v53 = vadd.f32 %v6323_v44, %v1019_v36 }
 0x197   :  { %2737 = vmatmul.f32.vlgmr.msra.gmra.mxu1 %v6596_v59  ;;  %2827 = vmatmul.f32.gmra.mxu3 %v2677_v1  ;;  %v2686_v1 = vsub.f32 %v6645_v7, %v2685_v52 }
 0x198   :  { %3066 = vmatpush.msra.mxu0 %v6534_v18  ;;  %3101 = vmatpush.msra.mxu1 %v6501_v34  ;;  %v1801_v41 = vpop.f32.mrf.mxu3  ;;  %v1057_v34 = vadd.f32 %v6341_v30, %v1023_v35  ;;  %v2926_v18 = vsel %vm2634_vm10, %v2414_v26, 0  ;;  %v1049_v30 = vadd.f32 %v6300_v24, %v1015_v50  ;;  %v1045_v24 = vadd.f32 %v6281_v0, %v1011_v19 }
 0x199   :  { %3160 = vmatpush.msra.mxu2 %v8019_v29  ;;  %2680 = vmatmul.f32.gmra.mxu0 %v2679_v12  ;;  %v1767_v62 = vpop.f32.mrf.mxu2  ;;  %v1727_v38 = vpop.f32.mrf.mxu1  ;;  %v2687_v63 = vand.u32 4294901760, %v2686_v1  ;;  %v6696_v12 = vand.u32 4294901760, %v2926_v18  ;;  %v2356_v61 = vmul.f32 0.01, %v1053_v53  ;;  %vm2324_vm12 = vcmp.gt.f32.partialorder %v1053_v53, 0.0 }
 0x19a   :  { %2784 = vmatmul.f32.gmra.mxu2 %v2676_v56  ;;  %3103 = vmatpush.msra.mxu1 %v6508_v58  ;;  %v1728_v15 = vadd.f32 %v1727_v38, %v1688_v22  ;;  %v2693_v58 = vand.u32 4294901760, %v6679_v51  ;;  %v6691_v13 = vpop.permute.xlu0 %282  ;;  %v2357_v48 = vmul.f32 0.01, %v1057_v34  ;;  %vm2325_vm11 = vcmp.gt.f32.partialorder %v1057_v34, 0.0 }
 0x19b   :  { %v2355_v9 = vmul.f32 0.01, %v1049_v30  ;;  %vm2323_vm13 = vcmp.gt.f32.partialorder %v1049_v30, 0.0  ;;  %v2929_v29 = vsel %vm2634_vm10, %v2415_v43, 0  ;;  %vm2322_vm14 = vcmp.gt.f32.partialorder %v1045_v24, 0.0 }
 0x19c   :  { %3105 = vmatpush.msra.mxu1 %v6520_v16  ;;  %v1692_v49 = vpop.f32.mrf.mxu0  ;;  %v1768_v56 = vadd.f32 %v1767_v62, %v1728_v15  ;;  %v2694_v31 = vsub.f32 %v6679_v51, %v2693_v58  ;;  %v2389_v0 = vsel %vm2325_vm11, %v1057_v34, %v2357_v48  ;;  %v2354_v3 = vmul.f32 0.01, %v1045_v24 }
 0x19d   :  { %v1693_v44 = vadd.f32 %v1692_v49, %v1655_v10  ;;  %v2388_v38 = vsel %vm2324_vm12, %v1053_v53, %v2356_v61  ;;  %v6715_v17 = vand.u32 4294901760, %v2389_v0  ;;  %v2387_v15 = vsel %vm2323_vm13, %v1049_v30, %v2355_v9  ;;  %v2416_v30 = vld [vmem:[%s7980_s4 + $0x30] sm:$0xff] }
 0x19e   :  { %3107 = vmatpush.msra.mxu1 %v6522_v37  ;;  %v6701_v39 = vadd.f32 %v1801_v41, %v1768_v56  ;;  %v1621_v41 = vadd.f32 %v6629_v55, %v263_v11  ;;  %v2695_v1 = vand.u32 4294901760, %v2694_v31  ;;  %v6722_v55 = vand.u32 4294901760, %v2929_v29 }
 0x19f   :  { %2741 = vmatmul.f32.gmra.mxu1 %v6617_v40  ;;  %2833 = vmatmul.f32.gmra.mxu3 %v2685_v52  ;;  %v6711_v52 = vsub.f32 %v2926_v18, %v6696_v12  ;;  %v6726_v49 = vand.u32 4294901760, %v2388_v38  ;;  %v6732_v53 = vand.u32 4294901760, %v2387_v15  ;;  %vm2334_vm12 = vcmp.gt.f32.partialorder %v6665_v57, 0.0 }
 0x1a0   :  { %v1805_v16 = vpop.f32.mrf.mxu3  ;;  %v1659_v18 = vadd.f32 %v6626_v21, %v1621_v41  ;;  %v2386_v21 = vsel %vm2322_vm14, %v1045_v24, %v2354_v3  ;;  %vm2335_vm11 = vcmp.gt.f32.partialorder %v6701_v39, 0.0 }
 0x1a1   :  { %2688 = vmatmul.f32.gmra.mxu0 %v2687_v63  ;;  %v1771_v37 = vpop.f32.mrf.mxu2  ;;  %v1733_v35 = vpop.f32.mrf.mxu1  ;;  %v6745_v24 = vand.u32 4294901760, %v2386_v21  ;;  %v6748_v43 = vsub.f32 %v2388_v38, %v6726_v49 }
 0x1a2   :  { %2789 = vmatmul.f32.gmra.mxu2 %v6645_v7  ;;  %v1734_v26 = vadd.f32 %v1733_v35, %v1693_v44  ;;  %v7993_v7 = vand.u32 4294901760, %v6711_v52  ;;  %v6724_v50 = vpop.permute.xlu0 %297 }
 0x1a4   :  { %v1697_v22 = vpop.f32.mrf.mxu0  ;;  %v1772_v62 = vadd.f32 %v1771_v37, %v1734_v26  ;;  %v2960_v48 = vsub.f32 %v6711_v52, %v7993_v7  ;;  %v2932_v37 = vsel %vm2634_vm10, %v2416_v30, 0  ;;  %v2359_v7 = vmul.f32 0.01, %v6389_v20 }
 0x1a5   :  { %v1698_v56 = vadd.f32 %v1697_v22, %v1659_v18 }
 0x1a6   :  { %v6719_v34 = vadd.f32 %v1805_v16, %v1772_v62  ;;  %v6742_v16 = vsub.f32 %v2929_v29, %v6722_v55  ;;  %v2961_v11 = vand.u32 4294901760, %v2960_v48  ;;  %v6765_v29 = vsub.f32 %v2386_v21, %v6745_v24 }
 0x1a7   :  { %2745 = vmatmul.f32.gmra.mxu1 %v6635_v46  ;;  %2839 = vmatmul.f32.gmra.mxu3 %v2693_v58  ;;  %v6735_v58 = vsub.f32 %v2389_v0, %v6715_v17  ;;  %v6759_v0 = vand.u32 4294901760, %v2932_v37  ;;  %v7996_v62 = vand.u32 4294901760, %v6748_v43 }
 0x1a8   :  { %v1809_v36 = vpop.f32.mrf.mxu3  ;;  %v7991_v35 = vand.u32 4294901760, %v6742_v16  ;;  %v7992_v48 = vand.u32 4294901760, %v6765_v29  ;;  %vm2336_vm9 = vcmp.gt.f32.partialorder %v6719_v34, 0.0 }
 0x1a9   :  { %2696 = vmatmul.f32.gmra.mxu0 %v2695_v1  ;;  %v1775_v63 = vpop.f32.mrf.mxu2  ;;  %v1739_v19 = vpop.f32.mrf.mxu1  ;;  %v7998_v9 = vand.u32 4294901760, %v6735_v58  ;;  %v2417_v1 = vld [vmem:[%s7980_s4 + $0x38] sm:$0xff] }
 0x1aa   :  { %2794 = vmatmul.f32.gmra.mxu2 %v6679_v51  ;;  %v1740_v10 = vadd.f32 %v1739_v19, %v1698_v56  ;;  %v6751_v51 = vsub.f32 %v2387_v15, %v6732_v53  ;;  %v6771_v3 = vpop.permute.xlu0 %2481  ;;  %v6784_v56 = vsub.f32 %v2932_v37, %v6759_v0  ;;  %v2935_v30 = vsel %vm2634_vm10, %v2417_v1, 0 }
 0x1ab   :  { %v3301_v19 = vsub.f32 %v6748_v43, %v7996_v62  ;;  %v2361_v1 = vmul.f32 0.01, %v6441_v42 }
 0x1ac   :  { %v1847_v44 = vpop.f32.mrf.mxu0  ;;  %v1776_v31 = vadd.f32 %v1775_v63, %v1740_v10  ;;  %v7995_v15 = vand.u32 4294901760, %v6751_v51 }
 0x1ad   :  { %v1848_v26 = vadd.f32 %v1847_v44, %v6652_v8  ;;  %v3295_v8 = vsub.f32 %v6735_v58, %v7998_v9 }
 0x1ae   :  { %v6754_v61 = vadd.f32 %v1809_v36, %v1776_v31  ;;  %v2968_v36 = vsub.f32 %v6742_v16, %v7991_v35  ;;  %v3307_v44 = vsub.f32 %v6751_v51, %v7995_v15 }
 0x1af   :  { %2749 = vmatmul.f32.gmra.mxu1 %v6659_v23  ;;  %3027 = vmatmul.f32.vlgmr.msrb.gmra.mxu3 %v6696_v12  ;;  %v3296_v10 = vand.u32 4294901760, %v3295_v8 }
 0x1b0   :  { %3391 = vmatpush.msrb.mxu3 %v6715_v17  ;;  %v1972_v41 = vpop.f32.mrf.mxu3  ;;  %v2969_v31 = vand.u32 4294901760, %v2968_v36  ;;  %v3313_v36 = vsub.f32 %v6765_v29, %v7992_v48  ;;  %v2393_v48 = vsel %vm2329_vm15, %v6441_v42, %v2361_v1  ;;  %v278_v1 = vpop.permute.xlu2 %277  ;;  %vm2337_vm8 = vcmp.gt.f32.partialorder %v6754_v61, 0.0 }
 0x1b1   :  { %2872 = vmatmul.f32.vlgmr.msrb.gmra.mxu0 %v6596_v59  ;;  %v1933_v22 = vpop.f32.mrf.mxu2  ;;  %v1897_v38 = vpop.f32.mrf.mxu1 }
 0x1b2   :  { %2962 = vmatmul.f32.vlgmr.msrb.gmra.mxu2 %v2961_v11  ;;  %3240 = vmatpush.msrb.mxu0 %v6715_v17  ;;  %v1898_v18 = vadd.f32 %v1897_v38, %v1848_v26  ;;  %v7994_v11 = vand.u32 4294901760, %v6784_v56  ;;  %v6803_v26 = vand.u32 4294901760, %v2935_v30 }
 0x1b3   :  { %3347 = vmatpush.msrb.mxu2 %v6735_v58  ;;  %3393 = vmatpush.msrb.mxu3 %v6726_v49 }
 0x1b4   :  { %3242 = vmatpush.msrb.mxu0 %v6726_v49  ;;  %v1855_v63 = vpop.f32.mrf.mxu0  ;;  %v1934_v21 = vadd.f32 %v1933_v22, %v1898_v18  ;;  %v273_v22 = vpop.permute.xlu1 %272 }
 0x1b5   :  { %3350 = vmatpush.msrb.mxu2 %v6748_v43  ;;  %3395 = vmatpush.msrb.mxu3 %v6732_v53  ;;  %v1856_v8 = vadd.f32 %v1855_v63, %v273_v22  ;;  %v6823_v22 = vpop.permute.xlu0 %2496 }
 0x1b6   :  { %3244 = vmatpush.msrb.mxu0 %v6732_v53  ;;  %v6800_v37 = vadd.f32 %v1972_v41, %v1934_v21  ;;  %v3302_v41 = vand.u32 4294901760, %v3301_v19  ;;  %v2360_v21 = vmul.f32 0.01, %v6409_v28  ;;  %v2976_v19 = vsub.f32 %v6784_v56, %v7994_v11 }
 0x1b7   :  { %3353 = vmatpush.msrb.mxu2 %v6751_v51  ;;  %3397 = vmatpush.msrb.mxu3 %v6745_v24 }
 0x1b8   :  { %8020 = vst [vmem:[#allocation5_spill] sm:$0xff] %v6800_v37  ;;  %2909 = vmatmul.f32.vlgmr.msrb.gmra.mxu1 %v6596_v59  ;;  %3031 = vmatmul.f32.gmra.mxu3 %v6722_v55  ;;  %v1978_v38 = vpop.f32.mrf.mxu3  ;;  %v3308_v59 = vand.u32 4294901760, %v3307_v44  ;;  %v2977_v15 = vand.u32 4294901760, %v2976_v19 }
 0x1b9   :  { %3246 = vmatpush.msrb.mxu0 %v6745_v24  ;;  %3297 = vmatpush.msrb.mxu1 %v3296_v10  ;;  %v1938_v18 = vpop.f32.mrf.mxu2  ;;  %v1901_v35 = vpop.f32.mrf.mxu1  ;;  %v6821_v10 = vsub.f32 %v2935_v30, %v6803_v26  ;;  %v6832_v30 = vand.u32 4294901760, %v2393_v48 }
 0x1ba   :  { %3356 = vmatpush.msrb.mxu2 %v6765_v29  ;;  %2876 = vmatmul.f32.gmra.mxu0 %v6617_v40  ;;  %v1902_v63 = vadd.f32 %v1901_v35, %v1856_v8  ;;  %v2358_v35 = vmul.f32 0.01, %v6365_v27  ;;  %v2392_v8 = vsel %vm2328_vm1, %v6409_v28, %v2360_v21 }
 0x1bb   :  { %2970 = vmatmul.f32.gmra.mxu2 %v2969_v31  ;;  %3303 = vmatpush.msrb.mxu1 %v3302_v41  ;;  %v3314_v41 = vand.u32 4294901760, %v3313_v36  ;;  %v7997_v42 = vand.u32 4294901760, %v6821_v10  ;;  %v2391_v36 = vsel %vm2327_vm2, %v6389_v20, %v2359_v7  ;;  %v6841_v21 = vand.u32 4294901760, %v2392_v8 }
 0x1bc   :  { %v1863_v44 = vpop.f32.mrf.mxu0  ;;  %v1939_v31 = vadd.f32 %v1938_v18, %v1902_v63  ;;  %v2390_v63 = vsel %vm2326_vm3, %v6365_v27, %v2358_v35  ;;  %v6846_v19 = vsub.f32 %v2393_v48, %v6832_v30  ;;  %v6863_v35 = vpop.permute.xlu1 %287 }
 0x1bd   :  { %3309 = vmatpush.msrb.mxu1 %v3308_v59  ;;  %v1864_v59 = vadd.f32 %v1863_v44, %v278_v1  ;;  %v6853_v44 = vpop.permute.xlu0 %2511  ;;  %v6855_v1 = vand.u32 4294901760, %v2390_v63  ;;  %v6858_v62 = vsub.f32 %v2392_v8, %v6841_v21  ;;  %v6871_v8 = vpop.permute.xlu2 %292 }
 0x1be   :  { %v6834_v11 = vadd.f32 %v1978_v38, %v1939_v31  ;;  %8022 = vst [vmem:[#allocation7_spill] sm:$0xff] %v6853_v44 }
 0x1bf   :  { %3315 = vmatpush.msrb.mxu1 %v3314_v41  ;;  %v6851_v41 = vand.u32 4294901760, %v2391_v36 }
 0x1c0   :  { %8021 = vst [vmem:[#allocation6_spill] sm:$0xff] %v6834_v11  ;;  %2913 = vmatmul.f32.gmra.mxu1 %v6617_v40  ;;  %3035 = vmatmul.f32.gmra.mxu3 %v6759_v0  ;;  %v1984_v18 = vpop.f32.mrf.mxu3  ;;  %v2984_v40 = vsub.f32 %v6821_v10, %v7997_v42 }
 0x1c1   :  { %v1943_v28 = vpop.f32.mrf.mxu2  ;;  %v1905_v38 = vpop.f32.mrf.mxu1 }
 0x1c2   :  { %2880 = vmatmul.f32.gmra.mxu0 %v6635_v46  ;;  %v1906_v31 = vadd.f32 %v1905_v38, %v1864_v59  ;;  %v2985_v48 = vand.u32 4294901760, %v2984_v40  ;;  %v6866_v59 = vsub.f32 %v2391_v36, %v6851_v41 }
 0x1c3   :  { %2978 = vmatmul.f32.gmra.mxu2 %v2977_v15  ;;  %v8002_v15 = vand.u32 4294901760, %v6846_v19 }
 0x1c4   :  { %v1871_v20 = vpop.f32.mrf.mxu0  ;;  %v1944_v7 = vadd.f32 %v1943_v28, %v1906_v31 }
 0x1c5   :  { %v1872_v38 = vadd.f32 %v1871_v20, %v6691_v13  ;;  %v7999_v13 = vand.u32 4294901760, %v6866_v59 }
 0x1c6   :  { %v6860_v27 = vadd.f32 %v1984_v18, %v1944_v7  ;;  %v6874_v18 = vsub.f32 %v2390_v63, %v6855_v1  ;;  %v8000_v7 = vand.u32 4294901760, %v6858_v62 }
 0x1c8   :  { %8023 = vst [vmem:[#allocation8_spill] sm:$0xff] %v6860_v27  ;;  %2917 = vmatmul.f32.gmra.mxu1 %v6635_v46  ;;  %3039 = vmatmul.f32.gmra.mxu3 %v6803_v26  ;;  %v1990_v28 = vpop.f32.mrf.mxu3  ;;  %v3585_v46 = vsub.f32 %v6846_v19, %v8002_v15  ;;  %v3591_v63 = vsub.f32 %v6858_v62, %v8000_v7  ;;  %v8001_v9 = vand.u32 4294901760, %v6874_v18 }
 0x1c9   :  { %v1948_v31 = vpop.f32.mrf.mxu2  ;;  %v1909_v40 = vpop.f32.mrf.mxu1 }
 0x1ca   :  { %2884 = vmatmul.f32.gmra.mxu0 %v6659_v23  ;;  %v1910_v36 = vadd.f32 %v1909_v40, %v1872_v38  ;;  %v3586_v27 = vand.u32 4294901760, %v3585_v46  ;;  %v3597_v38 = vsub.f32 %v6866_v59, %v7999_v13  ;;  %v6912_v13 = vpop.permute.xlu2 %2476 }
 0x1cb   :  { %2986 = vmatmul.f32.gmra.mxu2 %v2985_v48  ;;  %v6890_v48 = vpop.permute.xlu0 %2526 }
 0x1cc   :  { %v6881_v42 = vpop.f32.mrf.mxu0  ;;  %v1949_v20 = vadd.f32 %v1948_v31, %v1910_v36  ;;  %8025 = vst [vmem:[#allocation10_spill] sm:$0xff] %v6890_v48  ;;  %v6901_v36 = vpop.permute.xlu1 %302 }
 0x1cd   :  { %8024 = vst [vmem:[#allocation9_spill] sm:$0xff] %v6881_v42 }
 0x1ce   :  { %v6888_v44 = vadd.f32 %v1990_v28, %v1949_v20  ;;  %v3592_v28 = vand.u32 4294901760, %v3591_v63  ;;  %v8027_v20 = vand.u32 4294901760, %v6735_v58  ;;  %v8029_v63 = vand.u32 4294901760, %v6748_v43  ;;  %v2418_v43 = vld [vmem:[%s7980_s4 + $0x40] sm:$0xff] }
 0x1d0   :  { %2921 = vmatmul.f32.gmra.mxu1 %v6659_v23  ;;  %3199 = vmatmul.f32.vlgmr.msra.gmra.mxu3 %v6696_v12  ;;  %v6897_v31 = vpop.f32.mrf.mxu3  ;;  %v3603_v23 = vsub.f32 %v6874_v18, %v8001_v9 }
 0x1d1   :  { %3587 = vmatpush.msra.mxu3 %v3586_v27  ;;  %v6899_v40 = vpop.f32.mrf.mxu2  ;;  %v3598_v27 = vand.u32 4294901760, %v3597_v38 }
 0x1d2   :  { %3069 = vmatmul.f32.vlgmr.msra.gmra.mxu0 %v6711_v52  ;;  %v6904_v46 = vpop.f32.mrf.mxu1  ;;  %v3604_v9 = vand.u32 4294901760, %v3603_v23  ;;  %v8033_v23 = vand.u32 4294901760, %v6765_v29  ;;  %v3216_v29 = vsel %vm2634_vm10, %v2418_v43, 0 }
 0x1d3   :  { %8026 = vst [vmem:[#allocation11_spill] sm:$0xff] %v6904_v46  ;;  %3162 = vmatmul.f32.vlgmr.msra.gmra.mxu2 %v6696_v12  ;;  %3438 = vmatpush.msra.mxu0 %v8027_v20  ;;  %v8030_v12 = vand.u32 4294901760, %v6751_v51  ;;  %v6931_v38 = vpop.permute.xlu0 %2541 }
 0x1d4   :  { %3530 = vmatpush.msra.mxu2 %v6832_v30  ;;  %3593 = vmatpush.msra.mxu3 %v3592_v28  ;;  %v6915_v7 = vpop.f32.mrf.mxu0  ;;  %v8031_v28 = vand.u32 4294901760, %v6711_v52  ;;  %8032 = vst [vmem:[#allocation13_spill] sm:$0xff] %v6931_v38 }
 0x1d5   :  { %8028 = vst [vmem:[#allocation12_spill] sm:$0xff] %v6915_v7  ;;  %3442 = vmatpush.msra.mxu0 %v8029_v63 }
 0x1d6   :  { %3532 = vmatpush.msra.mxu2 %v6841_v21  ;;  %3599 = vmatpush.msra.mxu3 %v3598_v27  ;;  %v6947_v27 = vpop.permute.xlu2 %2491 }
 0x1d7   :  { %3446 = vmatpush.msra.mxu0 %v8030_v12  ;;  %v8036_v12 = vand.u32 4294901760, %v6742_v16 }
 0x1d8   :  { %3534 = vmatpush.msra.mxu2 %v6851_v41  ;;  %3605 = vmatpush.msra.mxu3 %v3604_v9  ;;  %v6923_v58 = vpop.f32.mrf.mxu3  ;;  %v6940_v9 = vpop.permute.xlu1 %2486 }
 0x1d9   :  { %3111 = vmatmul.f32.vlgmr.msra.gmra.mxu1 %v8031_v28  ;;  %3203 = vmatmul.f32.gmra.mxu3 %v6722_v55 }
 0x1da   :  { %3450 = vmatpush.msra.mxu0 %v8033_v23  ;;  %3481 = vmatpush.msra.mxu1 %v6715_v17  ;;  %v6936_v51 = vpop.f32.mrf.mxu1  ;;  %v6950_v17 = vand.u32 4294901760, %v3216_v29 }
 0x1db   :  { %8034 = vst [vmem:[#allocation14_spill] sm:$0xff] %v6936_v51  ;;  %3536 = vmatpush.msra.mxu2 %v6855_v1  ;;  %3074 = vmatmul.f32.gmra.mxu0 %v6742_v16  ;;  %v2106_v52 = vpop.f32.mrf.mxu2  ;;  %v2099_v51 = vadd.f32 %v6899_v40, %v6863_v35  ;;  %v8043_v35 = vand.u32 4294901760, %v6821_v10 }
 0x1dc   :  { %3166 = vmatmul.f32.gmra.mxu2 %v6722_v55  ;;  %3483 = vmatpush.msra.mxu1 %v6726_v49  ;;  %v6944_v20 = vpop.f32.mrf.mxu0  ;;  %v2419_v49 = vld [vmem:[%s7980_s4 + $0x48] sm:$0xff]  ;;  %v3248_v28 = vsub.f32 %v3216_v29, %v6950_v17 }
 0x1dd   :  { %8035 = vst [vmem:[#allocation15_spill] sm:$0xff] %v6944_v20  ;;  %v3219_v43 = vsel %vm2634_vm10, %v2419_v49, 0  ;;  %v2149_v42 = vadd.f32 %v6897_v31, %v2099_v51  ;;  %v2107_v51 = vadd.f32 %v2106_v52, %v6871_v8 }
 0x1de   :  { %3485 = vmatpush.msra.mxu1 %v6732_v53  ;;  %v6975_v15 = vpop.permute.xlu2 %2506  ;;  %v6979_v48 = vand.u32 4294901760, %v3219_v43 }
 0x1df   :  { %8039 = vst [vmem:[#allocation18_spill] sm:$0xff] %v6975_v15 }
 0x1e0   :  { %3487 = vmatpush.msra.mxu1 %v6745_v24  ;;  %v6953_v63 = vpop.f32.mrf.mxu3  ;;  %v6967_v24 = vpop.permute.xlu0 %2556 }
 0x1e1   :  { %3117 = vmatmul.f32.gmra.mxu1 %v8036_v12  ;;  %3207 = vmatmul.f32.gmra.mxu3 %v6759_v0  ;;  %8038 = vst [vmem:[#allocation17_spill] sm:$0xff] %v6967_v24  ;;  %v6973_v23 = vpop.permute.xlu1 %2501  ;;  %v3249_v12 = vand.u32 4294901760, %v3248_v28 }
 0x1e2   :  { %v6958_v55 = vpop.f32.mrf.mxu1 }
 0x1e3   :  { %8037 = vst [vmem:[#allocation16_spill] sm:$0xff] %v6958_v55  ;;  %3079 = vmatmul.f32.gmra.mxu0 %v6784_v56  ;;  %v6964_v53 = vpop.f32.mrf.mxu2  ;;  %v8040_v55 = vand.u32 4294901760, %v6784_v56  ;;  %v3250_v24 = vsub.f32 %v3248_v28, %v3249_v12 }
 0x1e4   :  { %3170 = vmatmul.f32.gmra.mxu2 %v6759_v0  ;;  %v6970_v16 = vpop.f32.mrf.mxu0  ;;  %v2420_v0 = vld [vmem:[%s7980_s4 + $0x50] sm:$0xff] }
 0x1e5   :  { %v3222_v20 = vsel %vm2634_vm10, %v2420_v0, 0  ;;  %v3251_v11 = vand.u32 4294901760, %v3250_v24  ;;  %v2421_v24 = vld [vmem:[%s7980_s4 + $0x58] sm:$0xff] }
 0x1e6   :  { %v6999_v46 = vand.u32 4294901760, %v3222_v20 }
 0x1e8   :  { %v6977_v38 = vpop.f32.mrf.mxu3  ;;  %v6997_v7 = vpop.permute.xlu0 %2571  ;;  %v7013_v31 = vsub.f32 %v3222_v20, %v6999_v46  ;;  %v8045_v20 = vand.u32 4294901760, %v6858_v62 }
 0x1e9   :  { %3123 = vmatmul.f32.gmra.mxu1 %v8040_v55  ;;  %3211 = vmatmul.f32.gmra.mxu3 %v6803_v26  ;;  %v3256_v55 = vsub.f32 %v3219_v43, %v6979_v48  ;;  %8042 = vst [vmem:[#allocation20_spill] sm:$0xff] %v6997_v7 }
 0x1ea   :  { %v6987_v29 = vpop.f32.mrf.mxu1  ;;  %v3265_v8 = vand.u32 4294901760, %v7013_v31 }
 0x1eb   :  { %8041 = vst [vmem:[#allocation19_spill] sm:$0xff] %v6987_v29  ;;  %3084 = vmatmul.f32.gmra.mxu0 %v6821_v10  ;;  %v6990_v49 = vpop.f32.mrf.mxu2  ;;  %v7001_v29 = vpop.permute.xlu1 %2516  ;;  %v3257_v15 = vand.u32 4294901760, %v3256_v55 }
 0x1ec   :  { %3174 = vmatmul.f32.gmra.mxu2 %v6803_v26  ;;  %v2184_v56 = vpop.f32.mrf.mxu0  ;;  %v7006_v26 = vpop.permute.xlu2 %2521 }
 0x1ed   :  { %v2185_v40 = vadd.f32 %v2184_v56, %v2149_v42  ;;  %v8044_v42 = vand.u32 4294901760, %v6846_v19 }
 0x1f0   :  { %v2299_v37 = vpop.f32.mrf.mxu3  ;;  %v7026_v52 = vpop.permute.xlu0 %2586 }
 0x1f1   :  { %3129 = vmatmul.f32.gmra.mxu1 %v8043_v35  ;;  %3401 = vmatmul.f32.vlgmr.msrb.gmra.mxu3 %v3249_v12  ;;  %v3258_v12 = vsub.f32 %v3256_v55, %v3257_v15  ;;  %8046 = vst [vmem:[#allocation21_spill] sm:$0xff] %v7026_v52 }
 0x1f2   :  { %3771 = vmatpush.msrb.mxu3 %v6832_v30 }
 0x1f3   :  { %3252 = vmatmul.f32.vlgmr.msrb.gmra.mxu0 %v3251_v11  ;;  %v2223_v43 = vpop.f32.mrf.mxu1  ;;  %v2265_v0 = vpop.f32.mrf.mxu2  ;;  %v3225_v11 = vsel %vm2634_vm10, %v2421_v24, 0 }
 0x1f4   :  { %3359 = vmatmul.f32.vlgmr.msrb.gmra.mxu2 %v3248_v28  ;;  %3637 = vmatpush.msrb.mxu0 %v6846_v19  ;;  %v2224_v10 = vadd.f32 %v2223_v43, %v2185_v40  ;;  %v2153_v19 = vadd.f32 %v6923_v58, %v2107_v51  ;;  %v3259_v40 = vand.u32 4294901760, %v3258_v12  ;;  %v7032_v24 = vand.u32 4294901760, %v3225_v11  ;;  %v7046_v51 = vpop.permute.xlu2 %2536 }
 0x1f5   :  { %3728 = vmatpush.msrb.mxu2 %v8044_v42  ;;  %3773 = vmatpush.msrb.mxu3 %v6841_v21  ;;  %v2189_v56 = vpop.f32.mrf.mxu0  ;;  %v8048_v43 = vand.u32 4294901760, %v6866_v59  ;;  %v3266_v58 = vsub.f32 %v7013_v31, %v3265_v8  ;;  %8050 = vst [vmem:[#allocation24_spill] sm:$0xff] %v7046_v51  ;;  %v2115_v12 = vadd.f32 %v6964_v53, %v6724_v50  ;;  %v8051_v42 = vand.u32 4294901760, %v6874_v18 }
 0x1f6   :  { %3640 = vmatpush.msrb.mxu0 %v6858_v62  ;;  %v2266_v35 = vadd.f32 %v2265_v0, %v2224_v10  ;;  %v7037_v0 = vpop.permute.xlu1 %2531  ;;  %v2190_v10 = vadd.f32 %v2189_v56, %v2153_v19  ;;  %v1517_v50 = vadd.f32 %v6572_v14, %v6510_v45 }
 0x1f7   :  { %3732 = vmatpush.msrb.mxu2 %v8045_v20  ;;  %3775 = vmatpush.msrb.mxu3 %v6851_v41  ;;  %8049 = vst [vmem:[#allocation23_spill] sm:$0xff] %v7037_v0 }
 0x1f8   :  { %3643 = vmatpush.msrb.mxu0 %v6866_v59  ;;  %v7030_v28 = vadd.f32 %v2299_v37, %v2266_v35  ;;  %v2422_v59 = vld [vmem:[%s7980_s4 + $0x60] sm:$0xff]  ;;  %v1525_v35 = vadd.f32 %v6615_v47, %v6555_v5  ;;  %v3267_v47 = vand.u32 4294901760, %v3266_v58  ;;  %v7073_v14 = vpop.permute.xlu0 %2601 }
 0x1f9   :  { %3736 = vmatpush.msrb.mxu2 %v8048_v43  ;;  %3777 = vmatpush.msrb.mxu3 %v6855_v1  ;;  %v2303_v62 = vpop.f32.mrf.mxu3  ;;  %v3506_v43 = vsel %vm2634_vm10, %v2422_v59, 0  ;;  %8052 = vst [vmem:[#allocation25_spill] sm:$0xff] %v7073_v14 }
 0x1fa   :  { %8047 = vst [vmem:[#allocation22_spill] sm:$0xff] %v7030_v28  ;;  %3317 = vmatmul.f32.vlgmr.msrb.gmra.mxu1 %v6950_v17  ;;  %3407 = vmatmul.f32.gmra.mxu3 %v3257_v15  ;;  %v1559_v53 = vadd.f32 %v6632_v6, %v1525_v35  ;;  %v7071_v45 = vand.u32 4294901760, %v3506_v43  ;;  %v1513_v6 = vadd.f32 %v6548_v60, %v6482_v4 }
 0x1fb   :  { %3646 = vmatpush.msrb.mxu0 %v6874_v18  ;;  %3681 = vmatpush.msrb.mxu1 %v6832_v30  ;;  %v2229_v37 = vpop.f32.mrf.mxu1  ;;  %v7053_v30 = vsub.f32 %v3225_v11, %v7032_v24  ;;  %v1521_v18 = vadd.f32 %v6594_v2, %v6536_v54  ;;  %v2157_v11 = vadd.f32 %v6953_v63, %v2115_v12 }
 0x1fc   :  { %3740 = vmatpush.msrb.mxu2 %v8051_v42  ;;  %3260 = vmatmul.f32.gmra.mxu0 %v3259_v40  ;;  %v2230_v15 = vadd.f32 %v2229_v37, %v2190_v10  ;;  %v2269_v56 = vpop.f32.mrf.mxu2  ;;  %v1551_v54 = vadd.f32 %v6591_v32, %v1517_v50  ;;  %vm2333_vm4 = vcmp.gt.f32.partialorder %v1559_v53, 0.0  ;;  %v1547_v37 = vadd.f32 %v6567_v25, %v1513_v6  ;;  %v7092_v59 = vpop.permute.xlu2 %2551 }
 0x1fd   :  { %3364 = vmatmul.f32.gmra.mxu2 %v3256_v55  ;;  %3683 = vmatpush.msrb.mxu1 %v6841_v21  ;;  %v2194_v20 = vpop.f32.mrf.mxu0  ;;  %v3273_v21 = vand.u32 4294901760, %v7053_v30  ;;  %v1555_v55 = vadd.f32 %v6612_v33, %v1521_v18  ;;  %v2123_v33 = vadd.f32 %v6990_v49, %v6901_v36  ;;  %v7090_v58 = vsub.f32 %v3506_v43, %v7071_v45 }
 0x1fe   :  { %v2270_v19 = vadd.f32 %v2269_v56, %v2230_v15  ;;  %v2195_v2 = vadd.f32 %v2194_v20, %v2157_v11  ;;  %8054 = vst [vmem:[#allocation27_spill] sm:$0xff] %v7092_v59  ;;  %v2363_v36 = vmul.f32 0.01, %v1551_v54  ;;  %vm2331_vm6 = vcmp.gt.f32.partialorder %v1551_v54, 0.0 }
 0x1ff   :  { %3685 = vmatpush.msrb.mxu1 %v6851_v41  ;;  %v2365_v41 = vmul.f32 0.01, %v1559_v53  ;;  %v3274_v32 = vsub.f32 %v7053_v30, %v3273_v21  ;;  %v2364_v4 = vmul.f32 0.01, %v1555_v55  ;;  %vm2332_vm5 = vcmp.gt.f32.partialorder %v1555_v55, 0.0 }
 0x200   :  { %v7066_v5 = vadd.f32 %v2303_v62, %v2270_v19  ;;  %v7079_v62 = vpop.permute.xlu1 %2546  ;;  %v2161_v15 = vadd.f32 %v6977_v38, %v2123_v33  ;;  %vm2330_vm7 = vcmp.gt.f32.partialorder %v1547_v37, 0.0  ;;  %v8004_v19 = vand.u32 4294901760, %v7090_v58  ;;  %v7105_v38 = vpop.permute.xlu0 %2616 }
 0x201   :  { %3687 = vmatpush.msrb.mxu1 %v6855_v1  ;;  %v2307_v40 = vpop.f32.mrf.mxu3  ;;  %8053 = vst [vmem:[#allocation26_spill] sm:$0xff] %v7079_v62  ;;  %v2397_v12 = vsel %vm2333_vm4, %v1559_v53, %v2365_v41  ;;  %v3275_v56 = vand.u32 4294901760, %v3274_v32  ;;  %v2396_v35 = vsel %vm2332_vm5, %v1555_v55, %v2364_v4  ;;  %v2395_v43 = vsel %vm2331_vm6, %v1551_v54, %v2363_v36  ;;  %v2424_v54 = vld [vmem:[%s7980_s4 + $0x70] sm:$0xff] }
 0x202   :  { %3321 = vmatmul.f32.gmra.mxu1 %v6979_v48  ;;  %3413 = vmatmul.f32.gmra.mxu3 %v3265_v8  ;;  %v2423_v8 = vld [vmem:[%s7980_s4 + $0x68] sm:$0xff]  ;;  %v7100_v50 = vand.u32 4294901760, %v2397_v12  ;;  %8055 = vst [vmem:[#allocation28_spill] sm:$0xff] %v7105_v38  ;;  %v7113_v6 = vand.u32 4294901760, %v2395_v43  ;;  %v3540_v41 = vsub.f32 %v7090_v58, %v8004_v19  ;;  %v3512_v32 = vsel %vm2634_vm10, %v2424_v54, 0 }
 0x203   :  { %v2235_v63 = vpop.f32.mrf.mxu1  ;;  %v3509_v42 = vsel %vm2634_vm10, %v2423_v8, 0 }
 0x204   :  { %3268 = vmatmul.f32.gmra.mxu0 %v3267_v47  ;;  %v2236_v1 = vadd.f32 %v2235_v63, %v2195_v2  ;;  %v2273_v10 = vpop.f32.mrf.mxu2  ;;  %v7103_v53 = vand.u32 4294901760, %v3509_v42  ;;  %v7107_v47 = vand.u32 4294901760, %v2396_v35  ;;  %v7122_v33 = vsub.f32 %v2397_v12, %v7100_v50  ;;  %v7128_v8 = vpop.permute.xlu2 %2566 }
 0x205   :  { %3369 = vmatmul.f32.gmra.mxu2 %v7013_v31  ;;  %v2199_v60 = vpop.f32.mrf.mxu0  ;;  %v2362_v31 = vmul.f32 0.01, %v1547_v37  ;;  %8057 = vst [vmem:[#allocation30_spill] sm:$0xff] %v7128_v8  ;;  %v7138_v36 = vsub.f32 %v2395_v43, %v7113_v6 }
 0x206   :  { %v2274_v49 = vadd.f32 %v2273_v10, %v2236_v1  ;;  %v2200_v18 = vadd.f32 %v2199_v60, %v2161_v15  ;;  %v7125_v10 = vsub.f32 %v3509_v42, %v7103_v53  ;;  %v7135_v4 = vsub.f32 %v2396_v35, %v7107_v47 }
 0x207   :  { %v2394_v2 = vsel %vm2330_vm7, %v1547_v37, %v2362_v31  ;;  %v3541_v60 = vand.u32 4294901760, %v3540_v41  ;;  %v8006_v12 = vand.u32 4294901760, %v7122_v33  ;;  %v7144_v15 = vand.u32 4294901760, %v3512_v32 }
 0x208   :  { %v7097_v25 = vadd.f32 %v2307_v40, %v2274_v49  ;;  %v7119_v63 = vpop.permute.xlu1 %2561  ;;  %v7130_v37 = vand.u32 4294901760, %v2394_v2  ;;  %v8003_v42 = vand.u32 4294901760, %v7125_v10  ;;  %v8005_v43 = vand.u32 4294901760, %v7135_v4 }
 0x209   :  { %v2311_v20 = vpop.f32.mrf.mxu3  ;;  %8056 = vst [vmem:[#allocation29_spill] sm:$0xff] %v7119_v63  ;;  %v3875_v54 = vsub.f32 %v7122_v33, %v8006_v12 }
 0x20a   :  { %3325 = vmatmul.f32.gmra.mxu1 %v6999_v46  ;;  %3419 = vmatmul.f32.gmra.mxu3 %v3273_v21 }
 0x20b   :  { %v2241_v11 = vpop.f32.mrf.mxu1 }
 0x20c   :  { %3276 = vmatmul.f32.gmra.mxu0 %v3275_v56  ;;  %v2242_v40 = vadd.f32 %v2241_v11, %v2200_v18  ;;  %v2277_v55 = vpop.f32.mrf.mxu2  ;;  %v2425_v18 = vld [vmem:[%s7980_s4 + $0x78] sm:$0xff] }
 0x20d   :  { %3374 = vmatmul.f32.gmra.mxu2 %v7053_v30  ;;  %v2673_v21 = vpop.f32.mrf.mxu0 }
 0x20e   :  { %v2278_v1 = vadd.f32 %v2277_v55, %v2242_v40  ;;  %v2674_v56 = vadd.f32 %v2673_v21, %v6912_v13  ;;  %v8007_v13 = vand.u32 4294901760, %v7138_v36  ;;  %v7158_v40 = vpop.permute.xlu0 %2631  ;;  %v7171_v21 = vsub.f32 %v3512_v32, %v7144_v15 }
 0x20f   :  { %8058 = vst [vmem:[#allocation31_spill] sm:$0xff] %v7158_v40 }
 0x210   :  { %v7132_v30 = vadd.f32 %v2311_v20, %v2278_v1  ;;  %v7150_v20 = vsub.f32 %v2394_v2, %v7130_v37  ;;  %v3548_v2 = vsub.f32 %v7125_v10, %v8003_v42  ;;  %v3515_v1 = vsel %vm2634_vm10, %v2425_v18, 0  ;;  %v7189_v18 = vpop.permute.xlu2 %2581 }
 0x211   :  { %v2822_v49 = vpop.f32.mrf.mxu3  ;;  %8060 = vst [vmem:[#allocation33_spill] sm:$0xff] %v7189_v18  ;;  %v7196_v12 = vand.u32 4294901760, %v3515_v1 }
 0x212   :  { %3329 = vmatmul.f32.gmra.mxu1 %v7032_v24  ;;  %3607 = vmatmul.f32.vlgmr.msra.gmra.mxu3 %v7071_v45  ;;  %v3549_v42 = vand.u32 4294901760, %v3548_v2 }
 0x213   :  { %3971 = vmatpush.msra.mxu3 %v7100_v50  ;;  %v7219_v38 = vsub.f32 %v3515_v1, %v7196_v12 }
 0x214   :  { %3452 = vmatmul.f32.vlgmr.msra.gmra.mxu0 %v6950_v17  ;;  %v2738_v31 = vpop.f32.mrf.mxu1  ;;  %v2780_v35 = vpop.f32.mrf.mxu2 }
 0x215   :  { %3542 = vmatmul.f32.vlgmr.msra.gmra.mxu2 %v3541_v60  ;;  %3820 = vmatpush.msra.mxu0 %v7100_v50  ;;  %v2739_v11 = vadd.f32 %v2738_v31, %v2674_v56  ;;  %v7175_v60 = vpop.permute.xlu1 %2576  ;;  %v3881_v56 = vsub.f32 %v7135_v4, %v8005_v43  ;;  %v8008_v31 = vand.u32 4294901760, %v7150_v20 }
 0x216   :  { %3927 = vmatpush.msra.mxu2 %v7122_v33  ;;  %3973 = vmatpush.msra.mxu3 %v7107_v47  ;;  %v7162_v55 = vpop.f32.mrf.mxu0  ;;  %8059 = vst [vmem:[#allocation32_spill] sm:$0xff] %v7175_v60  ;;  %v7225_v14 = vpop.permute.xlu0 %5095 }
 0x217   :  { %3822 = vmatpush.msra.mxu0 %v7107_v47  ;;  %v2781_v41 = vadd.f32 %v2780_v35, %v2739_v11  ;;  %v3887_v35 = vsub.f32 %v7138_v36, %v8007_v13  ;;  %v3876_v11 = vand.u32 4294901760, %v3875_v54  ;;  %v3893_v2 = vsub.f32 %v7150_v20, %v8008_v31 }
 0x218   :  { %3930 = vmatpush.msra.mxu2 %v7135_v4  ;;  %3975 = vmatpush.msra.mxu3 %v7113_v6 }
 0x219   :  { %3824 = vmatpush.msra.mxu0 %v7113_v6  ;;  %v7184_v32 = vadd.f32 %v2822_v49, %v2781_v41  ;;  %v2369_v49 = vmul.f32 0.01, %v6754_v61  ;;  %v3882_v41 = vand.u32 4294901760, %v3881_v56  ;;  %v3888_v43 = vand.u32 4294901760, %v3887_v35 }
 0x21a   :  { %3933 = vmatpush.msra.mxu2 %v7138_v36  ;;  %3977 = vmatpush.msra.mxu3 %v7130_v37  ;;  %v7193_v19 = vpop.f32.mrf.mxu3  ;;  %v8061_v56 = vand.u32 4294901760, %v7171_v21  ;;  %v3894_v35 = vand.u32 4294901760, %v3893_v2 }
 0x21b   :  { %3489 = vmatmul.f32.vlgmr.msra.gmra.mxu1 %v6950_v17  ;;  %3611 = vmatmul.f32.gmra.mxu3 %v7103_v53  ;;  %v2368_v17 = vmul.f32 0.01, %v6719_v34  ;;  %v2401_v31 = vsel %vm2337_vm8, %v6754_v61, %v2369_v49  ;;  %v8009_v61 = vand.u32 4294901760, %v7219_v38 }
 0x21c   :  { %3826 = vmatpush.msra.mxu0 %v7130_v37  ;;  %3877 = vmatpush.msra.mxu1 %v3876_v11  ;;  %v7203_v54 = vpop.f32.mrf.mxu1  ;;  %v3556_v11 = vsub.f32 %v7171_v21, %v8061_v56  ;;  %v7233_v52 = vand.u32 4294901760, %v2401_v31 }
 0x21d   :  { %3936 = vmatpush.msra.mxu2 %v7150_v20  ;;  %3456 = vmatmul.f32.gmra.mxu0 %v6979_v48  ;;  %v7210_v13 = vpop.f32.mrf.mxu2  ;;  %v7230_v56 = vpop.permute.xlu1 %2591  ;;  %v2400_v1 = vsel %vm2336_vm9, %v6719_v34, %v2368_v17 }
 0x21e   :  { %3550 = vmatmul.f32.gmra.mxu2 %v3549_v42  ;;  %3883 = vmatpush.msra.mxu1 %v3882_v41  ;;  %v7213_v40 = vpop.f32.mrf.mxu0  ;;  %v2367_v42 = vmul.f32 0.01, %v6701_v39  ;;  %v2366_v41 = vmul.f32 0.01, %v6665_v57  ;;  %8062 = vst [vmem:[#allocation34_spill] sm:$0xff] %v7230_v56  ;;  %v3557_v18 = vand.u32 4294901760, %v3556_v11  ;;  %v7267_v7 = vpop.permute.xlu0 %5110 }
 0x21f   :  { %v7246_v34 = vand.u32 4294901760, %v2400_v1 }
 0x220   :  { %3889 = vmatpush.msra.mxu1 %v3888_v43  ;;  %v7241_v43 = vpop.permute.xlu2 %2596  ;;  %v2399_v49 = vsel %vm2335_vm11, %v6701_v39, %v2367_v42  ;;  %v2398_v11 = vsel %vm2334_vm12, %v6665_v57, %v2366_v41  ;;  %v3564_v39 = vsub.f32 %v7219_v38, %v8009_v61  ;;  %vm2345_vm11 = vcmp.gt.f32.partialorder %v7132_v30, 0.0 }
 0x221   :  { %8063 = vst [vmem:[#allocation35_spill] sm:$0xff] %v7241_v43  ;;  %v7260_v42 = vand.u32 4294901760, %v2399_v49  ;;  %v7262_v43 = vand.u32 4294901760, %v2398_v11  ;;  %v7265_v56 = vsub.f32 %v2400_v1, %v7246_v34  ;;  %vm2344_vm12 = vcmp.gt.f32.partialorder %v7097_v25, 0.0 }
 0x222   :  { %3895 = vmatpush.msra.mxu1 %v3894_v35  ;;  %v7235_v60 = vpop.f32.mrf.mxu3  ;;  %v7253_v35 = vsub.f32 %v2401_v31, %v7233_v52  ;;  %v3565_v57 = vand.u32 4294901760, %v3564_v39 }
 0x223   :  { %3493 = vmatmul.f32.gmra.mxu1 %v6979_v48  ;;  %3615 = vmatmul.f32.gmra.mxu3 %v7144_v15  ;;  %v7282_v1 = vsub.f32 %v2398_v11, %v7262_v43  ;;  %v8010_v31 = vand.u32 4294901760, %v7265_v56  ;;  %v2682_v11 = vadd.f32 %v7162_v55, %v6771_v3 }
 0x224   :  { %v7244_v2 = vpop.f32.mrf.mxu1 }
 0x225   :  { %3460 = vmatmul.f32.gmra.mxu0 %v6999_v46  ;;  %v7249_v17 = vpop.f32.mrf.mxu2  ;;  %v7277_v61 = vpop.permute.xlu1 %2606  ;;  %v4171_v51 = vsub.f32 %v7265_v56, %v8010_v31  ;;  %v8013_v62 = vand.u32 4294901760, %v7282_v1  ;;  %v2743_v0 = vadd.f32 %v7203_v54, %v2682_v11 }
 0x226   :  { %3558 = vmatmul.f32.gmra.mxu2 %v3557_v18  ;;  %v7255_v48 = vpop.f32.mrf.mxu0  ;;  %v7273_v18 = vsub.f32 %v2399_v49, %v7260_v42  ;;  %8064 = vst [vmem:[#allocation36_spill] sm:$0xff] %v7277_v61  ;;  %v7308_v3 = vpop.permute.xlu0 %5125 }
 0x227   :  { %v4172_v31 = vand.u32 4294901760, %v4171_v51  ;;  %v2786_v28 = vadd.f32 %v7210_v13, %v2743_v0 }
 0x228   :  { %v7288_v63 = vpop.permute.xlu2 %2611  ;;  %v8012_v61 = vand.u32 4294901760, %v7273_v18 }
 0x229   :  { %8065 = vst [vmem:[#allocation37_spill] sm:$0xff] %v7288_v63 }
 0x22a   :  { %v7269_v41 = vpop.f32.mrf.mxu3 }
 0x22b   :  { %3497 = vmatmul.f32.gmra.mxu1 %v6999_v46  ;;  %3619 = vmatmul.f32.gmra.mxu3 %v7196_v12  ;;  %v8066_v46 = vand.u32 4294901760, %v7253_v35 }
 0x22c   :  { %v7279_v8 = vpop.f32.mrf.mxu1 }
 0x22d   :  { %3464 = vmatmul.f32.gmra.mxu0 %v7032_v24  ;;  %v7285_v39 = vpop.f32.mrf.mxu2  ;;  %v4165_v59 = vsub.f32 %v7253_v35, %v8066_v46  ;;  %v4177_v46 = vsub.f32 %v7273_v18, %v8012_v61  ;;  %v7317_v11 = vpop.permute.xlu1 %2621  ;;  %v8068_v61 = vand.u32 4294901760, %v7122_v33 }
 0x22e   :  { %3566 = vmatmul.f32.gmra.mxu2 %v3565_v57  ;;  %v2873_v49 = vpop.f32.mrf.mxu0  ;;  %8067 = vst [vmem:[#allocation38_spill] sm:$0xff] %v7317_v11  ;;  %v8069_v11 = vand.u32 4294901760, %v7135_v4 }
 0x22f   :  { %v4166_v63 = vand.u32 4294901760, %v4165_v59  ;;  %v2874_v55 = vadd.f32 %v2873_v49, %v7184_v32  ;;  %v4178_v51 = vand.u32 4294901760, %v4177_v46 }
 0x230   :  { %v7324_v49 = vpop.permute.xlu2 %2626 }
 0x232   :  { %v7301_v57 = vpop.f32.mrf.mxu3 }
 0x233   :  { %3501 = vmatmul.f32.gmra.mxu1 %v7032_v24  ;;  %3779 = vmatmul.f32.vlgmr.msrb.gmra.mxu3 %v7071_v45  ;;  %v4183_v24 = vsub.f32 %v7282_v1, %v8013_v62  ;;  %v2690_v62 = vadd.f32 %v7213_v40, %v6940_v9  ;;  %v8071_v40 = vand.u32 4294901760, %v7090_v58 }
 0x234   :  { %4167 = vmatpush.msrb.mxu3 %v4166_v63 }
 0x235   :  { %3649 = vmatmul.f32.vlgmr.msrb.gmra.mxu0 %v7090_v58  ;;  %v2910_v54 = vpop.f32.mrf.mxu1  ;;  %v7312_v59 = vpop.f32.mrf.mxu2  ;;  %v4184_v0 = vand.u32 4294901760, %v4183_v24  ;;  %v2747_v33 = vadd.f32 %v7244_v2, %v2690_v62  ;;  %v8072_v62 = vand.u32 4294901760, %v7150_v20 }
 0x236   :  { %3742 = vmatmul.f32.vlgmr.msrb.gmra.mxu2 %v7071_v45  ;;  %4018 = vmatpush.msrb.mxu0 %v8068_v61  ;;  %v2911_v63 = vadd.f32 %v2910_v54, %v2874_v55  ;;  %v2829_v45 = vadd.f32 %v7193_v19, %v2786_v28  ;;  %v8070_v61 = vand.u32 4294901760, %v7138_v36  ;;  %v2426_v28 = vld [vmem:[%s7980_s4 + $0x80] sm:$0xff]  ;;  %v7347_v36 = vpop.permute.xlu0 %5140  ;;  %v5086_v55 = vpop.permute.xlu1 %5085  ;;  %v2698_v54 = vadd.f32 %v7255_v48, %v6947_v27 }
 0x237   :  { %4110 = vmatpush.msrb.mxu2 %v7233_v52  ;;  %4173 = vmatpush.msrb.mxu3 %v4172_v31  ;;  %v2877_v32 = vpop.f32.mrf.mxu0  ;;  %v2791_v2 = vadd.f32 %v7249_v17, %v2747_v33  ;;  %v8073_v27 = vand.u32 4294901760, %v7125_v10 }
 0x238   :  { %4022 = vmatpush.msrb.mxu0 %v8069_v11  ;;  %v4987_v13 = vmul.f32 0.01, %v2911_v63  ;;  %vm4955_vm13 = vcmp.gt.f32.partialorder %v2911_v63, 0.0  ;;  %v2878_v4 = vadd.f32 %v2877_v32, %v2829_v45  ;;  %v5091_v11 = vpop.permute.xlu2 %5090 }
 0x239   :  { %4112 = vmatpush.msrb.mxu2 %v7246_v34  ;;  %4179 = vmatpush.msrb.mxu3 %v4178_v51  ;;  %v2751_v51 = vadd.f32 %v7279_v8, %v2698_v54  ;;  %v2427_v8 = vld [vmem:[%s7980_s4 + $0x88] sm:$0xff] }
 0x23a   :  { %4026 = vmatpush.msrb.mxu0 %v8070_v61  ;;  %v5019_v31 = vsel %vm4955_vm13, %v2911_v63, %v4987_v13  ;;  %v2835_v63 = vadd.f32 %v7235_v60, %v2791_v2  ;;  %vm2343_vm13 = vcmp.gt.f32.partialorder %v7066_v5, 0.0 }
 0x23b   :  { %4114 = vmatpush.msrb.mxu2 %v7260_v42  ;;  %4185 = vmatpush.msrb.mxu3 %v4184_v0  ;;  %v7336_v9 = vpop.f32.mrf.mxu3  ;;  %v5243_v24 = vmul.f32 %v5086_v55, %v5019_v31  ;;  %v2796_v33 = vadd.f32 %v7285_v39, %v2751_v51  ;;  %v2428_v55 = vld [vmem:[%s7980_s4 + $0x90] sm:$0xff] }
 0x23c   :  { %3691 = vmatmul.f32.vlgmr.msrb.gmra.mxu1 %v8071_v40  ;;  %3783 = vmatmul.f32.gmra.mxu3 %v7103_v53 }
 0x23d   :  { %4030 = vmatpush.msrb.mxu0 %v8072_v62  ;;  %4061 = vmatpush.msrb.mxu1 %v7100_v50  ;;  %v2914_v19 = vpop.f32.mrf.mxu1  ;;  %v3796_v50 = vsel %vm2634_vm10, %v2426_v28, 0  ;;  %v3799_v62 = vsel %vm2634_vm10, %v2427_v8, 0 }
 0x23e   :  { %4116 = vmatpush.msrb.mxu2 %v7262_v43  ;;  %3654 = vmatmul.f32.gmra.mxu0 %v7125_v10  ;;  %v2915_v58 = vadd.f32 %v2914_v19, %v2878_v4  ;;  %v7352_v46 = vpop.f32.mrf.mxu2  ;;  %v7362_v32 = vand.u32 4294901760, %v3796_v50  ;;  %v7381_v40 = vpop.permute.xlu0 %5155  ;;  %v2841_v19 = vadd.f32 %v7269_v41, %v2796_v33  ;;  %v8075_v33 = vand.u32 4294901760, %v7219_v38 }
 0x23f   :  { %3746 = vmatmul.f32.gmra.mxu2 %v7103_v53  ;;  %4063 = vmatpush.msrb.mxu1 %v7107_v47  ;;  %v2881_v20 = vpop.f32.mrf.mxu0 }
 0x240   :  { %vm4956_vm14 = vcmp.gt.f32.partialorder %v2915_v58, 0.0  ;;  %v4988_v17 = vmul.f32 0.01, %v2915_v58  ;;  %v2882_v45 = vadd.f32 %v2881_v20, %v2835_v63  ;;  %v3828_v10 = vsub.f32 %v3796_v50, %v7362_v32 }
 0x241   :  { %4065 = vmatpush.msrb.mxu1 %v7113_v6  ;;  %v5275_v6 = vsel %vm305_vm0, %v5243_v24, 0.0  ;;  %v7388_v20 = vand.u32 4294901760, %v3799_v62 }
 0x242   :  { %v5020_v53 = vsel %vm4956_vm14, %v2915_v58, %v4988_v17  ;;  %v3829_v2 = vand.u32 4294901760, %v3828_v10 }
 0x243   :  { %v5244_v47 = vmul.f32 %v5091_v11, %v5020_v53  ;;  %4067 = vmatpush.msrb.mxu1 %v7130_v37  ;;  %v7365_v0 = vpop.f32.mrf.mxu3  ;;  %v7404_v51 = vsub.f32 %v3799_v62, %v7388_v20  ;;  %v3802_v53 = vsel %vm2634_vm10, %v2428_v55, 0 }
 0x244   :  { %3697 = vmatmul.f32.gmra.mxu1 %v8073_v27  ;;  %3787 = vmatmul.f32.gmra.mxu3 %v7144_v15  ;;  %v3830_v11 = vsub.f32 %v3828_v10, %v3829_v2 }
 0x245   :  { %v5276_v60 = vsel %vm305_vm0, %v5244_v47, 0.0  ;;  %v2918_v48 = vpop.f32.mrf.mxu1 }
 0x246   :  { %v5277_v37 = vadd.f32 %v5276_v60, %v5275_v6  ;;  %3659 = vmatmul.f32.gmra.mxu0 %v7171_v21  ;;  %v2919_v13 = vadd.f32 %v2918_v48, %v2882_v45  ;;  %v7377_v61 = vpop.f32.mrf.mxu2  ;;  %v5101_v45 = vpop.permute.xlu1 %5100  ;;  %v3831_v60 = vand.u32 4294901760, %v3830_v11  ;;  %v7409_v48 = vand.u32 4294901760, %v3802_v53 }
 0x247   :  { %3750 = vmatmul.f32.gmra.mxu2 %v7144_v15  ;;  %v2885_v4 = vpop.f32.mrf.mxu0  ;;  %v8074_v15 = vand.u32 4294901760, %v7171_v21  ;;  %v2964_v21 = vadd.f32 %v7312_v59, %v6823_v22  ;;  %v7407_v27 = vpop.permute.xlu0 %5170 }
 0x248   :  { %vm4957_vm15 = vcmp.gt.f32.partialorder %v2919_v13, 0.0  ;;  %v4989_v28 = vmul.f32 0.01, %v2919_v13  ;;  %v2886_v50 = vadd.f32 %v2885_v4, %v2841_v19  ;;  %v2429_v4 = vld [vmem:[%s7980_s4 + $0x98] sm:$0xff]  ;;  %v7423_v19 = vsub.f32 %v3802_v53, %v7409_v48  ;;  %v8079_v53 = vld [vmem:[#allocation18_spill] sm:$0xff] }
 0x249   :  { %v3029_v8 = vadd.f32 %v7301_v57, %v2964_v21 }
 0x24a   :  { %v5021_v39 = vsel %vm4957_vm15, %v2919_v13, %v4989_v28  ;;  %vm5416_vm15 = vcmask 1041409  }
 0x24b   :  { %v5245_v31 = vmul.f32 %v7225_v14, %v5021_v39  ;;  %v7386_v58 = vpop.f32.mrf.mxu3 }
 0x24c   :  { %3703 = vmatmul.f32.gmra.mxu1 %v8074_v15  ;;  %3791 = vmatmul.f32.gmra.mxu3 %v7196_v12  ;;  %v3805_v15 = vsel %vm2634_vm10, %v2429_v4, 0  ;;  %v8085_v4 = vld [vmem:[#allocation6_spill] sm:$0xff] }
 0x24d   :  { %v5278_v41 = vsel %vm305_vm0, %v5245_v31, 0.0  ;;  %v2922_v54 = vpop.f32.mrf.mxu1  ;;  %v8076_v31 = vand.u32 4294901760, %v7253_v35 }
 0x24e   :  { %v5279_v17 = vadd.f32 %v5278_v41, %v5277_v37  ;;  %3664 = vmatmul.f32.gmra.mxu0 %v7219_v38  ;;  %v2923_v14 = vadd.f32 %v2922_v54, %v2886_v50  ;;  %v7398_v24 = vpop.f32.mrf.mxu2  ;;  %v2972_v38 = vadd.f32 %v7352_v46, %v6973_v23  ;;  %v8077_v41 = vand.u32 4294901760, %v7265_v56 }
 0x24f   :  { %3754 = vmatmul.f32.gmra.mxu2 %v7196_v12  ;;  %v3070_v63 = vpop.f32.mrf.mxu0  ;;  %v3837_v12 = vand.u32 4294901760, %v7404_v51  ;;  %v3845_v23 = vand.u32 4294901760, %v7423_v19  ;;  %v7440_v54 = vand.u32 4294901760, %v3805_v15 }
 0x250   :  { %vm4958_vm1 = vcmp.gt.f32.partialorder %v2923_v14, 0.0  ;;  %v4990_v47 = vmul.f32 0.01, %v2923_v14  ;;  %v3071_v13 = vadd.f32 %v3070_v63, %v3029_v8  ;;  %v3033_v46 = vadd.f32 %v7336_v9, %v2972_v38  ;;  %v8082_v8 = vld [vmem:[#allocation9_spill] sm:$0xff]  ;;  %v8087_v38 = vld [vmem:[#allocation8_spill] sm:$0xff] }
 0x251   :  { %v2027_v9 = vadd.f32 %v6970_v16, %v6888_v44  ;;  %v3846_v63 = vsub.f32 %v7423_v19, %v3845_v23 }
 0x252   :  { %v5022_v6 = vsel %vm4958_vm1, %v2923_v14, %v4990_v47  ;;  %v8078_v14 = vand.u32 4294901760, %v7273_v18  ;;  %v2980_v47 = vadd.f32 %v7377_v61, %v8079_v53  ;;  %v8083_v61 = vld [vmem:[#allocation19_spill] sm:$0xff] }
 0x253   :  { %v5246_v22 = vmul.f32 %v5101_v45, %v5022_v6  ;;  %v3200_v59 = vpop.f32.mrf.mxu3  ;;  %v8080_v6 = vand.u32 4294901760, %v7282_v1 }
 0x254   :  { %3709 = vmatmul.f32.gmra.mxu1 %v8075_v33  ;;  %3981 = vmatmul.f32.vlgmr.msra.gmra.mxu3 %v3829_v2  ;;  %v3838_v2 = vsub.f32 %v7404_v51, %v3837_v12 }
 0x255   :  { %v5280_v37 = vsel %vm305_vm0, %v5246_v22, 0.0  ;;  %4351 = vmatpush.msra.mxu3 %v7233_v52 }
 0x256   :  { %v7420_v28 = vadd.f32 %v5280_v37, %v5279_v17  ;;  %3832 = vmatmul.f32.vlgmr.msra.gmra.mxu0 %v3831_v60  ;;  %v3112_v57 = vpop.f32.mrf.mxu1  ;;  %v3163_v62 = vpop.f32.mrf.mxu2  ;;  %v7461_v60 = vsub.f32 %v3805_v15, %v7440_v54  ;;  %v8084_v37 = vld [vmem:[#allocation11_spill] sm:$0xff] }
 0x257   :  { %3939 = vmatmul.f32.vlgmr.msra.gmra.mxu2 %v3828_v10  ;;  %4217 = vmatpush.msra.mxu0 %v7253_v35  ;;  %v3113_v39 = vadd.f32 %v3112_v57, %v3071_v13  ;;  %v3839_v10 = vand.u32 4294901760, %v3838_v2  ;;  %v7442_v17 = vpop.permute.xlu0 %5185  ;;  %v8086_v57 = vld [vmem:[#allocation12_spill] sm:$0xff] }
 0x258   :  { %4308 = vmatpush.msra.mxu2 %v8076_v31  ;;  %4353 = vmatpush.msra.mxu3 %v7246_v34  ;;  %v3075_v50 = vpop.f32.mrf.mxu0  ;;  %v3853_v15 = vand.u32 4294901760, %v7461_v60 }
 0x259   :  { %4220 = vmatpush.msra.mxu0 %v7265_v56  ;;  %v3164_v55 = vadd.f32 %v3163_v62, %v3113_v39  ;;  %v3076_v11 = vadd.f32 %v3075_v50, %v3033_v46  ;;  %v2019_v62 = vadd.f32 %v8086_v57, %v8085_v4  ;;  %v8088_v39 = vld [vmem:[#allocation15_spill] sm:$0xff]  ;;  %v8090_v46 = vld [vmem:[#allocation16_spill] sm:$0xff] }
 0x25a   :  { %4312 = vmatpush.msra.mxu2 %v8077_v41  ;;  %4355 = vmatpush.msra.mxu3 %v7260_v42  ;;  %v2023_v2 = vadd.f32 %v8088_v39, %v8087_v38 }
 0x25b   :  { %4223 = vmatpush.msra.mxu0 %v7273_v18  ;;  %v3201_v35 = vadd.f32 %v3200_v59, %v3164_v55  ;;  %v2430_v18 = vld [vmem:[%s7980_s4 + $0xa0] sm:$0xff]  ;;  %v8089_v55 = vld [vmem:[#allocation14_spill] sm:$0xff] }
 0x25c   :  { %4316 = vmatpush.msra.mxu2 %v8078_v14  ;;  %4357 = vmatpush.msra.mxu3 %v7262_v43  ;;  %v3204_v56 = vpop.f32.mrf.mxu3  ;;  %v2053_v41 = vadd.f32 %v8089_v55, %v2019_v62 }
 0x25d   :  { %3897 = vmatmul.f32.vlgmr.msra.gmra.mxu1 %v7362_v32  ;;  %3987 = vmatmul.f32.gmra.mxu3 %v3837_v12  ;;  %v4991_v45 = vmul.f32 0.01, %v3201_v35  ;;  %vm4959_vm2 = vcmp.gt.f32.partialorder %v3201_v35, 0.0  ;;  %v2061_v12 = vadd.f32 %v8083_v61, %v2027_v9  ;;  %v5106_v9 = vpop.permute.xlu2 %5105 }
 0x25e   :  { %4226 = vmatpush.msra.mxu0 %v7282_v1  ;;  %4261 = vmatpush.msra.mxu1 %v7233_v52  ;;  %v3118_v21 = vpop.f32.mrf.mxu1  ;;  %v8081_v52 = vld [vmem:[#allocation5_spill] sm:$0xff]  ;;  %v4086_v1 = vsel %vm2634_vm10, %v2430_v18, 0  ;;  %vm2339_vm6 = vcmp.gt.f32.partialorder %v2053_v41, 0.0 }
 0x25f   :  { %4320 = vmatpush.msra.mxu2 %v8080_v6  ;;  %3840 = vmatmul.f32.gmra.mxu0 %v3839_v10  ;;  %v3119_v44 = vadd.f32 %v3118_v21, %v3076_v11  ;;  %v3167_v16 = vpop.f32.mrf.mxu2  ;;  %v2015_v22 = vadd.f32 %v8082_v8, %v8081_v52  ;;  %v5023_v31 = vsel %vm4959_vm2, %v3201_v35, %v4991_v45  ;;  %v7482_v11 = vand.u32 4294901760, %v4086_v1 }
 0x260   :  { %3944 = vmatmul.f32.gmra.mxu2 %v7404_v51  ;;  %4263 = vmatpush.msra.mxu1 %v7246_v34  ;;  %v3080_v59 = vpop.f32.mrf.mxu0  ;;  %v3847_v51 = vand.u32 4294901760, %v3846_v63  ;;  %v3037_v34 = vadd.f32 %v7365_v0, %v2980_v47  ;;  %v2057_v10 = vadd.f32 %v8090_v46, %v2023_v2  ;;  %v2373_v21 = vmul.f32 0.01, %v2061_v12  ;;  %v7485_v0 = vpop.permute.xlu0 %5210  ;;  %v8091_v63 = vld [vmem:[#allocation7_spill] sm:$0xff] }
 0x261   :  { %v3168_v33 = vadd.f32 %v3167_v16, %v3119_v44  ;;  %v7470_v13 = vadd.f32 %v8084_v37, %v2015_v22  ;;  %vm2341_vm5 = vcmp.gt.f32.partialorder %v2061_v12, 0.0  ;;  %v5247_v35 = vmul.f32 %v5106_v9, %v5023_v31  ;;  %v2432_v9 = vld [vmem:[%s7980_s4 + $0xb0] sm:$0xff] }
 0x262   :  { %4265 = vmatpush.msra.mxu1 %v7260_v42  ;;  %v3081_v18 = vadd.f32 %v3080_v59, %v3037_v34  ;;  %v3854_v6 = vsub.f32 %v7461_v60, %v3853_v15  ;;  %v2371_v44 = vmul.f32 0.01, %v2053_v41  ;;  %v2372_v16 = vmul.f32 0.01, %v2057_v10 }
 0x263   :  { %v3205_v50 = vadd.f32 %v3204_v56, %v3168_v33  ;;  %vm2338_vm4 = vcmp.gt.f32.partialorder %v7470_v13, 0.0  ;;  %v7497_v22 = vsub.f32 %v4086_v1, %v7482_v11  ;;  %vm2340_vm7 = vcmp.gt.f32.partialorder %v2057_v10, 0.0 }
 0x264   :  { %4267 = vmatpush.msra.mxu1 %v7262_v43  ;;  %v3208_v14 = vpop.f32.mrf.mxu3  ;;  %v2988_v43 = vadd.f32 %v7398_v24, %v8091_v63  ;;  %v2405_v24 = vsel %vm2341_vm5, %v2061_v12, %v2373_v21  ;;  %v2370_v61 = vmul.f32 0.01, %v7470_v13  ;;  %v5288_v33 = vsel %vm305_vm0, %v5247_v35, 0.0 }
 0x265   :  { %vm4960_vm3 = vcmp.gt.f32.partialorder %v3205_v50, 0.0  ;;  %v4992_v42 = vmul.f32 0.01, %v3205_v50  ;;  %3901 = vmatmul.f32.gmra.mxu1 %v7388_v20  ;;  %3993 = vmatmul.f32.gmra.mxu3 %v3845_v23  ;;  %v2431_v23 = vld [vmem:[%s7980_s4 + $0xa8] sm:$0xff]  ;;  %v3855_v62 = vand.u32 4294901760, %v3854_v6  ;;  %v2403_v1 = vsel %vm2339_vm6, %v2053_v41, %v2371_v44 }
 0x266   :  { %v3124_v56 = vpop.f32.mrf.mxu1  ;;  %v4089_v4 = vsel %vm2634_vm10, %v2431_v23, 0  ;;  %v2404_v38 = vsel %vm2340_vm7, %v2057_v10, %v2372_v16  ;;  %v7505_v39 = vand.u32 4294901760, %v2405_v24  ;;  %v4119_v12 = vand.u32 4294901760, %v7497_v22 }
 0x267   :  { %v5024_v53 = vsel %vm4960_vm3, %v3205_v50, %v4992_v42  ;;  %3848 = vmatmul.f32.gmra.mxu0 %v3847_v51  ;;  %v3125_v47 = vadd.f32 %v3124_v56, %v3081_v18  ;;  %v3171_v45 = vpop.f32.mrf.mxu2  ;;  %v7509_v31 = vand.u32 4294901760, %v4089_v4  ;;  %v2402_v55 = vsel %vm2338_vm4, %v7470_v13, %v2370_v61 }
 0x268   :  { %v5248_v52 = vmul.f32 %v7267_v7, %v5024_v53  ;;  %3949 = vmatmul.f32.gmra.mxu2 %v7423_v19  ;;  %v3085_v8 = vpop.f32.mrf.mxu0  ;;  %v3041_v7 = vadd.f32 %v7386_v58, %v2988_v43  ;;  %v5116_v58 = vpop.permute.xlu1 %5115  ;;  %v7514_v41 = vand.u32 4294901760, %v2404_v38  ;;  %v7524_v18 = vsub.f32 %v2405_v24, %v7505_v39 }
 0x269   :  { %v3172_v59 = vadd.f32 %v3171_v45, %v3125_v47  ;;  %v7519_v21 = vpop.permute.xlu0 %5230  ;;  %v4120_v35 = vsub.f32 %v7497_v22, %v4119_v12  ;;  %v7531_v63 = vsub.f32 %v4089_v4, %v7509_v31  ;;  %v7533_v43 = vand.u32 4294901760, %v2402_v55 }
 0x26a   :  { %v5289_v37 = vsel %vm305_vm0, %v5248_v52, 0.0  ;;  %v3086_v51 = vadd.f32 %v3085_v8, %v3041_v7  ;;  %v4092_v47 = vsel %vm2634_vm10, %v2432_v9, 0  ;;  %v5282_v45 = vrot.slane %v7420_v28, 4 }
 0x26b   :  { %v5290_v19 = vadd.f32 %v5289_v37, %v5288_v33  ;;  %v3209_v57 = vadd.f32 %v3208_v14, %v3172_v59  ;;  %v4121_v44 = vand.u32 4294901760, %v4120_v35  ;;  %v4454_v8 = vand.u32 4294901760, %v7524_v18  ;;  %v5121_v33 = vpop.permute.xlu2 %5120 }
 0x26c   :  { %v3212_v2 = vpop.f32.mrf.mxu3  ;;  %v4127_v59 = vand.u32 4294901760, %v7531_v63  ;;  %v7548_v61 = vand.u32 4294901760, %v4092_v47  ;;  %v7553_v4 = vsub.f32 %v2402_v55, %v7533_v43  ;;  %v5283_v7 = vadd.f32 %v5282_v45, %v7420_v28 }
 0x26d   :  { %vm4961_vm8 = vcmp.gt.f32.partialorder %v3209_v57, 0.0  ;;  %v4993_v34 = vmul.f32 0.01, %v3209_v57  ;;  %3905 = vmatmul.f32.gmra.mxu1 %v7409_v48  ;;  %3999 = vmatmul.f32.gmra.mxu3 %v3853_v15  ;;  %v7521_v15 = vand.u32 4294901760, %v2403_v1  ;;  %v4455_v28 = vsub.f32 %v7524_v18, %v4454_v8 }
 0x26e   :  { %v3130_v50 = vpop.f32.mrf.mxu1  ;;  %vm5419_vm7 = vcmask 1042434  }
 0x26f   :  { %v5025_v46 = vsel %vm4961_vm8, %v3209_v57, %v4993_v34  ;;  %3856 = vmatmul.f32.gmra.mxu0 %v3855_v62  ;;  %v3131_v10 = vadd.f32 %v3130_v50, %v3086_v51  ;;  %v3175_v14 = vpop.f32.mrf.mxu2  ;;  %v7542_v16 = vsub.f32 %v2403_v1, %v7521_v15  ;;  %v4128_v50 = vsub.f32 %v7531_v63, %v4127_v59 }
 0x270   :  { %v5249_v42 = vmul.f32 %v5116_v58, %v5025_v46  ;;  %3954 = vmatmul.f32.gmra.mxu2 %v7461_v60  ;;  %v3253_v13 = vpop.f32.mrf.mxu0  ;;  %v7539_v60 = vsub.f32 %v2404_v38, %v7514_v41  ;;  %v2433_v38 = vld [vmem:[%s7980_s4 + $0xb8] sm:$0xff]  ;;  %v7572_v58 = vsub.f32 %v4092_v47, %v7548_v61 }
 0x271   :  { %v3176_v56 = vadd.f32 %v3175_v14, %v3131_v10  ;;  %v3254_v37 = vadd.f32 %v3253_v13, %v7001_v29  ;;  %v4466_v51 = vand.u32 4294901760, %v7542_v16  ;;  %v7574_v55 = vpop.permute.xlu0 %5235  ;;  %v4472_v14 = vand.u32 4294901760, %v7553_v4 }
 0x272   :  { %v5291_v53 = vsel %vm305_vm0, %v5249_v42, 0.0  ;;  %v4460_v1 = vand.u32 4294901760, %v7539_v60  ;;  %v4095_v9 = vsel %vm2634_vm10, %v2433_v38, 0  ;;  %v5284_v42 = vrot.slane %v5283_v7, 2 }
 0x273   :  { %v5292_v6 = vadd.f32 %v5291_v53, %v5290_v19  ;;  %v3213_v23 = vadd.f32 %v3212_v2, %v3176_v56  ;;  %v4456_v53 = vand.u32 4294901760, %v4455_v28  ;;  %v4467_v47 = vsub.f32 %v7542_v16, %v4466_v51 }
 0x274   :  { %v3402_v52 = vpop.f32.mrf.mxu3  ;;  %v4461_v35 = vsub.f32 %v7539_v60, %v4460_v1 }
 0x275   :  { %vm4962_vm9 = vcmp.gt.f32.partialorder %v3213_v23, 0.0  ;;  %v4994_v24 = vmul.f32 0.01, %v3213_v23  ;;  %3909 = vmatmul.f32.gmra.mxu1 %v7440_v54  ;;  %4187 = vmatmul.f32.vlgmr.msrb.gmra.mxu3 %v7482_v11 }
 0x276   :  { %4551 = vmatpush.msrb.mxu3 %v7505_v39 }
 0x277   :  { %v5026_v19 = vsel %vm4962_vm9, %v3213_v23, %v4994_v24  ;;  %4032 = vmatmul.f32.vlgmr.msrb.gmra.mxu0 %v7362_v32  ;;  %v3318_v57 = vpop.f32.mrf.mxu1  ;;  %v3360_v62 = vpop.f32.mrf.mxu2  ;;  %v7594_v24 = vand.u32 4294901760, %v4095_v9 }
 0x278   :  { %v5250_v2 = vmul.f32 %v5121_v33, %v5026_v19  ;;  %4122 = vmatmul.f32.vlgmr.msrb.gmra.mxu2 %v4121_v44  ;;  %4400 = vmatpush.msrb.mxu0 %v7505_v39  ;;  %v3319_v29 = vadd.f32 %v3318_v57, %v3254_v37  ;;  %v4135_v44 = vand.u32 4294901760, %v7572_v58  ;;  %v2377_v33 = vmul.f32 0.01, %v7132_v30 }
 0x279   :  { %4507 = vmatpush.msrb.mxu2 %v7524_v18  ;;  %4553 = vmatpush.msrb.mxu3 %v7514_v41  ;;  %v3261_v34 = vpop.f32.mrf.mxu0  ;;  %v4473_v37 = vsub.f32 %v7553_v4, %v4472_v14  ;;  %v5285_v19 = vadd.f32 %v5284_v42, %v5283_v7  ;;  %v2375_v42 = vmul.f32 0.01, %v7066_v5 }
 0x27a   :  { %v5293_v46 = vsel %vm305_vm0, %v5250_v2, 0.0  ;;  %4402 = vmatpush.msrb.mxu0 %v7514_v41  ;;  %v3361_v10 = vadd.f32 %v3360_v62, %v3319_v29  ;;  %v4462_v62 = vand.u32 4294901760, %v4461_v35  ;;  %v2376_v2 = vmul.f32 0.01, %v7097_v25 }
 0x27b   :  { %v5294_v13 = vadd.f32 %v5293_v46, %v5292_v6  ;;  %4510 = vmatpush.msrb.mxu2 %v7539_v60  ;;  %4555 = vmatpush.msrb.mxu3 %v7521_v15  ;;  %v4129_v6 = vand.u32 4294901760, %v4128_v50  ;;  %v7613_v50 = vsub.f32 %v4095_v9, %v7594_v24  ;;  %v2409_v46 = vsel %vm2345_vm11, %v7132_v30, %v2377_v33  ;;  %v2434_v60 = vld [vmem:[%s7980_s4 + $0xc0] sm:$0xff] }
 0x27c   :  { %4404 = vmatpush.msrb.mxu0 %v7521_v15  ;;  %v7586_v56 = vadd.f32 %v3402_v52, %v3361_v10  ;;  %v3262_v52 = vadd.f32 %v3261_v34, %v7006_v26  ;;  %v4468_v26 = vand.u32 4294901760, %v4467_v47  ;;  %v4136_v34 = vsub.f32 %v7572_v58, %v4135_v44  ;;  %v7619_v47 = vpop.permute.xlu0 %5382 }
 0x27d   :  { %v5295_v45 = vrot.slane %v5294_v13, 4  ;;  %4513 = vmatpush.msrb.mxu2 %v7542_v16  ;;  %4557 = vmatpush.msrb.mxu3 %v7533_v43  ;;  %v3408_v23 = vpop.f32.mrf.mxu3  ;;  %v2408_v9 = vsel %vm2344_vm12, %v7097_v25, %v2376_v2  ;;  %v7628_v30 = vand.u32 4294901760, %v2409_v46  ;;  %v5384_v25 = vrot.slane %v7619_v47, 1 }
 0x27e   :  { %4069 = vmatmul.f32.vlgmr.msrb.gmra.mxu1 %v7362_v32  ;;  %4191 = vmatmul.f32.gmra.mxu3 %v7509_v31 }
 0x27f   :  { %v5296_v57 = vadd.f32 %v5295_v45, %v5294_v13  ;;  %4406 = vmatpush.msrb.mxu0 %v7533_v43  ;;  %4457 = vmatpush.msrb.mxu1 %v4456_v53  ;;  %v3322_v38 = vpop.f32.mrf.mxu1  ;;  %v5286_v13 = vrot.slane %v5285_v19, 1  ;;  %v4474_v53 = vand.u32 4294901760, %v4473_v37  ;;  %v8092_v45 = vld [vmem:[#allocation22_spill] sm:$0xff]  ;;  %v4143_v37 = vand.u32 4294901760, %v7613_v50 }
 0x280   :  { %4516 = vmatpush.msrb.mxu2 %v7553_v4  ;;  %4036 = vmatmul.f32.gmra.mxu0 %v7388_v20  ;;  %v3323_v32 = vadd.f32 %v3322_v38, %v3262_v52  ;;  %v3365_v29 = vpop.f32.mrf.mxu2  ;;  %vm2342_vm14 = vcmp.gt.f32.partialorder %v8092_v45, 0.0  ;;  %v8093_v38 = vld [vmem:[#allocation10_spill] sm:$0xff]  ;;  %v4376_v4 = vsel %vm2634_vm10, %v2434_v60, 0 }
 0x281   :  { %v5297_v28 = vrot.slane %v5296_v57, 2  ;;  %4130 = vmatmul.f32.gmra.mxu2 %v4129_v6  ;;  %4463 = vmatpush.msrb.mxu1 %v4462_v62  ;;  %v3269_v7 = vpop.f32.mrf.mxu0  ;;  %v2374_v6 = vmul.f32 0.01, %v8092_v45  ;;  %v4137_v62 = vand.u32 4294901760, %v4136_v34  ;;  %v5287_v2 = vadd.f32 %v5286_v13, %v5285_v19 }
 0x282   :  { %v3366_v10 = vadd.f32 %v3365_v29, %v3323_v32 }
 0x283   :  { %v5298_v35 = vadd.f32 %v5297_v28, %v5296_v57  ;;  %4469 = vmatpush.msrb.mxu1 %v4468_v26  ;;  %v3270_v26 = vadd.f32 %v3269_v7, %v8093_v38  ;;  %v7637_v28 = vand.u32 4294901760, %v2408_v9  ;;  %v7642_v7 = vsub.f32 %v2409_v46, %v7628_v30 }
 0x284   :  { %v7626_v52 = vadd.f32 %v3408_v23, %v3366_v10  ;;  %v2407_v23 = vsel %vm2343_vm13, %v7066_v5, %v2375_v42  ;;  %v4144_v5 = vsub.f32 %v7613_v50, %v4143_v37  ;;  %v5399_v13 = vadd.f32 %v7619_v47, %v5287_v2 }
 0x285   :  { %v5299_v33 = vrot.slane %v5298_v35, 1  ;;  %4475 = vmatpush.msrb.mxu1 %v4474_v53  ;;  %v3414_v57 = vpop.f32.mrf.mxu3  ;;  %v2406_v53 = vsel %vm2342_vm14, %v8092_v45, %v2374_v6  ;;  %v7647_v19 = vand.u32 4294901760, %v2407_v23  ;;  %v7653_v45 = vsub.f32 %v2408_v9, %v7637_v28 }
 0x286   :  { %4073 = vmatmul.f32.gmra.mxu1 %v7388_v20  ;;  %4195 = vmatmul.f32.gmra.mxu3 %v7548_v61  ;;  %v4145_v6 = vand.u32 4294901760, %v4144_v5 }
 0x287   :  { %v5300_v32 = vadd.f32 %v5299_v33, %v5298_v35  ;;  %v3326_v29 = vpop.f32.mrf.mxu1  ;;  %v7650_v33 = vand.u32 4294901760, %v2406_v53 }
 0x288   :  { %4040 = vmatmul.f32.gmra.mxu0 %v7409_v48  ;;  %v3327_v34 = vadd.f32 %v3326_v29, %v3270_v26  ;;  %v3370_v10 = vpop.f32.mrf.mxu2  ;;  %v4744_v26 = vand.u32 4294901760, %v7642_v7  ;;  %v8094_v29 = vld [vmem:[#allocation23_spill] sm:$0xff] }
 0x289   :  { %v5400_v20 = vadd.f32 %v5384_v25, %v5300_v32  ;;  %4138 = vmatmul.f32.gmra.mxu2 %v4137_v62  ;;  %v3277_v38 = vpop.f32.mrf.mxu0  ;;  %v7661_v32 = vsub.f32 %v2407_v23, %v7647_v19  ;;  %v7667_v9 = vsub.f32 %v2406_v53, %v7650_v33 }
 0x28a   :  { %v3371_v42 = vadd.f32 %v3370_v10, %v3327_v34  ;;  %v3278_v34 = vadd.f32 %v3277_v38, %v8094_v29  ;;  %v4745_v23 = vsub.f32 %v7642_v7, %v4744_v26 }
 0x28b   :  { %v5415_v35 = vrot.slane %v5400_v20, 7  ;;  %v4750_v20 = vand.u32 4294901760, %v7653_v45 }
 0x28c   :  { %v7655_v46 = vadd.f32 %v3414_v57, %v3371_v42 }
 0x28d   :  { %v3420_v62 = vpop.f32.mrf.mxu3  ;;  %v7658_v25 = vsel %vm5416_vm15, %v5415_v35, %v5399_v13  ;;  %v4751_v53 = vsub.f32 %v7653_v45, %v4750_v20  ;;  %v4762_v13 = vand.u32 4294901760, %v7667_v9  ;;  %v4746_v35 = vand.u32 4294901760, %v4745_v23 }
 0x28e   :  { %4077 = vmatmul.f32.gmra.mxu1 %v7409_v48  ;;  %4199 = vmatmul.f32.gmra.mxu3 %v7594_v24  ;;  %v4756_v48 = vand.u32 4294901760, %v7661_v32 }
 0x28f   :  { %v3330_v2 = vpop.f32.mrf.mxu1 }
 0x290   :  { %4044 = vmatmul.f32.gmra.mxu0 %v7440_v54  ;;  %v3331_v57 = vadd.f32 %v3330_v2, %v3278_v34  ;;  %v3375_v10 = vpop.f32.mrf.mxu2  ;;  %v4752_v34 = vand.u32 4294901760, %v4751_v53 }
 0x291   :  { %4146 = vmatmul.f32.gmra.mxu2 %v4145_v6  ;;  %v3453_v5 = vpop.f32.mrf.mxu0  ;;  %v4757_v6 = vsub.f32 %v7661_v32, %v4756_v48 }
 0x292   :  { %v3376_v38 = vadd.f32 %v3375_v10, %v3331_v57  ;;  %v4763_v10 = vsub.f32 %v7667_v9, %v4762_v13 }
 0x294   :  { %v7675_v42 = vadd.f32 %v3420_v62, %v3376_v38  ;;  %v3454_v62 = vadd.f32 %v3453_v5, %v7586_v56  ;;  %v4758_v56 = vand.u32 4294901760, %v4757_v6  ;;  %v4764_v23 = vand.u32 4294901760, %v4763_v10  ;;  %v2435_v10 = vld [vmem:[%s7980_s4 + $0xc8] sm:$0xff] }
 0x295   :  { %v7681_v29 = vpop.f32.mrf.mxu3 }
 0x296   :  { %4081 = vmatmul.f32.gmra.mxu1 %v7440_v54  ;;  %4359 = vmatmul.f32.vlgmr.msra.gmra.mxu3 %v7482_v11 }
 0x297   :  { %4747 = vmatpush.msra.mxu3 %v4746_v35  ;;  %v5131_v35 = vpop.permute.xlu1 %5130 }
 0x298   :  { %4229 = vmatmul.f32.vlgmr.msra.gmra.mxu0 %v7497_v22  ;;  %v3490_v2 = vpop.f32.mrf.mxu1  ;;  %v7690_v57 = vpop.f32.mrf.mxu2 }
 0x299   :  { %4322 = vmatmul.f32.vlgmr.msra.gmra.mxu2 %v7482_v11  ;;  %4598 = vmatpush.msra.mxu0 %v4454_v8  ;;  %v3491_v54 = vadd.f32 %v3490_v2, %v3454_v62  ;;  %v7725_v62 = vand.u32 4294901760, %v4376_v4 }
 0x29a   :  { %4690 = vmatpush.msra.mxu2 %v7628_v30  ;;  %4753 = vmatpush.msra.mxu3 %v4752_v34  ;;  %v3457_v5 = vpop.f32.mrf.mxu0 }
 0x29b   :  { %4602 = vmatpush.msra.mxu0 %v4460_v1  ;;  %v4995_v38 = vmul.f32 0.01, %v3491_v54  ;;  %vm4963_vm1 = vcmp.gt.f32.partialorder %v3491_v54, 0.0  ;;  %v3458_v18 = vadd.f32 %v3457_v5, %v7626_v52 }
 0x29c   :  { %4692 = vmatpush.msra.mxu2 %v7637_v28  ;;  %4759 = vmatpush.msra.mxu3 %v4758_v56 }
 0x29d   :  { %4606 = vmatpush.msra.mxu0 %v4466_v51  ;;  %v5027_v8 = vsel %vm4963_vm1, %v3491_v54, %v4995_v38  ;;  %v4379_v38 = vsel %vm2634_vm10, %v2435_v10, 0 }
 0x29e   :  { %4694 = vmatpush.msra.mxu2 %v7647_v19  ;;  %4765 = vmatpush.msra.mxu3 %v4764_v23  ;;  %v3612_v11 = vpop.f32.mrf.mxu3 }
 0x29f   :  { %4271 = vmatmul.f32.vlgmr.msra.gmra.mxu1 %v4119_v12  ;;  %4363 = vmatmul.f32.gmra.mxu3 %v7509_v31  ;;  %v8095_v12 = vld [vmem:[#allocation13_spill] sm:$0xff] }
 0x2a0   :  { %4610 = vmatpush.msra.mxu0 %v4472_v14  ;;  %4641 = vmatpush.msra.mxu1 %v7505_v39  ;;  %v3494_v16 = vpop.f32.mrf.mxu1  ;;  %v5251_v39 = vmul.f32 %v7308_v3, %v5027_v8 }
 0x2a1   :  { %4696 = vmatpush.msra.mxu2 %v7650_v33  ;;  %4234 = vmatmul.f32.gmra.mxu0 %v7531_v63  ;;  %v3495_v1 = vadd.f32 %v3494_v16, %v3458_v18  ;;  %v3551_v22 = vpop.f32.mrf.mxu2  ;;  %v8096_v63 = vld [vmem:[#allocation26_spill] sm:$0xff]  ;;  %v5136_v18 = vpop.permute.xlu2 %5135 }
 0x2a2   :  { %4326 = vmatmul.f32.gmra.mxu2 %v7509_v31  ;;  %4643 = vmatpush.msra.mxu1 %v7514_v41  ;;  %v3552_v51 = vadd.f32 %v3551_v22, %v8095_v12  ;;  %v3461_v52 = vpop.f32.mrf.mxu0  ;;  %v5301_v3 = vsel %vm305_vm0, %v5251_v39, 0.0  ;;  %v7744_v22 = vand.u32 4294901760, %v4379_v38 }
 0x2a3   :  { %vm4964_vm2 = vcmp.gt.f32.partialorder %v3495_v1, 0.0  ;;  %v4996_v14 = vmul.f32 0.01, %v3495_v1  ;;  %v3462_v34 = vadd.f32 %v3461_v52, %v7655_v46  ;;  %v4408_v46 = vsub.f32 %v4376_v4, %v7725_v62 }
 0x2a4   :  { %4645 = vmatpush.msra.mxu1 %v7521_v15  ;;  %v7723_v53 = vadd.f32 %v3612_v11, %v3552_v51 }
 0x2a5   :  { %v5028_v6 = vsel %vm4964_vm2, %v3495_v1, %v4996_v14  ;;  %v4409_v16 = vand.u32 4294901760, %v4408_v46  ;;  %vm5425_vm2 = vcmask 1044484  }
 0x2a6   :  { %v5252_v31 = vmul.f32 %v5131_v35, %v5028_v6  ;;  %4647 = vmatpush.msra.mxu1 %v7533_v43  ;;  %v3616_v41 = vpop.f32.mrf.mxu3  ;;  %v8097_v6 = vld [vmem:[#allocation24_spill] sm:$0xff] }
 0x2a7   :  { %4277 = vmatmul.f32.gmra.mxu1 %v4127_v59  ;;  %4367 = vmatmul.f32.gmra.mxu3 %v7548_v61  ;;  %v4410_v35 = vsub.f32 %v4408_v46, %v4409_v16 }
 0x2a8   :  { %v5302_v15 = vsel %vm305_vm0, %v5252_v31, 0.0  ;;  %v3498_v2 = vpop.f32.mrf.mxu1 }
 0x2a9   :  { %v5303_v54 = vadd.f32 %v5302_v15, %v5301_v3  ;;  %4239 = vmatmul.f32.gmra.mxu0 %v7572_v58  ;;  %v3499_v43 = vadd.f32 %v3498_v2, %v3462_v34  ;;  %v3559_v56 = vpop.f32.mrf.mxu2  ;;  %v8098_v58 = vld [vmem:[#allocation27_spill] sm:$0xff]  ;;  %v4411_v10 = vand.u32 4294901760, %v4410_v35 }
 0x2aa   :  { %4330 = vmatmul.f32.gmra.mxu2 %v7548_v61  ;;  %v3560_v59 = vadd.f32 %v3559_v56, %v8096_v63  ;;  %v3465_v5 = vpop.f32.mrf.mxu0  ;;  %v2436_v61 = vld [vmem:[%s7980_s4 + $0xd0] sm:$0xff] }
 0x2ab   :  { %vm4965_vm3 = vcmp.gt.f32.partialorder %v3499_v43, 0.0  ;;  %v4997_v23 = vmul.f32 0.01, %v3499_v43  ;;  %v3466_v12 = vadd.f32 %v3465_v5, %v7675_v42  ;;  %v3544_v42 = vadd.f32 %v7690_v57, %v8097_v6  ;;  %v2437_v5 = vld [vmem:[%s7980_s4 + $0xd8] sm:$0xff] }
 0x2ac   :  { %v7742_v11 = vadd.f32 %v3616_v41, %v3560_v59  ;;  %v7760_v41 = vsub.f32 %v4379_v38, %v7744_v22  ;;  %v4382_v34 = vsel %vm2634_vm10, %v2436_v61, 0 }
 0x2ad   :  { %v5029_v60 = vsel %vm4965_vm3, %v3499_v43, %v4997_v23  ;;  %v3609_v57 = vadd.f32 %v7681_v29, %v3544_v42 }
 0x2ae   :  { %v5253_v8 = vmul.f32 %v5136_v18, %v5029_v60  ;;  %v3620_v1 = vpop.f32.mrf.mxu3  ;;  %v4417_v56 = vand.u32 4294901760, %v7760_v41 }
 0x2af   :  { %4283 = vmatmul.f32.gmra.mxu1 %v4135_v44  ;;  %4371 = vmatmul.f32.gmra.mxu3 %v7594_v24 }
 0x2b0   :  { %v5304_v51 = vsel %vm305_vm0, %v5253_v8, 0.0  ;;  %v3502_v52 = vpop.f32.mrf.mxu1 }
 0x2b1   :  { %v5305_v4 = vadd.f32 %v5304_v51, %v5303_v54  ;;  %4244 = vmatmul.f32.gmra.mxu0 %v7613_v50  ;;  %v3503_v14 = vadd.f32 %v3502_v52, %v3466_v12  ;;  %v3567_v39 = vpop.f32.mrf.mxu2  ;;  %v7765_v54 = vand.u32 4294901760, %v4382_v34 }
 0x2b2   :  { %4334 = vmatmul.f32.gmra.mxu2 %v7594_v24  ;;  %v3568_v44 = vadd.f32 %v3567_v39, %v8098_v58  ;;  %v3650_v31 = vpop.f32.mrf.mxu0 }
 0x2b3   :  { %vm4966_vm4 = vcmp.gt.f32.partialorder %v3503_v14, 0.0  ;;  %v4998_v3 = vmul.f32 0.01, %v3503_v14  ;;  %v3651_v59 = vadd.f32 %v3650_v31, %v3609_v57  ;;  %v7778_v38 = vsub.f32 %v4382_v34, %v7765_v54 }
 0x2b4   :  { %v7763_v15 = vadd.f32 %v3620_v1, %v3568_v44 }
 0x2b5   :  { %v5030_v2 = vsel %vm4966_vm4, %v3503_v14, %v4998_v3 }
 0x2b6   :  { %v5254_v24 = vmul.f32 %v7347_v36, %v5030_v2  ;;  %v3780_v43 = vpop.f32.mrf.mxu3 }
 0x2b7   :  { %4289 = vmatmul.f32.gmra.mxu1 %v4143_v37  ;;  %4561 = vmatmul.f32.vlgmr.msrb.gmra.mxu3 %v4409_v16  ;;  %v4418_v37 = vsub.f32 %v7760_v41, %v4417_v56  ;;  %v4385_v16 = vsel %vm2634_vm10, %v2437_v5, 0 }
 0x2b8   :  { %v5306_v63 = vsel %vm305_vm0, %v5254_v24, 0.0  ;;  %4931 = vmatpush.msrb.mxu3 %v7628_v30  ;;  %v7792_v12 = vand.u32 4294901760, %v4385_v16 }
 0x2b9   :  { %v5307_v23 = vadd.f32 %v5306_v63, %v5305_v4  ;;  %4412 = vmatmul.f32.vlgmr.msrb.gmra.mxu0 %v4411_v10  ;;  %v3692_v29 = vpop.f32.mrf.mxu1  ;;  %v3743_v36 = vpop.f32.mrf.mxu2 }
 0x2ba   :  { %4519 = vmatmul.f32.vlgmr.msrb.gmra.mxu2 %v4408_v46  ;;  %4797 = vmatpush.msrb.mxu0 %v7642_v7  ;;  %v3693_v50 = vadd.f32 %v3692_v29, %v3651_v59  ;;  %v4425_v46 = vand.u32 4294901760, %v7778_v38 }
 0x2bb   :  { %v5308_v18 = vrot.slane %v5307_v23, 4  ;;  %4888 = vmatpush.msrb.mxu2 %v4744_v26  ;;  %4933 = vmatpush.msrb.mxu3 %v7637_v28  ;;  %v3655_v60 = vpop.f32.mrf.mxu0  ;;  %v4419_v26 = vand.u32 4294901760, %v4418_v37 }
 0x2bc   :  { %4800 = vmatpush.msrb.mxu0 %v7653_v45  ;;  %v3744_v8 = vadd.f32 %v3743_v36, %v3693_v50  ;;  %v2438_v45 = vld [vmem:[%s7980_s4 + $0xe0] sm:$0xff] }
 0x2bd   :  { %v5309_v1 = vadd.f32 %v5308_v18, %v5307_v23  ;;  %4892 = vmatpush.msrb.mxu2 %v4750_v20  ;;  %4935 = vmatpush.msrb.mxu3 %v7647_v19  ;;  %v3656_v20 = vadd.f32 %v3655_v60, %v7723_v53  ;;  %v7809_v53 = vsub.f32 %v4385_v16, %v7792_v12  ;;  %v4666_v35 = vsel %vm2634_vm10, %v2438_v45, 0 }
 0x2be   :  { %4803 = vmatpush.msrb.mxu0 %v7661_v32  ;;  %v3781_v7 = vadd.f32 %v3780_v43, %v3744_v8  ;;  %v7815_v58 = vand.u32 4294901760, %v4666_v35 }
 0x2bf   :  { %v5310_v61 = vrot.slane %v5309_v1, 2  ;;  %4896 = vmatpush.msrb.mxu2 %v4756_v48  ;;  %4937 = vmatpush.msrb.mxu3 %v7650_v33  ;;  %v3784_v51 = vpop.f32.mrf.mxu3  ;;  %v4426_v48 = vsub.f32 %v7778_v38, %v4425_v46  ;;  %v4433_v34 = vand.u32 4294901760, %v7809_v53 }
 0x2c0   :  { %4477 = vmatmul.f32.vlgmr.msrb.gmra.mxu1 %v7725_v62  ;;  %4806 = vmatpush.msrb.mxu0 %v7667_v9  ;;  %v4999_v4 = vmul.f32 0.01, %v3781_v7  ;;  %vm4967_vm5 = vcmp.gt.f32.partialorder %v3781_v7, 0.0  ;;  %v7825_v63 = vsub.f32 %v4666_v35, %v7815_v58 }
 0x2c1   :  { %v5311_v52 = vadd.f32 %v5310_v61, %v5309_v1  ;;  %4841 = vmatpush.msrb.mxu1 %v7628_v30  ;;  %4900 = vmatpush.msrb.mxu2 %v4762_v13  ;;  %v3698_v32 = vpop.f32.mrf.mxu1  ;;  %v5385_v13 = vrot.slane %v7619_v47, 2  ;;  %v4434_v23 = vsub.f32 %v7809_v53, %v4433_v34 }
 0x2c2   :  { %4420 = vmatmul.f32.gmra.mxu0 %v4419_v26  ;;  %4524 = vmatmul.f32.gmra.mxu2 %v7760_v41  ;;  %v3699_v14 = vadd.f32 %v3698_v32, %v3656_v20  ;;  %v3747_v39 = vpop.f32.mrf.mxu2  ;;  %v5031_v44 = vsel %vm4967_vm5, %v3781_v7, %v4999_v4  ;;  %v4427_v41 = vand.u32 4294901760, %v4426_v48  ;;  %vm5428_vm5 = vcmask 1045509  }
 0x2c3   :  { %v5312_v6 = vrot.slane %v5311_v52, 1  ;;  %4843 = vmatpush.msrb.mxu1 %v7637_v28  ;;  %4567 = vmatmul.f32.gmra.mxu3 %v4417_v56  ;;  %v3660_v30 = vpop.f32.mrf.mxu0  ;;  %v5146_v28 = vpop.permute.xlu1 %5145  ;;  %v4435_v7 = vand.u32 4294901760, %v4434_v23 }
 0x2c4   :  { %v3748_v9 = vadd.f32 %v3747_v39, %v3699_v14  ;;  %v3661_v10 = vadd.f32 %v3660_v30, %v7742_v11  ;;  %v5255_v43 = vmul.f32 %v5146_v28, %v5031_v44 }
 0x2c5   :  { %v5313_v42 = vadd.f32 %v5312_v6, %v5311_v52  ;;  %4845 = vmatpush.msrb.mxu1 %v7647_v19  ;;  %v2439_v19 = vld [vmem:[%s7980_s4 + $0xe8] sm:$0xff] }
 0x2c6   :  { %v3785_v31 = vadd.f32 %v3784_v51, %v3748_v9  ;;  %v4669_v50 = vsel %vm2634_vm10, %v2439_v19, 0  ;;  %v5314_v60 = vsel %vm305_vm0, %v5255_v43, 0.0 }
 0x2c7   :  { %v5401_v3 = vadd.f32 %v5385_v13, %v5313_v42  ;;  %4847 = vmatpush.msrb.mxu1 %v7650_v33  ;;  %v3788_v2 = vpop.f32.mrf.mxu3  ;;  %v5151_v33 = vpop.permute.xlu2 %5150  ;;  %v7837_v26 = vand.u32 4294901760, %v4669_v50 }
 0x2c8   :  { %vm4968_vm6 = vcmp.gt.f32.partialorder %v3785_v31, 0.0  ;;  %v5000_v57 = vmul.f32 0.01, %v3785_v31  ;;  %4481 = vmatmul.f32.gmra.mxu1 %v7744_v22 }
 0x2c9   :  { %v5418_v24 = vrot.slane %v5401_v3, 6  ;;  %v3704_v56 = vpop.f32.mrf.mxu1 }
 0x2ca   :  { %v5032_v59 = vsel %vm4968_vm6, %v3785_v31, %v5000_v57  ;;  %4428 = vmatmul.f32.gmra.mxu0 %v4427_v41  ;;  %4529 = vmatmul.f32.gmra.mxu2 %v7778_v38  ;;  %v3705_v11 = vadd.f32 %v3704_v56, %v3661_v10  ;;  %v3751_v5 = vpop.f32.mrf.mxu2  ;;  %v4699_v38 = vand.u32 4294901760, %v7825_v63 }
 0x2cb   :  { %v5256_v29 = vmul.f32 %v5151_v33, %v5032_v59  ;;  %4573 = vmatmul.f32.gmra.mxu3 %v4425_v46  ;;  %v3665_v36 = vpop.f32.mrf.mxu0  ;;  %v7832_v37 = vsel %vm5419_vm7, %v5418_v24, %v7658_v25  ;;  %v2440_v25 = vld [vmem:[%s7980_s4 + $0xf0] sm:$0xff]  ;;  %v5161_v41 = vpop.permute.xlu1 %5160 }
 0x2cc   :  { %v3752_v18 = vadd.f32 %v3751_v5, %v3705_v11  ;;  %v3666_v61 = vadd.f32 %v3665_v36, %v7763_v15  ;;  %v4700_v20 = vsub.f32 %v7825_v63, %v4699_v38  ;;  %v7849_v15 = vsub.f32 %v4669_v50, %v7837_v26 }
 0x2cd   :  { %v5315_v16 = vsel %vm305_vm0, %v5256_v29, 0.0  ;;  %v4672_v39 = vsel %vm2634_vm10, %v2440_v25, 0 }
 0x2ce   :  { %v5316_v8 = vadd.f32 %v5315_v16, %v5314_v60  ;;  %v3789_v1 = vadd.f32 %v3788_v2, %v3752_v18  ;;  %v4701_v30 = vand.u32 4294901760, %v4700_v20  ;;  %v4707_v42 = vand.u32 4294901760, %v7849_v15  ;;  %v8100_v16 = vld [vmem:[#allocation29_spill] sm:$0xff] }
 0x2cf   :  { %v3792_v46 = vpop.f32.mrf.mxu3 }
 0x2d0   :  { %vm4969_vm8 = vcmp.gt.f32.partialorder %v3789_v1, 0.0  ;;  %v5001_v51 = vmul.f32 0.01, %v3789_v1  ;;  %4485 = vmatmul.f32.gmra.mxu1 %v7765_v54  ;;  %v4708_v57 = vsub.f32 %v7849_v15, %v4707_v42 }
 0x2d1   :  { %v3710_v45 = vpop.f32.mrf.mxu1 }
 0x2d2   :  { %v5033_v52 = vsel %vm4969_vm8, %v3789_v1, %v5001_v51  ;;  %4436 = vmatmul.f32.gmra.mxu0 %v4435_v7  ;;  %4534 = vmatmul.f32.gmra.mxu2 %v7809_v53  ;;  %v3711_v32 = vadd.f32 %v3710_v45, %v3666_v61  ;;  %v3755_v48 = vpop.f32.mrf.mxu2  ;;  %v7855_v53 = vand.u32 4294901760, %v4672_v39  ;;  %v4709_v23 = vand.u32 4294901760, %v4708_v57 }
 0x2d3   :  { %v5257_v4 = vmul.f32 %v7381_v40, %v5033_v52  ;;  %4579 = vmatmul.f32.gmra.mxu3 %v4433_v34  ;;  %v3833_v14 = vpop.f32.mrf.mxu0  ;;  %v2441_v40 = vld [vmem:[%s7980_s4 + $0xf8] sm:$0xff]  ;;  %v8099_v34 = vld [vmem:[#allocation17_spill] sm:$0xff]  ;;  %s5487_s4 = smov [#allocation2]  }
 0x2d4   :  { %v3756_v35 = vadd.f32 %v3755_v48, %v3711_v32  ;;  %v3834_v3 = vadd.f32 %v3833_v14, %v8099_v34  ;;  %v7867_v19 = vsub.f32 %v4672_v39, %v7855_v53  ;;  %v4675_v56 = vsel %vm2634_vm10, %v2441_v40, 0  ;;  %s5443_s29 = sshll.u32 %s5487_s4, 4  ;;  %s5444_s29 = int_to_ptr.vmem [resolvable:$true] %s5443_s29 }
 0x2d5   :  { %v5317_v6 = vsel %vm305_vm0, %v5257_v4, 0.0  ;;  %v7873_v36 = vand.u32 4294901760, %v4675_v56  ;;  %vm5422_vm10 = vcmask 1043459  }
 0x2d6   :  { %v5318_v9 = vadd.f32 %v5317_v6, %v5316_v8  ;;  %v3793_v13 = vadd.f32 %v3792_v46, %v3756_v35  ;;  %v4715_v29 = vand.u32 4294901760, %v7867_v19  ;;  %v8101_v35 = vld [vmem:[#allocation30_spill] sm:$0xff] }
 0x2d7   :  { %v3982_v44 = vpop.f32.mrf.mxu3  ;;  %v7882_v61 = vsub.f32 %v4675_v56, %v7873_v36 }
 0x2d8   :  { %vm4970_vm9 = vcmp.gt.f32.partialorder %v3793_v13, 0.0  ;;  %v5002_v31 = vmul.f32 0.01, %v3793_v13  ;;  %4489 = vmatmul.f32.gmra.mxu1 %v7792_v12  ;;  %v4716_v46 = vsub.f32 %v7867_v19, %v4715_v29 }
 0x2d9   :  { %v4723_v48 = vand.u32 4294901760, %v7882_v61 }
 0x2da   :  { %v5034_v2 = vsel %vm4970_vm9, %v3793_v13, %v5002_v31  ;;  %4612 = vmatmul.f32.vlgmr.msra.gmra.mxu0 %v7725_v62  ;;  %4702 = vmatmul.f32.vlgmr.msra.gmra.mxu2 %v4701_v30  ;;  %v3898_v28 = vpop.f32.mrf.mxu1  ;;  %v3940_v10 = vpop.f32.mrf.mxu2  ;;  %v4717_v32 = vand.u32 4294901760, %v4716_v46  ;;  %v5386_v30 = vrot.slane %v7619_v47, 3 }
 0x2db   :  { %v5258_v24 = vmul.f32 %v5161_v41, %v5034_v2  ;;  %4767 = vmatmul.f32.vlgmr.msra.gmra.mxu3 %v7815_v58  ;;  %v3899_v43 = vadd.f32 %v3898_v28, %v3834_v3 }
 0x2dc   :  { %v3841_v33 = vpop.f32.mrf.mxu0 }
 0x2dd   :  { %v5319_v59 = vsel %vm305_vm0, %v5258_v24, 0.0  ;;  %v3941_v11 = vadd.f32 %v3940_v10, %v3899_v43  ;;  %v3842_v8 = vadd.f32 %v3841_v33, %v8100_v16  ;;  %v8102_v24 = vld [vmem:[#allocation20_spill] sm:$0xff] }
 0x2de   :  { %v5320_v5 = vadd.f32 %v5319_v59, %v5318_v9 }
 0x2df   :  { %v3983_v50 = vadd.f32 %v3982_v44, %v3941_v11  ;;  %v4724_v44 = vsub.f32 %v7882_v61, %v4723_v48 }
 0x2e0   :  { %v5321_v18 = vrot.slane %v5320_v5, 4  ;;  %4649 = vmatmul.f32.vlgmr.msra.gmra.mxu1 %v7725_v62  ;;  %v3988_v60 = vpop.f32.mrf.mxu3 }
 0x2e1   :  { %v4725_v3 = vand.u32 4294901760, %v4724_v44 }
 0x2e2   :  { %v5322_v1 = vadd.f32 %v5321_v18, %v5320_v5  ;;  %4616 = vmatmul.f32.gmra.mxu0 %v7744_v22  ;;  %4710 = vmatmul.f32.gmra.mxu2 %v4709_v23  ;;  %v3902_v7 = vpop.f32.mrf.mxu1 }
 0x2e3   :  { %4771 = vmatmul.f32.gmra.mxu3 %v7837_v26  ;;  %v3903_v51 = vadd.f32 %v3902_v7, %v3842_v8  ;;  %v3945_v25 = vpop.f32.mrf.mxu2  ;;  %v8103_v8 = vld [vmem:[#allocation32_spill] sm:$0xff] }
 0x2e4   :  { %v5323_v62 = vrot.slane %v5322_v1, 2  ;;  %v3849_v45 = vpop.f32.mrf.mxu0 }
 0x2e5   :  { %v3946_v20 = vadd.f32 %v3945_v25, %v3903_v51  ;;  %v3850_v6 = vadd.f32 %v3849_v45, %v8101_v35 }
 0x2e6   :  { %v5324_v52 = vadd.f32 %v5323_v62, %v5322_v1 }
 0x2e7   :  { %v3989_v4 = vadd.f32 %v3988_v60, %v3946_v20  ;;  %v8104_v20 = vld [vmem:[#allocation33_spill] sm:$0xff] }
 0x2e8   :  { %v5325_v14 = vrot.slane %v5324_v52, 1  ;;  %4653 = vmatmul.f32.gmra.mxu1 %v7744_v22  ;;  %v3994_v39 = vpop.f32.mrf.mxu3 }
 0x2ea   :  { %v5326_v9 = vadd.f32 %v5325_v14, %v5324_v52  ;;  %4620 = vmatmul.f32.gmra.mxu0 %v7765_v54  ;;  %4718 = vmatmul.f32.gmra.mxu2 %v4717_v32  ;;  %v3906_v13 = vpop.f32.mrf.mxu1 }
 0x2eb   :  { %4775 = vmatmul.f32.gmra.mxu3 %v7855_v53  ;;  %v3907_v31 = vadd.f32 %v3906_v13, %v3850_v6  ;;  %v3950_v40 = vpop.f32.mrf.mxu2 }
 0x2ec   :  { %v5402_v41 = vadd.f32 %v5386_v30, %v5326_v9  ;;  %v3857_v22 = vpop.f32.mrf.mxu0 }
 0x2ed   :  { %v3951_v34 = vadd.f32 %v3950_v40, %v3907_v31  ;;  %v3858_v43 = vadd.f32 %v3857_v22, %v8102_v24 }
 0x2ee   :  { %v5421_v2 = vrot.slane %v5402_v41, 5  ;;  %v8105_v41 = vld [vmem:[#allocation21_spill] sm:$0xff] }
 0x2ef   :  { %v3995_v28 = vadd.f32 %v3994_v39, %v3951_v34 }
 0x2f0   :  { %4657 = vmatmul.f32.gmra.mxu1 %v7765_v54  ;;  %v4000_v10 = vpop.f32.mrf.mxu3  ;;  %v7896_v57 = vsel %vm5422_vm10, %v5421_v2, %v7832_v37 }
 0x2f2   :  { %4624 = vmatmul.f32.gmra.mxu0 %v7792_v12  ;;  %4726 = vmatmul.f32.gmra.mxu2 %v4725_v3  ;;  %v3910_v56 = vpop.f32.mrf.mxu1  ;;  %v5176_v3 = vpop.permute.xlu1 %5175 }
 0x2f3   :  { %4779 = vmatmul.f32.gmra.mxu3 %v7873_v36  ;;  %v3911_v33 = vadd.f32 %v3910_v56, %v3858_v43  ;;  %v3955_v59 = vpop.f32.mrf.mxu2 }
 0x2f4   :  { %v4033_v11 = vpop.f32.mrf.mxu0 }
 0x2f5   :  { %v3956_v5 = vadd.f32 %v3955_v59, %v3911_v33  ;;  %v4034_v23 = vadd.f32 %v4033_v11, %v3983_v50  ;;  %v8106_v59 = vld [vmem:[#allocation34_spill] sm:$0xff] }
 0x2f7   :  { %v4001_v18 = vadd.f32 %v4000_v10, %v3956_v5 }
 0x2f8   :  { %4661 = vmatmul.f32.gmra.mxu1 %v7792_v12  ;;  %v4188_v54 = vpop.f32.mrf.mxu3 }
 0x2fa   :  { %4809 = vmatmul.f32.vlgmr.msrb.gmra.mxu0 %v7825_v63  ;;  %4902 = vmatmul.f32.vlgmr.msrb.gmra.mxu2 %v7815_v58 }
 0x2fb   :  { %v4070_v37 = vpop.f32.mrf.mxu1  ;;  %v4123_v60 = vpop.f32.mrf.mxu2  ;;  %4939 = vmatmul.f32.vlgmr.msrb.gmra.mxu3 %v7815_v58 }
 0x2fc   :  { %v4071_v16 = vadd.f32 %v4070_v37, %v4034_v23  ;;  %v4124_v1 = vadd.f32 %v4123_v60, %v8103_v8 }
 0x2fd   :  { %v4037_v7 = vpop.f32.mrf.mxu0 }
 0x2fe   :  { %v4038_v46 = vadd.f32 %v4037_v7, %v3989_v4  ;;  %v4189_v51 = vadd.f32 %v4188_v54, %v4124_v1  ;;  %v5003_v25 = vmul.f32 0.01, %v4071_v16  ;;  %vm4971_vm11 = vcmp.gt.f32.partialorder %v4071_v16, 0.0  ;;  %v5166_v4 = vpop.permute.xlu2 %5165 }
 0x300   :  { %4851 = vmatmul.f32.vlgmr.msrb.gmra.mxu1 %v4699_v38  ;;  %v5035_v58 = vsel %vm4971_vm11, %v4071_v16, %v5003_v25 }
 0x301   :  { %v4192_v12 = vpop.f32.mrf.mxu3  ;;  %v5259_v38 = vmul.f32 %v5166_v4, %v5035_v58 }
 0x302   :  { %4814 = vmatmul.f32.gmra.mxu0 %v7849_v15  ;;  %4906 = vmatmul.f32.gmra.mxu2 %v7837_v26 }
 0x303   :  { %v4074_v50 = vpop.f32.mrf.mxu1  ;;  %4943 = vmatmul.f32.gmra.mxu3 %v7837_v26  ;;  %v5327_v26 = vsel %vm305_vm0, %v5259_v38, 0.0 }
 0x304   :  { %v4075_v62 = vadd.f32 %v4074_v50, %v4038_v46  ;;  %v4131_v45 = vpop.f32.mrf.mxu2 }
 0x305   :  { %v4132_v52 = vadd.f32 %v4131_v45, %v8104_v20  ;;  %v4041_v32 = vpop.f32.mrf.mxu0 }
 0x306   :  { %vm4972_vm12 = vcmp.gt.f32.partialorder %v4075_v62, 0.0  ;;  %v5004_v14 = vmul.f32 0.01, %v4075_v62  ;;  %v4042_v63 = vadd.f32 %v4041_v32, %v3995_v28 }
 0x307   :  { %v4193_v39 = vadd.f32 %v4192_v12, %v4132_v52 }
 0x308   :  { %v5036_v35 = vsel %vm4972_vm12, %v4075_v62, %v5004_v14  ;;  %4857 = vmatmul.f32.gmra.mxu1 %v4707_v42  ;;  %vm5431_vm12 = vcmask 1046534  }
 0x309   :  { %v5260_v6 = vmul.f32 %v7407_v27, %v5036_v35  ;;  %v4196_v30 = vpop.f32.mrf.mxu3 }
 0x30a   :  { %4819 = vmatmul.f32.gmra.mxu0 %v7867_v19  ;;  %4910 = vmatmul.f32.gmra.mxu2 %v7855_v53 }
 0x30b   :  { %v5328_v9 = vsel %vm305_vm0, %v5260_v6, 0.0  ;;  %v4078_v13 = vpop.f32.mrf.mxu1  ;;  %4947 = vmatmul.f32.gmra.mxu3 %v7855_v53  ;;  %v5387_v6 = vrot.slane %v7619_v47, 4 }
 0x30c   :  { %v5329_v44 = vadd.f32 %v5328_v9, %v5327_v26  ;;  %v4079_v31 = vadd.f32 %v4078_v13, %v4042_v63  ;;  %v4139_v40 = vpop.f32.mrf.mxu2 }
 0x30d   :  { %v4140_v15 = vadd.f32 %v4139_v40, %v8105_v41  ;;  %v4045_v42 = vpop.f32.mrf.mxu0 }
 0x30e   :  { %vm4973_vm13 = vcmp.gt.f32.partialorder %v4079_v31, 0.0  ;;  %v5005_v27 = vmul.f32 0.01, %v4079_v31  ;;  %v4046_v22 = vadd.f32 %v4045_v42, %v4001_v18  ;;  %v5181_v18 = vpop.permute.xlu2 %5180 }
 0x30f   :  { %v4197_v34 = vadd.f32 %v4196_v30, %v4140_v15 }
 0x310   :  { %v5037_v2 = vsel %vm4973_vm13, %v4079_v31, %v5005_v27  ;;  %4863 = vmatmul.f32.gmra.mxu1 %v4715_v29 }
 0x311   :  { %v5261_v28 = vmul.f32 %v5176_v3, %v5037_v2  ;;  %v4200_v10 = vpop.f32.mrf.mxu3 }
 0x312   :  { %4824 = vmatmul.f32.gmra.mxu0 %v7882_v61  ;;  %4914 = vmatmul.f32.gmra.mxu2 %v7873_v36 }
 0x313   :  { %v5330_v53 = vsel %vm305_vm0, %v5261_v28, 0.0  ;;  %v4082_v24 = vpop.f32.mrf.mxu1  ;;  %4951 = vmatmul.f32.gmra.mxu3 %v7873_v36 }
 0x314   :  { %v5331_v43 = vadd.f32 %v5330_v53, %v5329_v44  ;;  %v4083_v56 = vadd.f32 %v4082_v24, %v4046_v22  ;;  %v4147_v33 = vpop.f32.mrf.mxu2  ;;  %v5191_v44 = vpop.permute.xlu1 %5190 }
 0x315   :  { %v4148_v11 = vadd.f32 %v4147_v33, %v8106_v59  ;;  %v4230_v5 = vpop.f32.mrf.mxu0 }
 0x316   :  { %vm4974_vm14 = vcmp.gt.f32.partialorder %v4083_v56, 0.0  ;;  %v5006_v19 = vmul.f32 0.01, %v4083_v56  ;;  %v4231_v29 = vadd.f32 %v4230_v5, %v4189_v51  ;;  %v7931_v35 = vpop.permute.xlu2 %5205 }
 0x317   :  { %v4201_v23 = vadd.f32 %v4200_v10, %v4148_v11 }
 0x318   :  { %v5038_v54 = vsel %vm4974_vm14, %v4083_v56, %v5006_v19  ;;  %4869 = vmatmul.f32.gmra.mxu1 %v4723_v48 }
 0x319   :  { %v5262_v37 = vmul.f32 %v5181_v18, %v5038_v54  ;;  %v4360_v60 = vpop.f32.mrf.mxu3 }
 0x31b   :  { %v5332_v16 = vsel %vm305_vm0, %v5262_v37, 0.0 }
 0x31c   :  { %v5333_v36 = vadd.f32 %v5332_v16, %v5331_v43  ;;  %v4272_v8 = vpop.f32.mrf.mxu1  ;;  %v4323_v1 = vpop.f32.mrf.mxu2 }
 0x31d   :  { %v4273_v7 = vadd.f32 %v4272_v8, %v4231_v29  ;;  %v5196_v5 = vpop.permute.xlu1 %5195 }
 0x31e   :  { %v5334_v46 = vrot.slane %v5333_v36, 4  ;;  %v4235_v25 = vpop.f32.mrf.mxu0  ;;  %v7940_v33 = vpop.permute.xlu2 %5225 }
 0x31f   :  { %v4324_v12 = vadd.f32 %v4323_v1, %v4273_v7  ;;  %v4236_v50 = vadd.f32 %v4235_v25, %v4193_v39  ;;  %v8107_v1 = vld [vmem:[#allocation35_spill] sm:$0xff] }
 0x320   :  { %v5335_v58 = vadd.f32 %v5334_v46, %v5333_v36 }
 0x321   :  { %v4361_v51 = vadd.f32 %v4360_v60, %v4324_v12 }
 0x322   :  { %v5336_v62 = vrot.slane %v5335_v58, 2  ;;  %v4364_v45 = vpop.f32.mrf.mxu3 }
 0x323   :  { %v5007_v61 = vmul.f32 0.01, %v4361_v51  ;;  %vm4975_vm15 = vcmp.gt.f32.partialorder %v4361_v51, 0.0 }
 0x324   :  { %v5337_v20 = vadd.f32 %v5336_v62, %v5335_v58  ;;  %v4278_v52 = vpop.f32.mrf.mxu1 }
 0x325   :  { %v4279_v48 = vadd.f32 %v4278_v52, %v4236_v50  ;;  %v4327_v32 = vpop.f32.mrf.mxu2  ;;  %v5039_v39 = vsel %vm4975_vm15, %v4361_v51, %v5007_v61  ;;  %vm5434_vm15 = vcmask 1047559  }
 0x326   :  { %v5338_v4 = vrot.slane %v5337_v20, 1  ;;  %v4240_v14 = vpop.f32.mrf.mxu0  ;;  %v5263_v40 = vmul.f32 %v7442_v17, %v5039_v39  ;;  %v5201_v8 = vpop.permute.xlu2 %5200 }
 0x327   :  { %v4328_v63 = vadd.f32 %v4327_v32, %v4279_v48  ;;  %v4241_v38 = vadd.f32 %v4240_v14, %v4197_v34  ;;  %v8108_v32 = vld [vmem:[#allocation25_spill] sm:$0xff] }
 0x328   :  { %v5339_v30 = vadd.f32 %v5338_v4, %v5337_v20  ;;  %v5340_v53 = vsel %vm305_vm0, %v5263_v40, 0.0  ;;  %v8109_v40 = vld [vmem:[#allocation36_spill] sm:$0xff] }
 0x329   :  { %v4365_v26 = vadd.f32 %v4364_v45, %v4328_v63 }
 0x32a   :  { %v4368_v9 = vpop.f32.mrf.mxu3  ;;  %v5403_v13 = vadd.f32 %v5387_v6, %v5339_v30 }
 0x32b   :  { %vm4976_vm1 = vcmp.gt.f32.partialorder %v4365_v26, 0.0  ;;  %v5008_v31 = vmul.f32 0.01, %v4365_v26 }
 0x32c   :  { %v4284_v41 = vpop.f32.mrf.mxu1  ;;  %v5424_v15 = vrot.slane %v5403_v13, 4 }
 0x32d   :  { %v5040_v42 = vsel %vm4976_vm1, %v4365_v26, %v5008_v31  ;;  %v4285_v27 = vadd.f32 %v4284_v41, %v4241_v38  ;;  %v4331_v22 = vpop.f32.mrf.mxu2 }
 0x32e   :  { %v5264_v34 = vmul.f32 %v5191_v44, %v5040_v42  ;;  %v4245_v3 = vpop.f32.mrf.mxu0  ;;  %v7936_v2 = vsel %vm5425_vm2, %v5424_v15, %v7896_v57  ;;  %v5388_v15 = vrot.slane %v7619_v47, 5 }
 0x32f   :  { %v4332_v28 = vadd.f32 %v4331_v22, %v4285_v27  ;;  %v4246_v10 = vadd.f32 %v4245_v3, %v4201_v23 }
 0x330   :  { %v5341_v24 = vsel %vm305_vm0, %v5264_v34, 0.0 }
 0x331   :  { %v5342_v43 = vadd.f32 %v5341_v24, %v5340_v53  ;;  %v4369_v56 = vadd.f32 %v4368_v9, %v4332_v28 }
 0x332   :  { %v4372_v17 = vpop.f32.mrf.mxu3 }
 0x333   :  { %vm4977_vm3 = vcmp.gt.f32.partialorder %v4369_v56, 0.0  ;;  %v5009_v59 = vmul.f32 0.01, %v4369_v56 }
 0x334   :  { %v4290_v11 = vpop.f32.mrf.mxu1 }
 0x335   :  { %v5041_v19 = vsel %vm4977_vm3, %v4369_v56, %v5009_v59  ;;  %v4291_v29 = vadd.f32 %v4290_v11, %v4246_v10  ;;  %v4335_v18 = vpop.f32.mrf.mxu2 }
 0x336   :  { %v5265_v57 = vmul.f32 %v5196_v5, %v5041_v19  ;;  %v4413_v54 = vpop.f32.mrf.mxu0 }
 0x337   :  { %v4336_v37 = vadd.f32 %v4335_v18, %v4291_v29  ;;  %v4414_v7 = vadd.f32 %v4413_v54, %v8107_v1 }
 0x338   :  { %v5343_v23 = vsel %vm305_vm0, %v5265_v57, 0.0 }
 0x339   :  { %v5344_v60 = vadd.f32 %v5343_v23, %v5342_v43  ;;  %v4373_v16 = vadd.f32 %v4372_v17, %v4336_v37 }
 0x33a   :  { %v4562_v46 = vpop.f32.mrf.mxu3 }
 0x33b   :  { %vm4978_vm4 = vcmp.gt.f32.partialorder %v4373_v16, 0.0  ;;  %v5010_v36 = vmul.f32 0.01, %v4373_v16 }
 0x33d   :  { %v5042_v25 = vsel %vm4978_vm4, %v4373_v16, %v5010_v36  ;;  %v4478_v12 = vpop.f32.mrf.mxu1  ;;  %v4520_v50 = vpop.f32.mrf.mxu2 }
 0x33e   :  { %v5266_v58 = vmul.f32 %v5201_v8, %v5042_v25  ;;  %v4479_v51 = vadd.f32 %v4478_v12, %v4414_v7 }
 0x33f   :  { %v4421_v62 = vpop.f32.mrf.mxu0 }
 0x340   :  { %v5345_v45 = vsel %vm305_vm0, %v5266_v58, 0.0  ;;  %v4521_v20 = vadd.f32 %v4520_v50, %v4479_v51  ;;  %v4422_v4 = vadd.f32 %v4421_v62, %v8108_v32 }
 0x341   :  { %v5346_v52 = vadd.f32 %v5345_v45, %v5344_v60 }
 0x342   :  { %v4563_v61 = vadd.f32 %v4562_v46, %v4521_v20  ;;  %v8110_v46 = vld [vmem:[#allocation37_spill] sm:$0xff] }
 0x343   :  { %v5347_v48 = vrot.slane %v5346_v52, 4 }
 0x345   :  { %v5348_v14 = vadd.f32 %v5347_v48, %v5346_v52  ;;  %v4482_v63 = vpop.f32.mrf.mxu1  ;;  %v4525_v38 = vpop.f32.mrf.mxu2 }
 0x346   :  { %v4483_v6 = vadd.f32 %v4482_v63, %v4422_v4  ;;  %v4568_v30 = vpop.f32.mrf.mxu3 }
 0x347   :  { %v5349_v39 = vrot.slane %v5348_v14, 2  ;;  %v4429_v26 = vpop.f32.mrf.mxu0 }
 0x348   :  { %v4526_v9 = vadd.f32 %v4525_v38, %v4483_v6  ;;  %v4430_v41 = vadd.f32 %v4429_v26, %v8109_v40  ;;  %v5216_v6 = vpop.permute.xlu1 %5215 }
 0x349   :  { %v5350_v13 = vadd.f32 %v5349_v39, %v5348_v14 }
 0x34a   :  { %v4569_v44 = vadd.f32 %v4568_v30, %v4526_v9 }
 0x34b   :  { %v5351_v31 = vrot.slane %v5350_v13, 1 }
 0x34d   :  { %v5352_v42 = vadd.f32 %v5351_v31, %v5350_v13  ;;  %v4486_v27 = vpop.f32.mrf.mxu1  ;;  %v4530_v22 = vpop.f32.mrf.mxu2  ;;  %v8111_v31 = vld [vmem:[#allocation28_spill] sm:$0xff] }
 0x34e   :  { %v4487_v34 = vadd.f32 %v4486_v27, %v4430_v41  ;;  %v4574_v3 = vpop.f32.mrf.mxu3 }
 0x34f   :  { %v4437_v28 = vpop.f32.mrf.mxu0  ;;  %v5404_v10 = vadd.f32 %v5388_v15, %v5352_v42 }
 0x350   :  { %v4531_v53 = vadd.f32 %v4530_v22, %v4487_v34  ;;  %v4438_v25 = vadd.f32 %v4437_v28, %v8110_v46  ;;  %v5221_v34 = vpop.permute.xlu1 %5220 }
 0x351   :  { %v5427_v24 = vrot.slane %v5404_v10, 3 }
 0x352   :  { %v4575_v43 = vadd.f32 %v4574_v3, %v4531_v53 }
 0x353   :  { %v7949_v56 = vsel %vm5428_vm5, %v5427_v24, %v7936_v2 }
 0x355   :  { %v4490_v17 = vpop.f32.mrf.mxu1  ;;  %v4535_v59 = vpop.f32.mrf.mxu2 }
 0x356   :  { %v4580_v11 = vpop.f32.mrf.mxu3  ;;  %v4491_v58 = vadd.f32 %v4490_v17, %v4438_v25 }
 0x357   :  { %v4613_v5 = vpop.f32.mrf.mxu0 }
 0x358   :  { %v4614_v19 = vadd.f32 %v4613_v5, %v4563_v61  ;;  %v4536_v32 = vadd.f32 %v4535_v59, %v4491_v58  ;;  %v8112_v59 = vld [vmem:[#allocation38_spill] sm:$0xff] }
 0x35d   :  { %v4650_v29 = vpop.f32.mrf.mxu1  ;;  %v4703_v18 = vpop.f32.mrf.mxu2 }
 0x35e   :  { %v4651_v57 = vadd.f32 %v4650_v29, %v4614_v19  ;;  %v4768_v54 = vpop.f32.mrf.mxu3  ;;  %v4704_v40 = vadd.f32 %v4703_v18, %v8111_v31 }
 0x35f   :  { %v4617_v37 = vpop.f32.mrf.mxu0 }
 0x360   :  { %v5011_v23 = vmul.f32 0.01, %v4651_v57  ;;  %vm4979_vm6 = vcmp.gt.f32.partialorder %v4651_v57, 0.0  ;;  %v4618_v60 = vadd.f32 %v4617_v37, %v4569_v44  ;;  %v4769_v3 = vadd.f32 %v4768_v54, %v4704_v40 }
 0x362   :  { %v5043_v8 = vsel %vm4979_vm6, %v4651_v57, %v5011_v23 }
 0x363   :  { %v5267_v50 = vmul.f32 %v7931_v35, %v5043_v8  ;;  %v4581_v35 = vadd.f32 %v4580_v11, %v4536_v32 }
 0x365   :  { %v4654_v16 = vpop.f32.mrf.mxu1  ;;  %v4711_v36 = vpop.f32.mrf.mxu2  ;;  %v5353_v20 = vsel %vm305_vm0, %v5267_v50, 0.0 }
 0x366   :  { %v4655_v1 = vadd.f32 %v4654_v16, %v4618_v60  ;;  %v4772_v7 = vpop.f32.mrf.mxu3  ;;  %v4712_v11 = vadd.f32 %v4711_v36, %v8112_v59 }
 0x367   :  { %v4621_v2 = vpop.f32.mrf.mxu0 }
 0x368   :  { %vm4980_vm7 = vcmp.gt.f32.partialorder %v4655_v1, 0.0  ;;  %v5012_v12 = vmul.f32 0.01, %v4655_v1  ;;  %v4622_v45 = vadd.f32 %v4621_v2, %v4575_v43  ;;  %v4773_v23 = vadd.f32 %v4772_v7, %v4712_v11 }
 0x36a   :  { %v5044_v51 = vsel %vm4980_vm7, %v4655_v1, %v5012_v12 }
 0x36b   :  { %v5268_v62 = vmul.f32 %v7485_v0, %v5044_v51 }
 0x36d   :  { %v5354_v52 = vsel %vm305_vm0, %v5268_v62, 0.0  ;;  %v4658_v61 = vpop.f32.mrf.mxu1  ;;  %v4719_v48 = vpop.f32.mrf.mxu2 }
 0x36e   :  { %v5355_v4 = vadd.f32 %v5354_v52, %v5353_v20  ;;  %v4659_v14 = vadd.f32 %v4658_v61, %v4622_v45  ;;  %v4776_v63 = vpop.f32.mrf.mxu3  ;;  %v4720_v46 = vadd.f32 %v4719_v48, %v7324_v49  ;;  %v5389_v45 = vrot.slane %v7619_v47, 6 }
 0x36f   :  { %v4625_v38 = vpop.f32.mrf.mxu0 }
 0x370   :  { %vm4981_vm8 = vcmp.gt.f32.partialorder %v4659_v14, 0.0  ;;  %v5013_v30 = vmul.f32 0.01, %v4659_v14  ;;  %v4626_v9 = vadd.f32 %v4625_v38, %v4581_v35  ;;  %v4777_v20 = vadd.f32 %v4776_v63, %v4720_v46 }
 0x372   :  { %v5045_v39 = vsel %vm4981_vm8, %v4659_v14, %v5013_v30 }
 0x373   :  { %v5269_v26 = vmul.f32 %v5216_v6, %v5045_v39  ;;  %v8113_v6 = vld [vmem:[#allocation31_spill] sm:$0xff] }
 0x375   :  { %v5356_v0 = vsel %vm305_vm0, %v5269_v26, 0.0  ;;  %v4662_v13 = vpop.f32.mrf.mxu1  ;;  %v4727_v44 = vpop.f32.mrf.mxu2 }
 0x376   :  { %v5357_v41 = vadd.f32 %v5356_v0, %v5355_v4  ;;  %v4663_v15 = vadd.f32 %v4662_v13, %v4626_v9  ;;  %v4780_v42 = vpop.f32.mrf.mxu3  ;;  %v4728_v30 = vadd.f32 %v4727_v44, %v8113_v6 }
 0x377   :  { %v4810_v27 = vpop.f32.mrf.mxu0 }
 0x378   :  { %vm4982_vm9 = vcmp.gt.f32.partialorder %v4663_v15, 0.0  ;;  %v5014_v22 = vmul.f32 0.01, %v4663_v15  ;;  %v4811_v53 = vadd.f32 %v4810_v27, %v4769_v3 }
 0x37a   :  { %v5046_v28 = vsel %vm4982_vm9, %v4663_v15, %v5014_v22 }
 0x37b   :  { %v5270_v10 = vmul.f32 %v5221_v34, %v5046_v28 }
 0x37d   :  { %v5358_v24 = vsel %vm305_vm0, %v5270_v10, 0.0  ;;  %v4852_v43 = vpop.f32.mrf.mxu1  ;;  %v4903_v17 = vpop.f32.mrf.mxu2 }
 0x37e   :  { %v5359_v5 = vadd.f32 %v5358_v24, %v5357_v41  ;;  %v4853_v19 = vadd.f32 %v4852_v43, %v4811_v53  ;;  %v4940_v29 = vpop.f32.mrf.mxu3 }
 0x37f   :  { %v4815_v18 = vpop.f32.mrf.mxu0 }
 0x380   :  { %v5360_v57 = vrot.slane %v5359_v5, 4  ;;  %v4904_v37 = vadd.f32 %v4903_v17, %v4853_v19  ;;  %v4816_v54 = vadd.f32 %v4815_v18, %v4773_v23 }
 0x382   :  { %v5361_v60 = vadd.f32 %v5360_v57, %v5359_v5  ;;  %v4941_v16 = vadd.f32 %v4940_v29, %v4904_v37 }
 0x384   :  { %v5362_v8 = vrot.slane %v5361_v60, 2  ;;  %v5015_v12 = vmul.f32 0.01, %v4941_v16  ;;  %vm4983_vm10 = vcmp.gt.f32.partialorder %v4941_v16, 0.0 }
 0x385   :  { %v4858_v1 = vpop.f32.mrf.mxu1  ;;  %v4907_v2 = vpop.f32.mrf.mxu2 }
 0x386   :  { %v5363_v25 = vadd.f32 %v5362_v8, %v5361_v60  ;;  %v4859_v50 = vadd.f32 %v4858_v1, %v4816_v54  ;;  %v4944_v58 = vpop.f32.mrf.mxu3  ;;  %v5047_v7 = vsel %vm4983_vm10, %v4941_v16, %v5015_v12  ;;  %v5390_v16 = vrot.slane %v7619_v47, 7 }
 0x387   :  { %v4820_v36 = vpop.f32.mrf.mxu0  ;;  %v5271_v49 = vmul.f32 %v7940_v33, %v5047_v7  ;;  %v4781_v33 = vadd.f32 %v4780_v42, %v4728_v30  ;;  %v5241_v42 = vpop.permute.xlu2 %5240 }
 0x388   :  { %v5364_v51 = vrot.slane %v5363_v25, 1  ;;  %v4908_v62 = vadd.f32 %v4907_v2, %v4859_v50  ;;  %v4821_v32 = vadd.f32 %v4820_v36, %v4777_v20 }
 0x389   :  { %v5366_v31 = vsel %vm305_vm0, %v5271_v49, 0.0 }
 0x38a   :  { %v4945_v52 = vadd.f32 %v4944_v58, %v4908_v62  ;;  %v5365_v61 = vadd.f32 %v5364_v51, %v5363_v25 }
 0x38c   :  { %vm4984_vm11 = vcmp.gt.f32.partialorder %v4945_v52, 0.0  ;;  %v5016_v4 = vmul.f32 0.01, %v4945_v52  ;;  %v5405_v14 = vadd.f32 %v5389_v45, %v5365_v61 }
 0x38d   :  { %v4864_v48 = vpop.f32.mrf.mxu1  ;;  %v4911_v38 = vpop.f32.mrf.mxu2 }
 0x38e   :  { %v5048_v35 = vsel %vm4984_vm11, %v4945_v52, %v5016_v4  ;;  %v4865_v39 = vadd.f32 %v4864_v48, %v4821_v32  ;;  %v4948_v26 = vpop.f32.mrf.mxu3  ;;  %v5430_v9 = vrot.slane %v5405_v14, 2 }
 0x38f   :  { %v5272_v63 = vmul.f32 %v7519_v21, %v5048_v35  ;;  %v4825_v41 = vpop.f32.mrf.mxu0 }
 0x390   :  { %v4912_v0 = vadd.f32 %v4911_v38, %v4865_v39  ;;  %v5432_v13 = vsel %vm5431_vm12, %v5430_v9, %v7949_v56  ;;  %v4826_v22 = vadd.f32 %v4825_v41, %v4781_v33 }
 0x391   :  { %v5367_v40 = vsel %vm305_vm0, %v5272_v63, 0.0 }
 0x392   :  { %v5368_v15 = vadd.f32 %v5367_v40, %v5366_v31  ;;  %v4949_v27 = vadd.f32 %v4948_v26, %v4912_v0 }
 0x394   :  { %vm4985_vm13 = vcmp.gt.f32.partialorder %v4949_v27, 0.0  ;;  %v5017_v44 = vmul.f32 0.01, %v4949_v27 }
 0x395   :  { %v4870_v34 = vpop.f32.mrf.mxu1  ;;  %v4915_v3 = vpop.f32.mrf.mxu2 }
 0x396   :  { %v5049_v28 = vsel %vm4985_vm13, %v4949_v27, %v5017_v44  ;;  %v4871_v10 = vadd.f32 %v4870_v34, %v4826_v22  ;;  %v4952_v53 = vpop.f32.mrf.mxu3 }
 0x397   :  { %v5273_v21 = vmul.f32 %v7574_v55, %v5049_v28 }
 0x398   :  { %v4916_v24 = vadd.f32 %v4915_v3, %v4871_v10 }
 0x399   :  { %v5369_v56 = vsel %vm305_vm0, %v5273_v21, 0.0 }
 0x39a   :  { %v5370_v43 = vadd.f32 %v5369_v56, %v5368_v15  ;;  %v4953_v17 = vadd.f32 %v4952_v53, %v4916_v24 }
 0x39c   :  { %vm4986_vm14 = vcmp.gt.f32.partialorder %v4953_v17, 0.0  ;;  %v5018_v59 = vmul.f32 0.01, %v4953_v17 }
 0x39e   :  { %v5050_v11 = vsel %vm4986_vm14, %v4953_v17, %v5018_v59 }
 0x39f   :  { %v5274_v5 = vmul.f32 %v5241_v42, %v5050_v11 }
 0x3a1   :  { %v5371_v19 = vsel %vm305_vm0, %v5274_v5, 0.0 }
 0x3a2   :  { %v5372_v29 = vadd.f32 %v5371_v19, %v5370_v43 }
 0x3a4   :  { %v5373_v18 = vrot.slane %v5372_v29, 4 }
 0x3a6   :  { %v5374_v57 = vadd.f32 %v5373_v18, %v5372_v29 }
 0x3a8   :  { %v5375_v37 = vrot.slane %v5374_v57, 2 }
 0x3aa   :  { %v5376_v23 = vadd.f32 %v5375_v37, %v5374_v57 }
 0x3ac   :  { %v5377_v60 = vrot.slane %v5376_v23, 1 }
 0x3ae   :  { %v5378_v55 = vadd.f32 %v5377_v60, %v5376_v23 }
 0x3b0   :  { %v5406_v8 = vadd.f32 %v5390_v16, %v5378_v55 }
 0x3b2   :  { %v5433_v54 = vrot.slane %v5406_v8, 1 }
 0x3b4   :  { %v5435_v1 = vsel %vm5434_vm15, %v5433_v54, %v5432_v13 }
 0x3b5   :  { %5437 = vst.msk [vmem:[#allocation2] sm:$0xff] %vm305_vm0, %v5435_v1 }
 0x3b6   :  { %5448 = dma.vmem_to_hbm [thread:$0]  %s5444_s29, 128, %s5446_s0, [#allocation3]  }
 0x3b7   :  { %5484 = dma.done.wait [#allocation3], 128  }
 0x3b8   :  { %5485 = vsyncadd [#allocation3], 4294967168 }
 0x3b9   :  { %5453 = vsyncpa [#allocation3], 1 }

</bundles_post_ra>
